<compile_context>
chip_gen: v6e
topology: v6e:2x2x1
jax: 0.10.0
libtpu: 0.0.40
codegen_flags: <defaults>
</compile_context>

<pallas_src>
import jax
import jax.numpy as jnp
from jax.experimental import pallas as pl
from jax.experimental.pallas import tpu as pltpu


def _sae_kernel(x_ref, w_enc_ref, b_enc_ref, w_dec_ref, b_dec_ref,
                acts_ref, l2ps_ref, l1ps_ref,
                xcent_sc, recon_acc, l1_acc):
    """Grid = (batch_tile_idx i [parallel], hidden_tile_idx h [arbitrary])."""
    h = pl.program_id(1)
    last_h = pl.num_programs(1) - 1

    # --- once per batch tile: hoist centering + casts out of the hidden loop
    @pl.when(h == 0)
    def _():
        x_f32 = x_ref[...].astype(jnp.float32)                     # [TB, D_in]
        xcent_sc[...] = (x_f32 - b_dec_ref[...]).astype(xcent_sc.dtype)
        recon_acc[...] = jnp.zeros_like(recon_acc)
        l1_acc[...] = jnp.zeros_like(l1_acc)

    # --- encoder for this hidden tile: relu(x_cent @ W_enc[:, h] + b_enc[h])
    x_cent = xcent_sc[...]                                          # [TB, D_in]
    pre = jnp.dot(x_cent, w_enc_ref[...],
                  preferred_element_type=jnp.float32) + b_enc_ref[...]
    acts = jnp.maximum(pre, 0.0)                                    # [TB, TH] f32
    acts_ref[...] = acts.astype(acts_ref.dtype)

    # --- partial decode, accumulated in place (MRB-friendly on v7x)
    recon_acc[...] += jnp.dot(acts.astype(w_dec_ref.dtype), w_dec_ref[...],
                              preferred_element_type=jnp.float32)   # [TB, D_in]

    # acts >= 0 after ReLU -> |acts|.sum == acts.sum.  Accumulate in the
    # natural (TB, 1) layout; lane relayout is deferred to the last step.
    l1_acc[...] += jnp.sum(acts, axis=-1, keepdims=True)

    # --- once per batch tile: finalize per-sample losses (lane-dense rows)
    @pl.when(h == last_h)
    def _():
        x_f32 = x_ref[...].astype(jnp.float32)
        recon = recon_acc[...] + b_dec_ref[...]                     # [TB, D_in]
        diff = recon - x_f32
        l2ps_ref[...] = jnp.sum(diff * diff, axis=-1)[None, :].astype(
            l2ps_ref.dtype)
        l1ps_ref[...] = jnp.sum(l1_acc[...], axis=-1)[None, :].astype(
            l1ps_ref.dtype)


def sae_forward(x, w_enc, b_enc, w_dec, b_dec, *, l1_coeff,
                batch_tile=512, hidden_tile=512,
                compute_dtype=jnp.bfloat16, acts_dtype=None):
    """Returns (loss[1], acts[B,H], penalty(None), l2_error_per_sample[B,1]).

    batch_tile: rows per grid step (weights are re-streamed once per batch
      tile, so larger is better on v6e/v7x until VMEM runs out; tiles are
      auto-shrunk against the device VMEM budget).
    hidden_tile: dictionary columns per grid step (multiple of 128).
    compute_dtype: weight / matmul-input dtype (bf16 for MXU throughput,
      float32 for exact fp32 semantics).  Accumulation is always float32.
    """
    B, D_in = x.shape
    H = w_enc.shape[1]
    if acts_dtype is None:
        acts_dtype = compute_dtype

    batch_tile = min(batch_tile, B)
    hidden_tile = min(hidden_tile, H)

    # v7x megacore: guarantee >= 2 batch tiles when B permits so the
    # "parallel" axis actually shards across both TensorCores (free on
    # single-TC v5e/v6e).
    if B // batch_tile < 2 and B >= 16 and (B // 2) % 8 == 0:
        batch_tile = B // 2

    # Generation-aware VMEM budget (≈128 MiB on v5e/v6e, 64 MiB per TC on v7x).
    try:
        vmem_cap = int(pltpu.get_tpu_info().vmem_capacity_bytes)
    except Exception:
        vmem_cap = 128 << 20
    vmem_budget = max(int(vmem_cap * 0.75), 32 << 20)

    cb = jnp.dtype(compute_dtype).itemsize
    ab = jnp.dtype(acts_dtype).itemsize

    def footprint(tb, th):
        return (2 * tb * D_in * 4                # x tile (f32, double-buffered)
                + 2 * D_in * th * cb             # W_enc tile
                + 2 * th * D_in * cb             # W_dec tile
                + 2 * (th + D_in) * 4            # biases
                + 2 * tb * th * ab               # acts out tile
                + 4 * tb * 4                     # l2/l1 output rows
                + tb * D_in * cb                 # x_cent scratch
                + tb * D_in * 4                  # recon accumulator
                + tb * 4)                        # l1 accumulator

    # Auto-shrink tiles until the working set fits the per-generation budget
    # (prefer to keep hidden_tile large to minimize recon_acc RMW traffic).
    while footprint(batch_tile, hidden_tile) > vmem_budget and batch_tile > 128:
        batch_tile //= 2
    while footprint(batch_tile, hidden_tile) > vmem_budget and hidden_tile > 128:
        hidden_tile //= 2

    assert B % batch_tile == 0, (B, batch_tile)
    assert H % hidden_tile == 0, (H, hidden_tile)
    assert D_in % 128 == 0 and hidden_tile % 128 == 0 and batch_tile % 8 == 0
    n_b = B // batch_tile
    n_h = H // hidden_tile

    vmem_limit = min(int(1.3 * footprint(batch_tile, hidden_tile)) + (4 << 20),
                     vmem_budget)
    vmem_limit = max(vmem_limit, min(32 << 20, vmem_budget))

    # x stays f32 (L2 is measured against the unquantized input, matching the
    # PyTorch x.float() path); weights stream as compute_dtype; biases f32.
    x_f = x.astype(jnp.float32)
    w_enc_c = w_enc.astype(compute_dtype)
    w_dec_c = w_dec.astype(compute_dtype)
    b_enc_f = b_enc.reshape(1, H).astype(jnp.float32)
    b_dec_f = b_dec.reshape(1, D_in).astype(jnp.float32)

    # Note: b_dec is grid-invariant; single-buffering it would save a few KiB
    # of VMEM but is negligible next to the streamed weight tiles.
    acts, l2_row, l1_row = pl.pallas_call(
        _sae_kernel,
        out_shape=(
            jax.ShapeDtypeStruct((B, H), acts_dtype),
            jax.ShapeDtypeStruct((1, B), jnp.float32),
            jax.ShapeDtypeStruct((1, B), jnp.float32),
        ),
        grid_spec=pltpu.PrefetchScalarGridSpec(
            num_scalar_prefetch=0,
            grid=(n_b, n_h),
            in_specs=[
                pl.BlockSpec((batch_tile, D_in), lambda i, h: (i, 0)),      # x
                pl.BlockSpec((D_in, hidden_tile), lambda i, h: (0, h)),     # W_enc^T tile
                pl.BlockSpec((1, hidden_tile), lambda i, h: (0, h)),        # b_enc tile
                pl.BlockSpec((hidden_tile, D_in), lambda i, h: (h, 0)),     # W_dec^T tile
                pl.BlockSpec((1, D_in), lambda i, h: (0, 0)),               # b_dec
            ],
            out_specs=[
                pl.BlockSpec((batch_tile, hidden_tile), lambda i, h: (i, h)),  # acts
                pl.BlockSpec((1, batch_tile), lambda i, h: (0, i)),            # l2 per sample
                pl.BlockSpec((1, batch_tile), lambda i, h: (0, i)),            # l1 per sample
            ],
            scratch_shapes=[
                pltpu.VMEM((batch_tile, D_in), compute_dtype),   # x_cent (hoisted)
                pltpu.VMEM((batch_tile, D_in), jnp.float32),     # recon accumulator
                pltpu.VMEM((batch_tile, 1), jnp.float32),        # l1 accumulator
            ],
        ),
        compiler_params=pltpu.CompilerParams(
            dimension_semantics=("parallel", "arbitrary"),
            vmem_limit_bytes=vmem_limit),
    )(x_f, w_enc_c, b_enc_f, w_dec_c, b_dec_f)

    # Tiny scalar reduction in the wrapper keeps the kernel's batch axis fully
    # parallel with no serializing accumulators.
    l2ps = l2_row.reshape(B, 1)
    l2_loss = jnp.mean(l2_row, axis=-1)                 # shape (1,)
    l1_loss = l1_coeff * jnp.sum(l1_row)                # scalar
    loss = l2_loss + l1_loss                            # shape (1,)

    penalty = None  # dec_penalty_coeff is None (see TODO above)
    return loss, acts, penalty, l2ps


def init_params(key, input_dim, d_hidden):
    """Deterministic init mirroring the module's __init__ (kaiming_uniform +
    row-normalized decoder weights, zero biases)."""
    k_enc, k_dec = jax.random.split(key)
    # enc.weight: [H, D_in], kaiming_uniform bound = sqrt(6 / fan_in)
    enc_bound = jnp.sqrt(6.0 / input_dim)
    w_enc_t = jax.random.uniform(k_enc, (d_hidden, input_dim),
                                 minval=-enc_bound, maxval=enc_bound,
                                 dtype=jnp.float32)
    # dec.weight: [D_in, H], kaiming_uniform then rows normalized to unit norm
    dec_bound = jnp.sqrt(6.0 / d_hidden)
    w_dec_t = jax.random.uniform(k_dec, (input_dim, d_hidden),
                                 minval=-dec_bound, maxval=dec_bound,
                                 dtype=jnp.float32)
    w_dec_t = w_dec_t / jnp.linalg.norm(w_dec_t, axis=-1, keepdims=True)

    b_enc = jnp.zeros((1, d_hidden), jnp.float32)
    b_dec = jnp.zeros((1, input_dim), jnp.float32)

    # Pre-transpose for the kernel's row-major matmuls.
    w_enc = w_enc_t.T          # [D_in, H]
    w_dec = w_dec_t.T          # [H, D_in]
    return w_enc, b_enc, w_dec, b_dec


def reference_forward(x, w_enc, b_enc, w_dec, b_dec, l1_coeff,
                      compute_dtype=jnp.bfloat16):
    """Plain-JAX reference with the same boundary casts as the kernel."""
    cd = compute_dtype
    x_f = x.astype(jnp.float32)
    x_cent = (x_f - b_dec.reshape(1, -1)).astype(cd)
    acts = jax.nn.relu(
        jnp.dot(x_cent, w_enc.astype(cd),
                preferred_element_type=jnp.float32) + b_enc.reshape(1, -1))
    recon = jnp.dot(acts.astype(cd), w_dec.astype(cd),
                    preferred_element_type=jnp.float32) + b_dec.reshape(1, -1)
    l2ps = jnp.sum((recon - x_f) ** 2, axis=-1, keepdims=True)
    l2_loss = jnp.mean(l2ps, axis=0)
    l1_loss = l1_coeff * jnp.sum(jnp.abs(acts))
    return l2_loss + l1_loss, acts, l2ps


if __name__ == "__main__":
    # Small but MXU-meaningful shapes: batch=256, input_dim=256, dict=1024.
    # Defaults (batch_tile=512 -> clamped/split to 128 for >=2 batch tiles,
    # hidden_tile=512) give grid (2, 2), exercising both axes.
    B, D_IN, D_HIDDEN = 256, 256, 1024
    L1_COEFF = 1e-3
    CD = jnp.bfloat16

    key = jax.random.PRNGKey(0)
    k_x, k_p = jax.random.split(key)
    x = jax.random.normal(k_x, (B, D_IN), dtype=jnp.float32)
    w_enc, b_enc, w_dec, b_dec = init_params(k_p, D_IN, D_HIDDEN)

    loss, acts, penalty, l2ps = sae_forward(
        x, w_enc, b_enc, w_dec, b_dec, l1_coeff=L1_COEFF, compute_dtype=CD)
    jax.block_until_ready((loss, acts, l2ps))

    # Cross-check against a plain-JAX reference with matching precision.
    ref_loss, ref_acts, ref_l2ps = reference_forward(
        x, w_enc, b_enc, w_dec, b_dec, L1_COEFF, compute_dtype=CD)
    assert jnp.allclose(loss, ref_loss, rtol=1e-2, atol=1e-2), (loss, ref_loss)
    assert jnp.allclose(acts.astype(jnp.float32), ref_acts,
                        rtol=1e-2, atol=1e-2)
    assert jnp.allclose(l2ps, ref_l2ps, rtol=1e-2, atol=1e-2)
    assert penalty is None
    assert loss.shape == (1,) and l2ps.shape == (B, 1) and acts.shape == (B, D_HIDDEN)

    print("KERNEL_OK")
</pallas_src>

<mosaic_0001>
module attributes {stable_mosaic.version = 11 : i64} {
  func.func @_sae_kernel(%arg0: i32, %arg1: i32, %arg2: memref<128x256xf32, #tpu.memory_space<vmem>>, %arg3: memref<256x512xbf16, #tpu.memory_space<vmem>>, %arg4: memref<1x512xf32, #tpu.memory_space<vmem>>, %arg5: memref<512x256xbf16, #tpu.memory_space<vmem>>, %arg6: memref<1x256xf32, #tpu.memory_space<vmem>>, %arg7: memref<128x512xbf16, #tpu.memory_space<vmem>>, %arg8: memref<1x128xf32, #tpu.memory_space<vmem>>, %arg9: memref<1x128xf32, #tpu.memory_space<vmem>>, %arg10: memref<128x256xbf16, #tpu.memory_space<vmem>>, %arg11: memref<128x256xf32, #tpu.memory_space<vmem>>, %arg12: memref<128x1xf32, #tpu.memory_space<vmem>>) attributes {dimension_semantics = [#tpu.dimension_semantics<parallel>, #tpu.dimension_semantics<arbitrary>], iteration_bounds = array<i64: 2, 2>, scalar_prefetch = 0 : i64, scratch_operands = 3 : i64, tpu.core_type = #tpu.core_type<tc>, window_params = [{transform_indices = @transform_0, window_bounds = array<i64: 128, 256>}, {transform_indices = @transform_1, window_bounds = array<i64: 256, 512>}, {transform_indices = @transform_2, window_bounds = array<i64: 1, 512>}, {transform_indices = @transform_3, window_bounds = array<i64: 512, 256>}, {pipeline_mode = #tpu.pipeline_mode<synchronous>, transform_indices = @transform_4, window_bounds = array<i64: 1, 256>}, {transform_indices = @transform_5, window_bounds = array<i64: 128, 512>}, {transform_indices = @transform_6, window_bounds = array<i64: 1, 128>}, {transform_indices = @transform_7, window_bounds = array<i64: 1, 128>}]} {
    %c0_i32 = arith.constant 0 : i32
    %0 = arith.cmpi eq, %arg1, %c0_i32 : i32
    %1 = arith.extui %0 : i1 to i32
    %c0_i32_0 = arith.constant 0 : i32
    %2 = arith.cmpi ne, %1, %c0_i32_0 : i32
    scf.if %2 {
      %c0_22 = arith.constant 0 : index
      %c0_23 = arith.constant 0 : index
      %27 = vector.load %arg2[%c0_22, %c0_23] : memref<128x256xf32, #tpu.memory_space<vmem>>, vector<128x256xf32>
      %c0_24 = arith.constant 0 : index
      %c0_25 = arith.constant 0 : index
      %28 = vector.load %arg6[%c0_24, %c0_25] : memref<1x256xf32, #tpu.memory_space<vmem>>, vector<1x256xf32>
      %29 = vector.broadcast %28 : vector<1x256xf32> to vector<128x256xf32>
      %30 = arith.subf %27, %29 : vector<128x256xf32>
      %31 = arith.truncf %30 : vector<128x256xf32> to vector<128x256xbf16>
      %c0_26 = arith.constant 0 : index
      %c0_27 = arith.constant 0 : index
      %32 = vector.load %arg10[%c0_26, %c0_27] : memref<128x256xbf16, #tpu.memory_space<vmem>>, vector<128x256xbf16>
      tpu.vector_store %arg10[%c0_26, %c0_27], %31 {strides = array<i32>} : memref<128x256xbf16, #tpu.memory_space<vmem>>, vector<128x256xbf16>,
      %cst_28 = arith.constant 0.000000e+00 : f32
      %33 = vector.broadcast %cst_28 : f32 to vector<128x256xf32>
      %c0_29 = arith.constant 0 : index
      %c0_30 = arith.constant 0 : index
      %34 = vector.load %arg11[%c0_29, %c0_30] : memref<128x256xf32, #tpu.memory_space<vmem>>, vector<128x256xf32>
      tpu.vector_store %arg11[%c0_29, %c0_30], %33 {strides = array<i32>} : memref<128x256xf32, #tpu.memory_space<vmem>>, vector<128x256xf32>,
      %cst_31 = arith.constant 0.000000e+00 : f32
      %35 = vector.broadcast %cst_31 : f32 to vector<128x1xf32>
      %c0_32 = arith.constant 0 : index
      %c0_33 = arith.constant 0 : index
      %36 = vector.load %arg12[%c0_32, %c0_33] : memref<128x1xf32, #tpu.memory_space<vmem>>, vector<128x1xf32>
      tpu.vector_store %arg12[%c0_32, %c0_33], %35 {strides = array<i32>} : memref<128x1xf32, #tpu.memory_space<vmem>>, vector<128x1xf32>,
    } else {
    }
    %c0 = arith.constant 0 : index
    %c0_1 = arith.constant 0 : index
    %3 = vector.load %arg10[%c0, %c0_1] : memref<128x256xbf16, #tpu.memory_space<vmem>>, vector<128x256xbf16>
    %c0_2 = arith.constant 0 : index
    %c0_3 = arith.constant 0 : index
    %4 = vector.load %arg3[%c0_2, %c0_3] : memref<256x512xbf16, #tpu.memory_space<vmem>>, vector<256x512xbf16>
    %cst = arith.constant dense<0.000000e+00> : vector<128x512xf32>
    %5 = tpu.matmul %3, %4, %cst {dimension_numbers = #tpu.dot_dimension_numbers<[1], [0], [0], [1], [0, 0, 1, 1], [], []>} : vector<128x256xbf16>, vector<256x512xbf16>, vector<128x512xf32> -> vector<128x512xf32>
    %c0_4 = arith.constant 0 : index
    %c0_5 = arith.constant 0 : index
    %6 = vector.load %arg4[%c0_4, %c0_5] : memref<1x512xf32, #tpu.memory_space<vmem>>, vector<1x512xf32>
    %7 = vector.broadcast %6 : vector<1x512xf32> to vector<128x512xf32>
    %8 = arith.addf %5, %7 : vector<128x512xf32>
    %cst_6 = arith.constant 0.000000e+00 : f32
    %9 = vector.broadcast %cst_6 : f32 to vector<128x512xf32>
    %10 = arith.maximumf %8, %9 : vector<128x512xf32>
    %11 = arith.truncf %10 : vector<128x512xf32> to vector<128x512xbf16>
    %c0_7 = arith.constant 0 : index
    %c0_8 = arith.constant 0 : index
    %12 = vector.load %arg7[%c0_7, %c0_8] : memref<128x512xbf16, #tpu.memory_space<vmem>>, vector<128x512xbf16>
    tpu.vector_store %arg7[%c0_7, %c0_8], %11 {strides = array<i32>} : memref<128x512xbf16, #tpu.memory_space<vmem>>, vector<128x512xbf16>,
    %c0_9 = arith.constant 0 : index
    %c0_10 = arith.constant 0 : index
    %13 = vector.load %arg11[%c0_9, %c0_10] : memref<128x256xf32, #tpu.memory_space<vmem>>, vector<128x256xf32>
    %14 = arith.truncf %10 : vector<128x512xf32> to vector<128x512xbf16>
    %c0_11 = arith.constant 0 : index
    %c0_12 = arith.constant 0 : index
    %15 = vector.load %arg5[%c0_11, %c0_12] : memref<512x256xbf16, #tpu.memory_space<vmem>>, vector<512x256xbf16>
    %cst_13 = arith.constant dense<0.000000e+00> : vector<128x256xf32>
    %16 = tpu.matmul %14, %15, %cst_13 {dimension_numbers = #tpu.dot_dimension_numbers<[1], [0], [0], [1], [0, 0, 1, 1], [], []>} : vector<128x512xbf16>, vector<512x256xbf16>, vector<128x256xf32> -> vector<128x256xf32>
    %17 = arith.addf %13, %16 : vector<128x256xf32>
    %c0_14 = arith.constant 0 : index
    %c0_15 = arith.constant 0 : index
    %18 = vector.load %arg11[%c0_14, %c0_15] : memref<128x256xf32, #tpu.memory_space<vmem>>, vector<128x256xf32>
    tpu.vector_store %arg11[%c0_14, %c0_15], %17 {strides = array<i32>} : memref<128x256xf32, #tpu.memory_space<vmem>>, vector<128x256xf32>,
    %c0_16 = arith.constant 0 : index
    %c0_17 = arith.constant 0 : index
    %19 = vector.load %arg12[%c0_16, %c0_17] : memref<128x1xf32, #tpu.memory_space<vmem>>, vector<128x1xf32>
    %cst_18 = arith.constant dense<0.000000e+00> : vector<128xf32>
    %20 = vector.multi_reduction <add>, %10, %cst_18 [1] : vector<128x512xf32> to vector<128xf32>
    %21 = vector.shape_cast %20 : vector<128xf32> to vector<128x1xf32>
    %22 = arith.addf %19, %21 : vector<128x1xf32>
    %c0_19 = arith.constant 0 : index
    %c0_20 = arith.constant 0 : index
    %23 = vector.load %arg12[%c0_19, %c0_20] : memref<128x1xf32, #tpu.memory_space<vmem>>, vector<128x1xf32>
    tpu.vector_store %arg12[%c0_19, %c0_20], %22 {strides = array<i32>} : memref<128x1xf32, #tpu.memory_space<vmem>>, vector<128x1xf32>,
    %c1_i32 = arith.constant 1 : i32
    %24 = arith.cmpi eq, %arg1, %c1_i32 : i32
    %25 = arith.extui %24 : i1 to i32
    %c0_i32_21 = arith.constant 0 : i32
    %26 = arith.cmpi ne, %25, %c0_i32_21 : i32
    scf.if %26 {
      %c0_22 = arith.constant 0 : index
      %c0_23 = arith.constant 0 : index
      %27 = vector.load %arg2[%c0_22, %c0_23] : memref<128x256xf32, #tpu.memory_space<vmem>>, vector<128x256xf32>
      %c0_24 = arith.constant 0 : index
      %c0_25 = arith.constant 0 : index
      %28 = vector.load %arg11[%c0_24, %c0_25] : memref<128x256xf32, #tpu.memory_space<vmem>>, vector<128x256xf32>
      %c0_26 = arith.constant 0 : index
      %c0_27 = arith.constant 0 : index
      %29 = vector.load %arg6[%c0_26, %c0_27] : memref<1x256xf32, #tpu.memory_space<vmem>>, vector<1x256xf32>
      %30 = vector.broadcast %29 : vector<1x256xf32> to vector<128x256xf32>
      %31 = arith.addf %28, %30 : vector<128x256xf32>
      %32 = arith.subf %31, %27 : vector<128x256xf32>
      %33 = arith.mulf %32, %32 : vector<128x256xf32>
      %cst_28 = arith.constant dense<0.000000e+00> : vector<128xf32>
      %34 = vector.multi_reduction <add>, %33, %cst_28 [1] : vector<128x256xf32> to vector<128xf32>
      %35 = vector.shape_cast %34 : vector<128xf32> to vector<1x128xf32>
      %c0_29 = arith.constant 0 : index
      %c0_30 = arith.constant 0 : index
      %36 = vector.load %arg8[%c0_29, %c0_30] : memref<1x128xf32, #tpu.memory_space<vmem>>, vector<1x128xf32>
      tpu.vector_store %arg8[%c0_29, %c0_30], %35 {strides = array<i32>} : memref<1x128xf32, #tpu.memory_space<vmem>>, vector<1x128xf32>,
      %c0_31 = arith.constant 0 : index
      %c0_32 = arith.constant 0 : index
      %37 = vector.load %arg12[%c0_31, %c0_32] : memref<128x1xf32, #tpu.memory_space<vmem>>, vector<128x1xf32>
      %cst_33 = arith.constant dense<0.000000e+00> : vector<128xf32>
      %38 = vector.multi_reduction <add>, %37, %cst_33 [1] : vector<128x1xf32> to vector<128xf32>
      %39 = vector.shape_cast %38 : vector<128xf32> to vector<1x128xf32>
      %c0_34 = arith.constant 0 : index
      %c0_35 = arith.constant 0 : index
      %40 = vector.load %arg9[%c0_34, %c0_35] : memref<1x128xf32, #tpu.memory_space<vmem>>, vector<1x128xf32>
      tpu.vector_store %arg9[%c0_34, %c0_35], %39 {strides = array<i32>} : memref<1x128xf32, #tpu.memory_space<vmem>>, vector<1x128xf32>,
    } else {
    }
    return
  }
  func.func @transform_0(%arg0: i32, %arg1: i32) -> (i32, i32) {
    %c0_i32 = arith.constant 0 : i32
    %c0_i32_0 = arith.constant 0 : i32
    return %arg0, %c0_i32 : i32, i32
  }
  func.func @transform_1(%arg0: i32, %arg1: i32) -> (i32, i32) {
    %c0_i32 = arith.constant 0 : i32
    %c0_i32_0 = arith.constant 0 : i32
    return %c0_i32, %arg1 : i32, i32
  }
  func.func @transform_2(%arg0: i32, %arg1: i32) -> (i32, i32) {
    %c0_i32 = arith.constant 0 : i32
    %c0_i32_0 = arith.constant 0 : i32
    return %c0_i32, %arg1 : i32, i32
  }
  func.func @transform_3(%arg0: i32, %arg1: i32) -> (i32, i32) {
    %c0_i32 = arith.constant 0 : i32
    %c0_i32_0 = arith.constant 0 : i32
    return %arg1, %c0_i32 : i32, i32
  }
  func.func @transform_4(%arg0: i32, %arg1: i32) -> (i32, i32) {
    %c0_i32 = arith.constant 0 : i32
    %c0_i32_0 = arith.constant 0 : i32
    %c0_i32_1 = arith.constant 0 : i32
    return %c0_i32, %c0_i32_0 : i32, i32
  }
  func.func @transform_5(%arg0: i32, %arg1: i32) -> (i32, i32) {
    %c0_i32 = arith.constant 0 : i32
    return %arg0, %arg1 : i32, i32
  }
  func.func @transform_6(%arg0: i32, %arg1: i32) -> (i32, i32) {
    %c0_i32 = arith.constant 0 : i32
    %c0_i32_0 = arith.constant 0 : i32
    return %c0_i32, %arg0 : i32, i32
  }
  func.func @transform_7(%arg0: i32, %arg1: i32) -> (i32, i32) {
    %c0_i32 = arith.constant 0 : i32
    %c0_i32_0 = arith.constant 0 : i32
    return %c0_i32, %arg0 : i32, i32
  }
}

</mosaic_0001>

<bundles_post_ra>
// kernel: tpu_custom_call.1
= control target key start
LH: loop header
LB: loop body
LE: loop exit
PB: predicated region body
PF: predicated region fallthrough
CT: control target
= control target key end

     0   :  { %s5421_s0 = inlined_call_operand.hbm [shape: f32[256,256], index: 0, kind: input, shape index: {}]   ;;  %s5422_s1 = inlined_call_operand.hbm [shape: bf16[256,1024], index: 1, kind: input, shape index: {}]   ;;  %s5423_s2 = inlined_call_operand.hbm [shape: f32[1,1024], index: 2, kind: input, shape index: {}]   ;;  %s5424_s3 = inlined_call_operand.hbm [shape: bf16[1024,256], index: 3, kind: input, shape index: {}]   ;;  %s5425_s4 = inlined_call_operand.vmem [shape: f32[1,256], index: 4, kind: input, shape index: {}]   ;;  %s5426_s5 = inlined_call_operand.hbm [shape: bf16[256,1024], index: 5, kind: output, shape index: {0}]   ;;  %s5427_s6 = inlined_call_operand.hbm [shape: f32[1,256], index: 6, kind: output, shape index: {1}]   ;;  %s5428_s7 = inlined_call_operand.hbm [shape: f32[1,256], index: 7, kind: output, shape index: {2}]  }
   0x1   :  { %5451 = sst [smem:[#allocation37_spill]] %s5421_s0 }
   0x2   :  { %5452 = sst [smem:[#allocation38_spill]] %s5422_s1 }
   0x3   :  { %5453 = sst [smem:[#allocation39_spill]] %s5425_s4 }
   0x4   :  { %5454 = sst [smem:[#allocation40_spill]] %s5426_s5 }
   0x5   :  { %5455 = sst [smem:[#allocation41_spill]] %s5427_s6 }
   0x6   :  { %5456 = sst [smem:[#allocation42_spill]] %s5428_s7 }
   0x7   :  { %13 = vsyncpa [#allocation6], 0 }
   0x8   :  { %15 = vsyncpa [#allocation6 + $0x1], 0 }
   0x9   :  { %16 = vsyncpa [#allocation9], 0 }
   0xa   :  { %18 = vsyncpa [#allocation9 + $0x1], 0 }
   0xb   :  { %19 = vsyncpa [#allocation12], 0 }
   0xc   :  { %21 = vsyncpa [#allocation12 + $0x1], 0 }
   0xd   :  { %22 = vsyncpa [#allocation7], 0 }
   0xe   :  { %24 = vsyncpa [#allocation7 + $0x1], 0 }
   0xf   :  { %25 = vsyncpa [#allocation15], 0 }
  0x10   :  { %27 = vsyncpa [#allocation15 + $0x1], 0  ;;  %s4360_s24 = smov 0   ;;  %s4362_s25 = smov 0  }
  0x11   :  { %s4364_s26 = smov 0   ;;  %s4366_s27 = smov 0  }
  0x12   :  { %s4368_s28 = smov 0   ;;  %s4370_s29 = smov 0  }
  0x13   :  { %s4372_s30 = smov 0   ;;  %s4374_s8 = smov 0  }
  0x14   :  { %s4376_s9 = smov 0   ;;  %s4378_s10 = smov 0  }
  0x15   :  { %s4380_s11 = smov 0   ;;  %s4382_s12 = smov 0  }
  0x16   :  { %s4384_s13 = smov 0   ;;  %s4386_s14 = smov 0  }
  0x17 LB: > { %5457 = sst [smem:[#allocation22_spill]] %s4249_s24  ;;  %p60_p0 = scmp.eq.s32.totalorder %s4301_s14, 0  ;;  %s4301_s14 = sphi %s4386_s14, %s33_s14   ;;  %s4297_s13 = sphi %s4384_s13, %s5519_s13   ;;  %s4293_s12 = sphi %s4382_s12, %s5528_s12   ;;  %s4289_s11 = sphi %s4380_s11, %s5517_s11   ;;  %s4285_s10 = sphi %s4378_s10, %s5527_s10   ;;  %s4281_s9 = sphi %s4376_s9, %s5516_s9   ;;  %s4277_s8 = sphi %s4374_s8, %s5526_s8   ;;  %s4273_s30 = sphi %s4372_s30, %s5525_s30   ;;  %s4269_s29 = sphi %s4370_s29, %s5514_s29   ;;  %s4265_s28 = sphi %s4368_s28, %s5524_s28   ;;  %s4261_s27 = sphi %s4366_s27, %s5523_s27   ;;  %s4257_s26 = sphi %s4364_s26, %s5512_s26   ;;  %s4253_s25 = sphi %s4362_s25, %s5522_s25   ;;  %s4249_s24 = sphi %s4360_s24, %s5521_s24  }
  0x18   : > { %5458 = sst [smem:[#allocation23_spill]] %s4257_s26  ;;  %p85_p1 = scmp.ne.s32.totalorder %s4269_s29, %s4265_s28 }
  0x19   : > { %5459 = sst [smem:[#allocation24_spill]] %s4269_s29  ;;  %p91_p2 = scmp.ne.s32.totalorder %s4265_s28, %s4261_s27 }
  0x1a   : > { %5460 = sst [smem:[#allocation25_spill]] %s4281_s9  ;;  %p5440_p3 = scmp.lt.s32.totalorder %s4301_s14, 4 }
  0x1b   : > { %5461 = sst [smem:[#allocation26_spill]] %s4285_s10  ;;  %p87_p4 = por %p85_p1, %p60_p0 }
  0x1c   : > { %5462 = sst [smem:[#allocation27_spill]] %s4289_s11  ;;  %s293_s16 = sand.u32 1, %s4301_s14  }
  0x1d   : > { %5463 = sst [smem:[#allocation28_spill]] %s4297_s13  ;;  %s4441_s17 = sand.u32 1, %s4269_s29  }
  0x1e   : > { %s5432_s18 = sshll.u32 %s4441_s17, 9  ;;  %s3558_s19 = sshll.u32 %s4293_s12, 8 }
  0x1f   : > { %s5464_s1 = sld [smem:[#allocation38_spill]]  ;;  %s297_s23 = scalar_lea.vmem [#allocation8], %s5432_s18 }
  0x20   : > { %s304_s7 = sshll.u32 %s297_s23, 4  ;;  %p4452_p5 = pnand %p5440_p3, %p87_p4  ;;  %s305_s7 = int_to_ptr.vmem [resolvable:$true] %s304_s7 }
  0x21   : > { %p3347_p6 = scmp.ge.s32.totalorder %s4301_s14, 1  ;;  %s4457_s5 = scalar_lea.sflag [#allocation9], %s293_s16 }
  0x22   : > { %p5437_p7 = pneg %p4452_p5  ;;  %s3994_s6 = scalar_lea.vmem %s305_s7, 8192 }
  0x23   : > { %p3995_p8 = scmp.ne.s32.totalorder %s305_s7, %s3994_s6 }
  0x25   : > { %s303_s22 = scalar_lea.hbm %s5464_s1, %s3558_s19  ;;  %p3997_p9 = pnand %p3995_p8, %p5437_p7 }
  0x26   : > { %s4303_s19 = smov [#allocation8]  }
  0x27   : > { %p3998_p10 = pneg %p3997_p9  ;;  %s3999_s20 = sshll.u32 %s4303_s19, 4  ;;  %s4000_s20 = int_to_ptr.vmem [resolvable:$false] %s3999_s20 }
  0x28   : > { %s4001_s21 = scalar_lea.vmem %s4000_s20, 16384  ;;  %p4002_p11 = scmp.lt.s32.totalorder %s305_s7, %s4000_s20 }
  0x29   : > { %p4003_p12 = scmp.lt.s32.totalorder %s4001_s21, %s3994_s6 }
  0x2b   : > { %p4004_p13 = por %p4003_p12, %p4002_p11 }
  0x2d   : > { %p4005_p1 = pnand %p4004_p13, %p3998_p10 }
  0x2f   : > { %4008 = shalt.err (!%p4005_p1)
}
  0x30   : > { %s4304_s23 = smov 512   ;;  %s5433_s6 = smov 256  }
  0x31   : > { %s5434_s16 = smov 16   ;;  %p353_p4 = scmp.lt.s32.totalorder %s4301_s14, 5 }
  0x32   : > { %3631 = dma.hbm_to_vmem [thread:$0]  (!%p4452_p5), %s303_s22, 8192, %s305_s7, %s4457_s5, %s4304_s23, %s5433_s6, %s5434_s16  }
  0x33   : > { %p4472_p8 = pnand %p3347_p6, %p353_p4  ;;  %s4477_s20 = sadd.s32 4294967295, %s4301_s14  }
  0x34   : > { %s42_s18 = sadd.s32 1, %s4293_s12  ;;  %s45_s1 = sadd.s32 1, %s4297_s13 }
  0x35   : > { %p43_p9 = scmp.ge.s32.totalorder %s42_s18, 2  ;;  %s52_s7 = sadd.s32 1, %s4281_s9 }
  0x36   : > { %p59_p10 = scmp.ne.s32.totalorder %s4281_s9, %s4277_s8  ;;  %p5442_p11 = scmp.ne.s32.totalorder %s4277_s8, %s4273_s30 }
  0x37   : > { %s5530_s18 = smov (%p43_p9, %s42_s18), 0  ;;  %s5532_s1 = smov (!%p43_p9, %s45_s1), %s4297_s13 }
  0x38   : > { %5467 = sst [smem:[#allocation29_spill]] %s5530_s18  ;;  %p4495_p6 = por %p60_p0, %p59_p10 }
  0x39   : > { %p66_p12 = scmp.eq.s32.totalorder %s4477_s20, 0  ;;  %p47_p13 = scmp.ge.s32.totalorder %s5532_s1, 2 }
  0x3a   : > { %s75_s23 = ssub.s32 %s4293_s12, %s5530_s18  ;;  %s5472_s16 = sadd.s32 1, %s4269_s29 }
  0x3b   : > { %p4505_p1 = por %p66_p12, %p5442_p11  ;;  %p76_p4 = scmp.eq.s32.totalorder %s75_s23, 0 }
  0x3c   : > { %s5534_s1 = smov (%p47_p13, %s5532_s1), 0  ;;  %p4521_p0 = por %p91_p2, %p66_p12 }
  0x3d   : > { %s5469_s6 = scalar_select %p4505_p1, 1, 0 }
  0x3e   : > { %5471 = sst [smem:[#allocation31_spill]] %s5534_s1  ;;  %s49_s11 = ssub.s32 %s4297_s13, %s5534_s1 }
  0x3f   : > { %5470 = sst [smem:[#allocation30_spill]] %s5469_s6  ;;  %p50_p9 = scmp.eq.s32.totalorder %s49_s11, 0 }
  0x40   : > { %s4514_s21 = scalar_select %p76_p4, %s4269_s29, %s5472_s16  }
  0x41   : > { %s5474_s18 = scalar_select %p4521_p0, 1, 0 }
  0x42   : > { %5473 = sst [smem:[#allocation32_spill]] %s4514_s21  ;;  %s176_s4 = sor.u32 %s75_s23, %s49_s11 }
  0x43   : > { %p177_p7 = scmp.eq.s32.totalorder %s176_s4, 0  ;;  %s179_s10 = sadd.s32 1, %s4257_s26 }
  0x44   : > { %s4527_s6 = scalar_select %p50_p9, %s4281_s9, %s52_s7  }
  0x45   : > { %s4530_s16 = scalar_select %p177_p7, %s4257_s26, %s179_s10  }
  0x46   : > { %5475 = sst [smem:[#allocation33_spill]] %s4527_s6  ;;  %p189_p13 = scmp.ne.s32.totalorder %s4257_s26, %s4253_s25 }
  0x47   : > { %5476 = sst [smem:[#allocation34_spill]] %s4530_s16  ;;  %p190_p4 = scmp.eq.s32.totalorder %s4477_s20, 3 }
  0x48   : > { %p195_p3 = scmp.ne.s32.totalorder %s4253_s25, %s4249_s24  ;;  %s5477_s27 = sadd.s32 4294967294, %s4301_s14  }
  0x49   : > { %p196_p2 = scmp.eq.s32.totalorder %s5477_s27, 3  ;;  %p4539_p12 = por %p190_p4, %p189_p13 }
  0x4a   : > { %p4546_p11 = por %p190_p4, %p59_p10  ;;  %p5482_p7 = scmp.ne.s32.totalorder %s4277_s8, %s4273_s30 }
  0x4b   : > { %p4550_p9 = por %p196_p2, %p195_p3  ;;  %s271_s7 = sand.u32 1, %s4281_s9  }
  0x4c   : > { %p4557_p0 = por %p196_p2, %p5482_p7  ;;  %s3557_s23 = sshll.u32 %s4297_s13, 12 }
  0x4d   : > { %s5480_s11 = scalar_select %p4550_p9, 1, 0 }
  0x4e   : > { %s5483_s10 = scalar_select %p4557_p0, 1, 0 }
  0x4f   : > { %5481 = sst [smem:[#allocation35_spill]] %s5480_s11  ;;  %s3333_s27 = sshll.u32 %s271_s7, 8 }
  0x50   : > { %5484 = sst [smem:[#allocation36_spill]] %s5483_s10  ;;  %s275_s16 = scalar_lea.vmem [#allocation5], %s3333_s27 }
  0x51   : > { %s5485_s0 = sld [smem:[#allocation37_spill]]  ;;  %s283_s26 = sshll.u32 %s275_s16, 4  ;;  %s284_s26 = int_to_ptr.vmem [resolvable:$true] %s283_s26 }
  0x52   : > { %p5486_p10 = scmp.lt.s32.totalorder %s4301_s14, 4  ;;  %s3340_s30 = sshll.u32 %s4441_s17, 2 }
  0x53   : > { %s272_s11 = scalar_lea.sflag [#allocation6], %s271_s7  ;;  %s4022_s13 = scalar_lea.vmem %s284_s26, 4096 }
  0x54   : > { %p4570_p3 = pnand %p5486_p10, %p4495_p6  ;;  %p4023_p4 = scmp.ne.s32.totalorder %s284_s26, %s4022_s13 }
  0x55   : > { %s4307_s6 = smov [#allocation5]  }
  0x56   : > { %p4011_p13 = pneg %p4570_p3  ;;  %s4027_s21 = sshll.u32 %s4307_s6, 4  ;;  %s4028_s21 = int_to_ptr.vmem [resolvable:$false] %s4027_s21 }
  0x57   : > { %s282_s29 = scalar_lea.hbm %s5485_s0, %s3557_s23  ;;  %s4029_s16 = scalar_lea.vmem %s4028_s21, 8192 }
  0x58   : > { %p4025_p2 = pnand %p4023_p4, %p4011_p13  ;;  %p4030_p0 = scmp.lt.s32.totalorder %s284_s26, %s4028_s21 }
  0x59   : > { %p4031_p9 = scmp.lt.s32.totalorder %s4029_s16, %s4022_s13 }
  0x5a   : > { %p4026_p7 = pneg %p4025_p2 }
  0x5b   : > { %p4032_p6 = por %p4031_p9, %p4030_p0 }
  0x5d   : > { %p4033_p10 = pnand %p4032_p6, %p4026_p7 }
  0x5f   : > { %4036 = shalt.err (!%p4033_p10)
}
  0x60   : > { %s5488_s22 = smov 16   ;;  %s5489_s23 = smov 256  }
  0x61   : > { %3628 = dma.hbm_to_vmem [thread:$0]  (!%p4570_p3), %s282_s29, 4096, %s284_s26, %s272_s11, %s5489_s23, %s5489_s23, %s5488_s22  }
  0x62   : > { %s3559_s7 = sshll.u32 %s4293_s12, 6  ;;  %s318_s27 = scalar_lea.vmem [#allocation10], %s3340_s30 }
  0x63   : > { %s326_s0 = sshll.u32 %s318_s27, 4  ;;  %s324_s10 = scalar_lea.hbm %s5423_s2, %s3559_s7  ;;  %s327_s0 = int_to_ptr.vmem [resolvable:$true] %s326_s0 }
  0x64   : > { %s4050_s13 = scalar_lea.vmem %s327_s0, 64  ;;  %p5490_p9 = pneg %p4452_p5 }
  0x65   : > { %p4051_p0 = scmp.ne.s32.totalorder %s327_s0, %s4050_s13  ;;  %s4308_s24 = smov [#allocation10]  }
  0x66   : > { %s4055_s21 = sshll.u32 %s4308_s24, 4  ;;  %s4056_s21 = int_to_ptr.vmem [resolvable:$false] %s4055_s21 }
  0x67   : > { %p4053_p13 = pnand %p4051_p0, %p5490_p9  ;;  %s4057_s16 = scalar_lea.vmem %s4056_s21, 128 }
  0x68   : > { %p4058_p2 = scmp.lt.s32.totalorder %s327_s0, %s4056_s21  ;;  %p4059_p3 = scmp.lt.s32.totalorder %s4057_s16, %s4050_s13 }
  0x69   : > { %p4054_p4 = pneg %p4053_p13 }
  0x6a   : > { %p4060_p7 = por %p4059_p3, %p4058_p2 }
  0x6c   : > { %p4061_p6 = pnand %p4060_p7, %p4054_p4 }
  0x6e   : > { %4064 = shalt.err (!%p4061_p6)
}
  0x6f   : > { %3634 = dma.hbm_to_vmem [thread:$0]  (!%p4452_p5), %s324_s10, 64, %s327_s0, %s4457_s5  }
  0x70   : > { %s3561_s26 = sshll.u32 %s4293_s12, 13  ;;  %s5491_s29 = sshll.u32 %s4441_s17, 9 }
  0x71   : > { %s337_s9 = scalar_lea.vmem [#allocation11], %s5491_s29  ;;  %s344_s23 = scalar_lea.hbm %s5424_s3, %s3561_s26 }
  0x72   : > { %s345_s11 = sshll.u32 %s337_s9, 4  ;;  %s334_s7 = scalar_lea.sflag [#allocation12], %s4441_s17  ;;  %s346_s11 = int_to_ptr.vmem [resolvable:$true] %s345_s11 }
  0x73   : > { %s4078_s27 = scalar_lea.vmem %s346_s11, 8192  ;;  %p5492_p0 = pmov %p5490_p9 }
  0x74   : > { %p4079_p10 = scmp.ne.s32.totalorder %s346_s11, %s4078_s27  ;;  %s4309_s6 = smov [#allocation11]  }
  0x75   : > { %s4083_s13 = sshll.u32 %s4309_s6, 4  ;;  %s4084_s13 = int_to_ptr.vmem [resolvable:$false] %s4083_s13 }
  0x76   : > { %p4081_p9 = pnand %p4079_p10, %p5492_p0  ;;  %s4085_s0 = scalar_lea.vmem %s4084_s13, 16384 }
  0x77   : > { %p4086_p4 = scmp.lt.s32.totalorder %s346_s11, %s4084_s13  ;;  %p4087_p2 = scmp.lt.s32.totalorder %s4085_s0, %s4078_s27 }
  0x78   : > { %p4082_p13 = pneg %p4081_p9 }
  0x79   : > { %p4088_p3 = por %p4087_p2, %p4086_p4 }
  0x7b   : > { %p4089_p7 = pnand %p4088_p3, %p4082_p13 }
  0x7d   : > { %4092 = shalt.err (!%p4089_p7)
}
  0x7e   : > { %s4310_s5 = smov 128   ;;  %s4311_s10 = smov 8  }
  0x7f   : > { %3637 = dma.hbm_to_vmem [thread:$0]  (!%p4452_p5), %s344_s23, 8192, %s346_s11, %s334_s7, %s4310_s5, %s4310_s5, %s4311_s10  }
  0x80   : > { %357 = sbr.rel (%p4472_p8) target bundleno = 1026 (0x402), region = 40  ;;  %s4607_s24 = sand.u32 (!%p4472_p8), 1, %s4277_s8  }
  0x81   : > { %s3348_s21 = sshll.u32 (!%p4472_p8), %s4607_s24, 8  ;;  %s360_s16 = scalar_lea.sflag (!%p4472_p8), [#allocation6], %s4607_s24 }
  0x82   : > { %s4611_s26 = scalar_lea.vmem (!%p4472_p8), [#allocation5], %s3348_s21 }
  0x85   : > { %4228 = dma.done.wait (%p4505_p1), %s360_s16, 4096  }
  0x86   : > { %4230 = vsyncadd (%p4505_p1), %s360_s16, 4294963200  ;;  %s368_s15 = sand.u32 1, %s4477_s20   ;;  %s370_s19 = sand.u32 1, %s4265_s28  }
  0x87   : > { %s3349_s29 = sshll.u32 %s370_s19, 9  ;;  %s369_s9 = scalar_lea.sflag [#allocation9], %s368_s15 }
  0x88   : > { %s4621_s11 = scalar_lea.vmem [#allocation8], %s3349_s29  ;;  %p5494_p5 = scmp.ne.s32.totalorder %s5474_s18, 0 }
  0x8a   : > { %4232 = dma.done.wait (%p5494_p5), %s369_s9, 8256  }
  0x8b   : > { %4234 = vsyncadd (%p5494_p5), %s369_s9, 4294959040  ;;  %s3350_s30 = sshll.u32 %s370_s19, 2  ;;  %s387_s23 = scalar_lea.sflag [#allocation12], %s370_s19 }
  0x8c   : > { %s4627_s22 = scalar_lea.vmem [#allocation10], %s3350_s30  ;;  %s4629_s7 = scalar_lea.vmem [#allocation11], %s3349_s29 }
  0x8d   : > { %4236 = dma.done.wait (%p5494_p5), %s387_s23, 8192  }
  0x8e   : > { %4238 = vsyncadd (%p5494_p5), %s387_s23, 4294959104  ;;  %s429_s27 = sand.u32 1, %s4253_s25   ;;  %s437_s0 = scalar_lea.vmem [#allocation14], %s4607_s24 }
  0x8f   : > { %s3352_s6 = sshll.u32 %s429_s27, 8  ;;  %s443_s5 = scalar_lea.vmem [#allocation16], %s4607_s24 }
  0x90   : > { %s4638_s13 = scalar_lea.vmem [#allocation13], %s3352_s6  ;;  %s5495_s10 = sld [smem:[#allocation26_spill]] }
  0x96   : > { %p3353_p8 = scmp.ne.s32.totalorder %s5495_s10, 0 }
  0x97   : > { %s5496_s21 = sld [smem:[#allocation39_spill]] (!%p3353_p8) }
  0x98   : > { %453 = sbr.rel (%p3353_p8) target bundleno = 190 (0xbe), region = 60 }
  0x9d   : > { %v488_v0 = vlaneseq  ;;  %vm674_vm0 = vcmask 7168   ;;  %v4312_v1 = vmov 0.0   ;;  %v486_v3 = vld [vmem:[%s5496_s21] sm:$0x3]  ;;  %v455_v5 = vld [vmem:[%s4611_s26 + $0x8] sm:$0xff]  ;;  %v456_v8 = vld [vmem:[%s4611_s26 + $0x10] sm:$0xff] }
  0x9e   : > { %642 = vst [vmem:[#allocation3 + $0xa8] sm:$0xff] %v4312_v1  ;;  %643 = vst [vmem:[#allocation3 + $0x68] sm:$0xff] %v4312_v1  ;;  %v454_v4 = vld [vmem:[%s4611_s26] sm:$0xff]  ;;  %v457_v9 = vld [vmem:[%s4611_s26 + $0x18] sm:$0xff] }
  0x9f   : > { %644 = vst [vmem:[#allocation3 + $0x10] sm:$0xff] %v4312_v1  ;;  %645 = vst [vmem:[#allocation3 + $0xc0] sm:$0xff] %v4312_v1  ;;  %v489_v2 = vshrl.u32 %v488_v0, 7  ;;  %v458_v10 = vld [vmem:[%s4611_s26 + $0x20] sm:$0xff]  ;;  %v459_v13 = vld [vmem:[%s4611_s26 + $0x28] sm:$0xff] }
  0xa0   : > { %646 = vst [vmem:[#allocation3 + $0xc8] sm:$0xff] %v4312_v1  ;;  %647 = vst [vmem:[#allocation3 + $0xb0] sm:$0xff] %v4312_v1  ;;  %v460_v14 = vld [vmem:[%s4611_s26 + $0x30] sm:$0xff]  ;;  %v461_v15 = vld [vmem:[%s4611_s26 + $0x38] sm:$0xff] }
  0xa1   : > { %648 = vst [vmem:[#allocation3 + $0x70] sm:$0xff] %v4312_v1  ;;  %649 = vst [vmem:[#allocation3 + $0x38] sm:$0xff] %v4312_v1  ;;  %v490_v6 = vsub.s32 0, %v489_v2  ;;  %v494_v7 = vsub.s32 1, %v489_v2  ;;  %v462_v16 = vld [vmem:[%s4611_s26 + $0x40] sm:$0xff]  ;;  %v463_v17 = vld [vmem:[%s4611_s26 + $0x48] sm:$0xff] }
  0xa2   : > { %650 = vst [vmem:[#allocation3 + $0x48] sm:$0xff] %v4312_v1  ;;  %651 = vst [vmem:[#allocation3 + $0xf8] sm:$0xff] %v4312_v1  ;;  %v464_v22 = vld [vmem:[%s4611_s26 + $0x50] sm:$0xff]  ;;  %v465_v23 = vld [vmem:[%s4611_s26 + $0x58] sm:$0xff] }
  0xa3   : > { %652 = vst [vmem:[#allocation3 + $0x78] sm:$0xff] %v4312_v1  ;;  %653 = vst [vmem:[#allocation3 + $0x88] sm:$0xff] %v4312_v1  ;;  %v4667_v11 = vrot.slane %v486_v3, %v490_v6  ;;  %v4669_v12 = vrot.slane %v486_v3, %v494_v7  ;;  %v466_v28 = vld [vmem:[%s4611_s26 + $0x60] sm:$0xff]  ;;  %v467_v29 = vld [vmem:[%s4611_s26 + $0x68] sm:$0xff] }
  0xa4   : > { %654 = vst [vmem:[#allocation3 + $0xf0] sm:$0xff] %v4312_v1  ;;  %655 = vst [vmem:[#allocation3 + $0x18] sm:$0xff] %v4312_v1  ;;  %v468_v30 = vld [vmem:[%s4611_s26 + $0x70] sm:$0xff]  ;;  %v469_v35 = vld [vmem:[%s4611_s26 + $0x78] sm:$0xff] }
  0xa5   : > { %656 = vst [vmem:[#allocation3 + $0x30] sm:$0xff] %v4312_v1  ;;  %657 = vst [vmem:[#allocation3 + $0x50] sm:$0xff] %v4312_v1  ;;  %v498_v18 = vsub.f32 %v454_v4, %v4667_v11  ;;  %v499_v19 = vsub.f32 %v455_v5, %v4669_v12  ;;  %v500_v20 = vsub.f32 %v456_v8, %v4667_v11  ;;  %v470_v36 = vld [vmem:[%s4611_s26 + $0x80] sm:$0xff]  ;;  %v471_v37 = vld [vmem:[%s4611_s26 + $0x88] sm:$0xff] }
  0xa6   : > { %658 = vst [vmem:[#allocation3 + $0xb8] sm:$0xff] %v4312_v1  ;;  %659 = vst [vmem:[#allocation3 + $0xd0] sm:$0xff] %v4312_v1  ;;  %v501_v21 = vsub.f32 %v457_v9, %v4669_v12  ;;  %v502_v24 = vsub.f32 %v458_v10, %v4667_v11  ;;  %v503_v25 = vsub.f32 %v459_v13, %v4669_v12  ;;  %v472_v42 = vld [vmem:[%s4611_s26 + $0x90] sm:$0xff]  ;;  %v473_v43 = vld [vmem:[%s4611_s26 + $0x98] sm:$0xff] }
  0xa7   : > { %660 = vst [vmem:[#allocation3 + $0xd8] sm:$0xff] %v4312_v1  ;;  %661 = vst [vmem:[#allocation3 + $0x58] sm:$0xff] %v4312_v1  ;;  %v504_v26 = vsub.f32 %v460_v14, %v4667_v11  ;;  %v505_v27 = vsub.f32 %v461_v15, %v4669_v12  ;;  %v3562_v31 = vpack.c.bf16 %v499_v19, %v498_v18  ;;  %v474_v44 = vld [vmem:[%s4611_s26 + $0xa0] sm:$0xff]  ;;  %v475_v49 = vld [vmem:[%s4611_s26 + $0xa8] sm:$0xff] }
  0xa8   : > { %662 = vst [vmem:[#allocation3 + $0x80] sm:$0xff] %v4312_v1  ;;  %663 = vst [vmem:[#allocation3 + $0x40] sm:$0xff] %v4312_v1  ;;  %v3563_v32 = vpack.c.bf16 %v501_v21, %v500_v20  ;;  %v506_v33 = vsub.f32 %v462_v16, %v4667_v11  ;;  %v507_v34 = vsub.f32 %v463_v17, %v4669_v12  ;;  %v476_v50 = vld [vmem:[%s4611_s26 + $0xb0] sm:$0xff]  ;;  %v477_v55 = vld [vmem:[%s4611_s26 + $0xb8] sm:$0xff] }
  0xa9   : > { %664 = vst [vmem:[#allocation3 + $0x28] sm:$0xff] %v4312_v1  ;;  %665 = vst [vmem:[#allocation3] sm:$0xff] %v4312_v1  ;;  %v3564_v38 = vpack.c.bf16 %v503_v25, %v502_v24  ;;  %v3565_v39 = vpack.c.bf16 %v505_v27, %v504_v26  ;;  %v508_v40 = vsub.f32 %v464_v22, %v4667_v11  ;;  %v478_v56 = vld [vmem:[%s4611_s26 + $0xc0] sm:$0xff]  ;;  %v479_v57 = vld [vmem:[%s4611_s26 + $0xc8] sm:$0xff] }
  0xaa   : > { %666 = vst [vmem:[#allocation3 + $0x90] sm:$0xff] %v4312_v1  ;;  %667 = vst [vmem:[#allocation3 + $0xe8] sm:$0xff] %v4312_v1  ;;  %v509_v41 = vsub.f32 %v465_v23, %v4669_v12  ;;  %v3566_v45 = vpack.c.bf16 %v507_v34, %v506_v33  ;;  %v510_v46 = vsub.f32 %v466_v28, %v4667_v11  ;;  %v480_v62 = vld [vmem:[%s4611_s26 + $0xd0] sm:$0xff]  ;;  %v481_v63 = vld [vmem:[%s4611_s26 + $0xd8] sm:$0xff] }
  0xab   : > { %668 = vst [vmem:[#allocation3 + $0xa0] sm:$0xff] %v4312_v1  ;;  %669 = vst [vmem:[#allocation3 + $0x20] sm:$0xff] %v4312_v1  ;;  %v511_v47 = vsub.f32 %v467_v29, %v4669_v12  ;;  %v512_v48 = vsub.f32 %v468_v30, %v4667_v11  ;;  %v513_v52 = vsub.f32 %v469_v35, %v4669_v12  ;;  %v482_v0 = vld [vmem:[%s4611_s26 + $0xe0] sm:$0xff]  ;;  %v483_v5 = vld [vmem:[%s4611_s26 + $0xe8] sm:$0xff] }
  0xac   : > { %670 = vst [vmem:[#allocation3 + $0x8] sm:$0xff] %v4312_v1  ;;  %671 = vst [vmem:[#allocation3 + $0xe0] sm:$0xff] %v4312_v1  ;;  %v3567_v51 = vpack.c.bf16 %v509_v41, %v508_v40  ;;  %v514_v53 = vsub.f32 %v470_v36, %v4667_v11  ;;  %v515_v54 = vsub.f32 %v471_v37, %v4669_v12  ;;  %v484_v6 = vld [vmem:[%s4611_s26 + $0xf0] sm:$0xff]  ;;  %v485_v13 = vld [vmem:[%s4611_s26 + $0xf8] sm:$0xff] }
  0xad   : > { %672 = vst [vmem:[#allocation3 + $0x60] sm:$0xff] %v4312_v1  ;;  %673 = vst [vmem:[#allocation3 + $0x98] sm:$0xff] %v4312_v1  ;;  %v3568_v58 = vpack.c.bf16 %v511_v47, %v510_v46  ;;  %v516_v59 = vsub.f32 %v472_v42, %v4667_v11  ;;  %v517_v60 = vsub.f32 %v473_v43, %v4669_v12 }
  0xae   : > { %675 = vst.msk [vmem:[#allocation4] sm:$0xff] %vm674_vm0, %v4312_v1  ;;  %676 = vst.msk [vmem:[#allocation4 + $0x8] sm:$0xff] %vm674_vm0, %v4312_v1  ;;  %v518_v61 = vsub.f32 %v474_v44, %v4667_v11  ;;  %v3570_v2 = vpack.c.bf16 %v515_v54, %v514_v53  ;;  %v519_v3 = vsub.f32 %v475_v49, %v4669_v12 }
  0xaf   : > { %677 = vst.msk [vmem:[#allocation4 + $0x10] sm:$0xff] %vm674_vm0, %v4312_v1  ;;  %678 = vst.msk [vmem:[#allocation4 + $0x18] sm:$0xff] %vm674_vm0, %v4312_v1  ;;  %v520_v4 = vsub.f32 %v476_v50, %v4667_v11  ;;  %v3571_v7 = vpack.c.bf16 %v517_v60, %v516_v59  ;;  %v521_v8 = vsub.f32 %v477_v55, %v4669_v12 }
  0xb0   : > { %679 = vst.msk [vmem:[#allocation4 + $0x20] sm:$0xff] %vm674_vm0, %v4312_v1  ;;  %680 = vst.msk [vmem:[#allocation4 + $0x28] sm:$0xff] %vm674_vm0, %v4312_v1  ;;  %v522_v9 = vsub.f32 %v478_v56, %v4667_v11  ;;  %v523_v10 = vsub.f32 %v479_v57, %v4669_v12  ;;  %v3572_v14 = vpack.c.bf16 %v519_v3, %v518_v61 }
  0xb1   : > { %681 = vst.msk [vmem:[#allocation4 + $0x30] sm:$0xff] %vm674_vm0, %v4312_v1  ;;  %682 = vst.msk [vmem:[#allocation4 + $0x38] sm:$0xff] %vm674_vm0, %v4312_v1  ;;  %v524_v15 = vsub.f32 %v480_v62, %v4667_v11  ;;  %v525_v16 = vsub.f32 %v481_v63, %v4669_v12  ;;  %v526_v17 = vsub.f32 %v482_v0, %v4667_v11 }
  0xb2   : > { %683 = vst.msk [vmem:[#allocation4 + $0x40] sm:$0xff] %vm674_vm0, %v4312_v1  ;;  %684 = vst.msk [vmem:[#allocation4 + $0x48] sm:$0xff] %vm674_vm0, %v4312_v1  ;;  %v3573_v18 = vpack.c.bf16 %v521_v8, %v520_v4  ;;  %v3574_v19 = vpack.c.bf16 %v523_v10, %v522_v9  ;;  %v527_v20 = vsub.f32 %v483_v5, %v4669_v12 }
  0xb3   : > { %685 = vst.msk [vmem:[#allocation4 + $0x50] sm:$0xff] %vm674_vm0, %v4312_v1  ;;  %686 = vst.msk [vmem:[#allocation4 + $0x58] sm:$0xff] %vm674_vm0, %v4312_v1  ;;  %v528_v21 = vsub.f32 %v484_v6, %v4667_v11  ;;  %v3575_v22 = vpack.c.bf16 %v525_v16, %v524_v15  ;;  %v529_v23 = vsub.f32 %v485_v13, %v4669_v12 }
  0xb4   : > { %687 = vst.msk [vmem:[#allocation4 + $0x60] sm:$0xff] %vm674_vm0, %v4312_v1  ;;  %688 = vst.msk [vmem:[#allocation4 + $0x68] sm:$0xff] %vm674_vm0, %v4312_v1  ;;  %v3576_v24 = vpack.c.bf16 %v527_v20, %v526_v17 }
  0xb5   : > { %689 = vst.msk [vmem:[#allocation4 + $0x70] sm:$0xff] %vm674_vm0, %v4312_v1  ;;  %690 = vst.msk [vmem:[#allocation4 + $0x78] sm:$0xff] %vm674_vm0, %v4312_v1  ;;  %v3569_v1 = vpack.c.bf16 %v513_v52, %v512_v48  ;;  %v3577_v25 = vpack.c.bf16 %v529_v23, %v528_v21 }
  0xb6   : > { %626 = vst [vmem:[#allocation2 + $0x30] sm:$0xff] %v3562_v31  ;;  %627 = vst [vmem:[#allocation2] sm:$0xff] %v3563_v32 }
  0xb7   : > { %628 = vst [vmem:[#allocation2 + $0x58] sm:$0xff] %v3564_v38  ;;  %629 = vst [vmem:[#allocation2 + $0x18] sm:$0xff] %v3565_v39 }
  0xb8   : > { %630 = vst [vmem:[#allocation2 + $0x50] sm:$0xff] %v3566_v45  ;;  %631 = vst [vmem:[#allocation2 + $0x68] sm:$0xff] %v3567_v51 }
  0xb9   : > { %632 = vst [vmem:[#allocation2 + $0x8] sm:$0xff] %v3568_v58  ;;  %633 = vst [vmem:[#allocation2 + $0x48] sm:$0xff] %v3569_v1 }
  0xba   : > { %634 = vst [vmem:[#allocation2 + $0x40] sm:$0xff] %v3570_v2  ;;  %635 = vst [vmem:[#allocation2 + $0x20] sm:$0xff] %v3571_v7 }
  0xbb   : > { %636 = vst [vmem:[#allocation2 + $0x10] sm:$0xff] %v3572_v14  ;;  %637 = vst [vmem:[#allocation2 + $0x38] sm:$0xff] %v3573_v18 }
  0xbc   : > { %638 = vst [vmem:[#allocation2 + $0x60] sm:$0xff] %v3574_v19  ;;  %639 = vst [vmem:[#allocation2 + $0x70] sm:$0xff] %v3575_v22 }
  0xbd   : > { %640 = vst [vmem:[#allocation2 + $0x78] sm:$0xff] %v3576_v24  ;;  %641 = vst [vmem:[#allocation2 + $0x28] sm:$0xff] %v3577_v25 }
  0xbe PF: > { %v3772_v11 = vld [vmem:[%s4621_s11 + $0xe4] ss:$16 sps:$4 sm:$0xff]   ;;  %v3774_v12 = vld [vmem:[%s4621_s11 + $0xec] ss:$16 sps:$4 sm:$0xff]   ;;  %v3776_v26 = vld [vmem:[%s4621_s11 + $0xe0] ss:$16 sps:$4 sm:$0xff]  }
  0xbf   : > { %1193 = vmatprep.subr.bf16.mxu0 %v3772_v11  ;;  %v3777_v27 = vld [vmem:[%s4621_s11 + $0xe8] ss:$16 sps:$4 sm:$0xff]   ;;  %1306 = vmatprep.subr.bf16.mxu1 %v3774_v12  ;;  %v3778_v28 = vld [vmem:[%s4621_s11 + $0xc4] ss:$16 sps:$4 sm:$0xff]   ;;  %v3780_v29 = vld [vmem:[%s4621_s11 + $0xcc] ss:$16 sps:$4 sm:$0xff]  }
  0xc0   : > { %1194 = vmatpush1.bf16.msra.mxu0 %v3776_v26  ;;  %1307 = vmatpush1.bf16.msra.mxu1 %v3777_v27  ;;  %v3782_v30 = vld [vmem:[%s4621_s11 + $0xc0] ss:$16 sps:$4 sm:$0xff]   ;;  %v3783_v31 = vld [vmem:[%s4621_s11 + $0xc8] ss:$16 sps:$4 sm:$0xff]   ;;  %v3784_v32 = vld [vmem:[%s4621_s11 + $0xa4] ss:$16 sps:$4 sm:$0xff]  }
  0xc1   : > { %1195 = vmatprep.subr.bf16.mxu0 %v3778_v28  ;;  %1308 = vmatprep.subr.bf16.mxu1 %v3780_v29  ;;  %v3786_v33 = vld [vmem:[%s4621_s11 + $0xac] ss:$16 sps:$4 sm:$0xff]   ;;  %v3788_v34 = vld [vmem:[%s4621_s11 + $0xa0] ss:$16 sps:$4 sm:$0xff]   ;;  %v3789_v35 = vld [vmem:[%s4621_s11 + $0xa8] ss:$16 sps:$4 sm:$0xff]  }
  0xc2   : > { %v3790_v36 = vld [vmem:[%s4621_s11 + $0x84] ss:$16 sps:$4 sm:$0xff]   ;;  %v3792_v37 = vld [vmem:[%s4621_s11 + $0x8c] ss:$16 sps:$4 sm:$0xff]   ;;  %v3794_v38 = vld [vmem:[%s4621_s11 + $0x80] ss:$16 sps:$4 sm:$0xff]  }
  0xc3   : > { %v3795_v39 = vld [vmem:[%s4621_s11 + $0x88] ss:$16 sps:$4 sm:$0xff]   ;;  %v3796_v40 = vld [vmem:[%s4621_s11 + $0x64] ss:$16 sps:$4 sm:$0xff]   ;;  %v3798_v41 = vld [vmem:[%s4621_s11 + $0x6c] ss:$16 sps:$4 sm:$0xff]  }
  0xc4   : > { %1196 = vmatpush1.bf16.msra.mxu0 %v3782_v30  ;;  %1309 = vmatpush1.bf16.msra.mxu1 %v3783_v31  ;;  %v3800_v42 = vld [vmem:[%s4621_s11 + $0x60] ss:$16 sps:$4 sm:$0xff]   ;;  %v3801_v43 = vld [vmem:[%s4621_s11 + $0x68] ss:$16 sps:$4 sm:$0xff]   ;;  %v3802_v44 = vld [vmem:[%s4621_s11 + $0x44] ss:$16 sps:$4 sm:$0xff]  }
  0xc5   : > { %1197 = vmatprep.subr.bf16.mxu0 %v3784_v32  ;;  %1310 = vmatprep.subr.bf16.mxu1 %v3786_v33  ;;  %v3804_v45 = vld [vmem:[%s4621_s11 + $0x4c] ss:$16 sps:$4 sm:$0xff]   ;;  %v3806_v46 = vld [vmem:[%s4621_s11 + $0x40] ss:$16 sps:$4 sm:$0xff]   ;;  %v3807_v47 = vld [vmem:[%s4621_s11 + $0x48] ss:$16 sps:$4 sm:$0xff]  }
  0xc6   : > { %v3808_v48 = vld [vmem:[%s4621_s11 + $0x24] ss:$16 sps:$4 sm:$0xff]   ;;  %v3810_v49 = vld [vmem:[%s4621_s11 + $0x2c] ss:$16 sps:$4 sm:$0xff]   ;;  %v3812_v50 = vld [vmem:[%s4621_s11 + $0x20] ss:$16 sps:$4 sm:$0xff]  }
  0xc7   : > { %v3813_v51 = vld [vmem:[%s4621_s11 + $0x28] ss:$16 sps:$4 sm:$0xff]   ;;  %v3814_v52 = vld [vmem:[%s4621_s11 + $0x4] ss:$16 sps:$4 sm:$0xff]   ;;  %v3816_v53 = vld [vmem:[%s4621_s11 + $0xc] ss:$16 sps:$4 sm:$0xff]  }
  0xc8   : > { %1198 = vmatpush1.bf16.msra.mxu0 %v3788_v34  ;;  %1311 = vmatpush1.bf16.msra.mxu1 %v3789_v35  ;;  %v3818_v54 = vld [vmem:[%s4621_s11] ss:$16 sps:$4 sm:$0xff]   ;;  %v3819_v55 = vld [vmem:[%s4621_s11 + $0x8] ss:$16 sps:$4 sm:$0xff]   ;;  %v3820_v56 = vld [vmem:[%s4621_s11 + $0x1e4] ss:$16 sps:$4 sm:$0xff]  }
  0xc9   : > { %1199 = vmatprep.subr.bf16.mxu0 %v3790_v36  ;;  %1312 = vmatprep.subr.bf16.mxu1 %v3792_v37  ;;  %v3822_v57 = vld [vmem:[%s4621_s11 + $0x1ec] ss:$16 sps:$4 sm:$0xff]   ;;  %v3824_v58 = vld [vmem:[%s4621_s11 + $0x1e0] ss:$16 sps:$4 sm:$0xff]   ;;  %v3825_v59 = vld [vmem:[%s4621_s11 + $0x1e8] ss:$16 sps:$4 sm:$0xff]  }
  0xca   : > { %v3826_v60 = vld [vmem:[%s4621_s11 + $0x1c4] ss:$16 sps:$4 sm:$0xff]   ;;  %v3828_v61 = vld [vmem:[%s4621_s11 + $0x1cc] ss:$16 sps:$4 sm:$0xff]   ;;  %v3830_v62 = vld [vmem:[%s4621_s11 + $0x1c0] ss:$16 sps:$4 sm:$0xff]  }
  0xcb   : > { %v3831_v63 = vld [vmem:[%s4621_s11 + $0x1c8] ss:$16 sps:$4 sm:$0xff]   ;;  %v3832_v0 = vld [vmem:[%s4621_s11 + $0x1a4] ss:$16 sps:$4 sm:$0xff]   ;;  %v3834_v1 = vld [vmem:[%s4621_s11 + $0x1ac] ss:$16 sps:$4 sm:$0xff]  }
  0xcc   : > { %1200 = vmatpush1.bf16.msra.mxu0 %v3794_v38  ;;  %1313 = vmatpush1.bf16.msra.mxu1 %v3795_v39  ;;  %v3836_v2 = vld [vmem:[%s4621_s11 + $0x1a0] ss:$16 sps:$4 sm:$0xff]   ;;  %v3837_v3 = vld [vmem:[%s4621_s11 + $0x1a8] ss:$16 sps:$4 sm:$0xff]   ;;  %v3838_v4 = vld [vmem:[%s4621_s11 + $0x184] ss:$16 sps:$4 sm:$0xff]  }
  0xcd   : > { %1201 = vmatprep.subr.bf16.mxu0 %v3796_v40  ;;  %1314 = vmatprep.subr.bf16.mxu1 %v3798_v41  ;;  %v3840_v5 = vld [vmem:[%s4621_s11 + $0x18c] ss:$16 sps:$4 sm:$0xff]   ;;  %v3870_v6 = vld [vmem:[#allocation2 + $0x34] ss:$-48 sps:$4 sm:$0xff]   ;;  %v3842_v7 = vld [vmem:[%s4621_s11 + $0x180] ss:$16 sps:$4 sm:$0xff]  }
  0xce   : > { %v3843_v8 = vld [vmem:[%s4621_s11 + $0x188] ss:$16 sps:$4 sm:$0xff]   ;;  %v3844_v9 = vld [vmem:[%s4621_s11 + $0x164] ss:$16 sps:$4 sm:$0xff]   ;;  %v3846_v10 = vld [vmem:[%s4621_s11 + $0x16c] ss:$16 sps:$4 sm:$0xff]   ;;  %1225 = vmatprep.mubr.bf16.mxu0 %v3870_v6  ;;  %1338 = vmatprep.mubr.bf16.mxu1 %v3870_v6 }
  0xcf   : > { %v3848_v13 = vld [vmem:[%s4621_s11 + $0x160] ss:$16 sps:$4 sm:$0xff]   ;;  %v3849_v14 = vld [vmem:[%s4621_s11 + $0x168] ss:$16 sps:$4 sm:$0xff]   ;;  %v3850_v15 = vld [vmem:[%s4621_s11 + $0x144] ss:$16 sps:$4 sm:$0xff]  }
  0xd0   : > { %1202 = vmatpush1.bf16.msra.mxu0 %v3800_v42  ;;  %1315 = vmatpush1.bf16.msra.mxu1 %v3801_v43  ;;  %v3852_v16 = vld [vmem:[%s4621_s11 + $0x14c] ss:$16 sps:$4 sm:$0xff]   ;;  %v3854_v17 = vld [vmem:[%s4621_s11 + $0x140] ss:$16 sps:$4 sm:$0xff]   ;;  %v3855_v18 = vld [vmem:[%s4621_s11 + $0x148] ss:$16 sps:$4 sm:$0xff]  }
  0xd1   : > { %1203 = vmatprep.subr.bf16.mxu0 %v3802_v44  ;;  %1316 = vmatprep.subr.bf16.mxu1 %v3804_v45  ;;  %v3856_v19 = vld [vmem:[%s4621_s11 + $0x124] ss:$16 sps:$4 sm:$0xff]   ;;  %v3858_v20 = vld [vmem:[%s4621_s11 + $0x12c] ss:$16 sps:$4 sm:$0xff]   ;;  %v3860_v21 = vld [vmem:[%s4621_s11 + $0x120] ss:$16 sps:$4 sm:$0xff]  }
  0xd2   : > { %v3861_v22 = vld [vmem:[%s4621_s11 + $0x128] ss:$16 sps:$4 sm:$0xff]   ;;  %v3862_v23 = vld [vmem:[%s4621_s11 + $0x104] ss:$16 sps:$4 sm:$0xff]   ;;  %v3864_v24 = vld [vmem:[%s4621_s11 + $0x10c] ss:$16 sps:$4 sm:$0xff]  }
  0xd3   : > { %v3866_v25 = vld [vmem:[%s4621_s11 + $0x100] ss:$16 sps:$4 sm:$0xff]   ;;  %v3867_v11 = vld [vmem:[%s4621_s11 + $0x108] ss:$16 sps:$4 sm:$0xff]   ;;  %v3885_v27 = vld [vmem:[%s4629_s7 + $0x74] ss:$8 sps:$4 sm:$0xff]  }
  0xd4   : > { %1204 = vmatpush1.bf16.msra.mxu0 %v3806_v46  ;;  %1317 = vmatpush1.bf16.msra.mxu1 %v3807_v47  ;;  %v693_v12 = vld [vmem:[#allocation2 + $0x58] sm:$0xff]  ;;  %v3868_v29 = vld [vmem:[#allocation2 + $0x30] ss:$-48 sps:$4 sm:$0xff]   ;;  %v3891_v33 = vld [vmem:[%s4629_s7 + $0x64] ss:$8 sps:$4 sm:$0xff]   ;;  %vm2525_vm1 = vcmask 7168  }
  0xd5   : > { %1205 = vmatprep.subr.bf16.mxu0 %v3808_v48  ;;  %1318 = vmatprep.subr.bf16.mxu1 %v3810_v49  ;;  %v694_v26 = vld [vmem:[#allocation2 + $0x18] sm:$0xff]  ;;  %v3894_v34 = vld [vmem:[%s4629_s7 + $0x164] ss:$8 sps:$4 sm:$0xff]   ;;  %v3889_v35 = vld [vmem:[%s4629_s7 + $0x60] ss:$8 sps:$4 sm:$0xff]   ;;  %s5497_s16 = sld [smem:[#allocation26_spill]] }
  0xd6   : > { %v3888_v28 = vld [vmem:[%s4629_s7 + $0x174] ss:$8 sps:$4 sm:$0xff]   ;;  %v3373_v30 = vcombine.high %v693_v12, %v694_v26  ;;  %v3883_v31 = vld [vmem:[%s4629_s7 + $0x70] ss:$8 sps:$4 sm:$0xff]   ;;  %v3892_v36 = vld [vmem:[%s4629_s7 + $0x160] ss:$8 sps:$4 sm:$0xff]   ;;  %v3372_v39 = vcombine.low %v693_v12, %v694_v26 }
  0xd7   : > { %v3886_v32 = vld [vmem:[%s4629_s7 + $0x170] ss:$8 sps:$4 sm:$0xff]   ;;  %v3897_v37 = vld [vmem:[%s4629_s7 + $0x54] ss:$8 sps:$4 sm:$0xff]   ;;  %v3871_v40 = vld [vmem:[#allocation2 + $0x54] ss:$24 sps:$4 sm:$0xff]  }
  0xd8   : > { %1206 = vmatpush1.bf16.msra.mxu0 %v3812_v50  ;;  %1319 = vmatpush1.bf16.msra.mxu1 %v3813_v51  ;;  %v3900_v38 = vld [vmem:[%s4629_s7 + $0x154] ss:$8 sps:$4 sm:$0xff]   ;;  %v3895_v41 = vld [vmem:[%s4629_s7 + $0x50] ss:$8 sps:$4 sm:$0xff]   ;;  %v3903_v43 = vld [vmem:[%s4629_s7 + $0x44] ss:$8 sps:$4 sm:$0xff]  }
  0xd9   : > { %1207 = vmatprep.subr.bf16.mxu0 %v3814_v52  ;;  %1320 = vmatprep.subr.bf16.mxu1 %v3816_v53  ;;  %v3898_v42 = vld [vmem:[%s4629_s7 + $0x150] ss:$8 sps:$4 sm:$0xff]   ;;  %v3906_v44 = vld [vmem:[%s4629_s7 + $0x144] ss:$8 sps:$4 sm:$0xff]   ;;  %v3901_v47 = vld [vmem:[%s4629_s7 + $0x40] ss:$8 sps:$4 sm:$0xff]  }
  0xda   : > { %v697_v45 = vld [vmem:[#allocation2 + $0x8] sm:$0xff]  ;;  %v3909_v49 = vld [vmem:[%s4629_s7 + $0x34] ss:$8 sps:$4 sm:$0xff]   ;;  %v3907_v53 = vld [vmem:[%s4629_s7 + $0x30] ss:$8 sps:$4 sm:$0xff]  }
  0xdb   : > { %v698_v46 = vld [vmem:[#allocation2 + $0x48] sm:$0xff]  ;;  %v3912_v50 = vld [vmem:[%s4629_s7 + $0x134] ss:$8 sps:$4 sm:$0xff]   ;;  %p3546_p1 = scmp.ne.s32.totalorder %s5497_s16, 1 }
  0xdc   : > { %1208 = vmatpush1.bf16.msra.mxu0 %v3818_v54  ;;  %1321 = vmatpush1.bf16.msra.mxu1 %v3819_v55  ;;  %v3904_v48 = vld [vmem:[%s4629_s7 + $0x140] ss:$8 sps:$4 sm:$0xff]   ;;  %v3377_v52 = vcombine.high %v697_v45, %v698_v46  ;;  %v3910_v54 = vld [vmem:[%s4629_s7 + $0x130] ss:$8 sps:$4 sm:$0xff]   ;;  %v3915_v55 = vld [vmem:[%s4629_s7 + $0x24] ss:$8 sps:$4 sm:$0xff]  }
  0xdd   : > { %1209 = vmatprep.subr.bf16.mxu0 %v3820_v56  ;;  %1322 = vmatprep.subr.bf16.mxu1 %v3822_v57  ;;  %v3873_v51 = vld [vmem:[#allocation2 + $0x50] ss:$24 sps:$4 sm:$0xff]   ;;  %v3918_v56 = vld [vmem:[%s4629_s7 + $0x124] ss:$8 sps:$4 sm:$0xff]   ;;  %v699_v57 = vld [vmem:[#allocation2 + $0x40] sm:$0xff]  ;;  %s5498_s9 = sld [smem:[#allocation39_spill]] (!%p3546_p1) }
  0xde   : > { %v3928_v6 = vld [vmem:[%s4629_s7 + $0x100] ss:$8 sps:$4 sm:$0xff]  }
  0xdf   : > { %v3949_v12 = vld [vmem:[%s4629_s7 + $0xc0] ss:$8 sps:$4 sm:$0xff]  }
  0xe0   : > { %1210 = vmatpush2.bf16.msra.mxu0 %v3824_v58  ;;  %1323 = vmatpush2.bf16.msra.mxu1 %v3825_v59  ;;  %v700_v58 = vld [vmem:[#allocation2 + $0x20] sm:$0xff]  ;;  %v3913_v59 = vld [vmem:[%s4629_s7 + $0x20] ss:$8 sps:$4 sm:$0xff]  }
  0xe1   : > { %1211 = vmatprep.subr.bf16.mxu0 %v3826_v60  ;;  %1324 = vmatprep.subr.bf16.mxu1 %v3828_v61  ;;  %v3916_v60 = vld [vmem:[%s4629_s7 + $0x120] ss:$8 sps:$4 sm:$0xff]   ;;  %v3921_v61 = vld [vmem:[%s4629_s7 + $0x14] ss:$8 sps:$4 sm:$0xff]  }
  0xe2   : > { %v3952_v26 = vld [vmem:[%s4629_s7 + $0x1c0] ss:$8 sps:$4 sm:$0xff]  }
  0xe4   : > { %1212 = vmatpush2.bf16.msra.mxu0 %v3830_v62  ;;  %1325 = vmatpush2.bf16.msra.mxu1 %v3831_v63  ;;  %v3924_v62 = vld [vmem:[%s4629_s7 + $0x114] ss:$8 sps:$4 sm:$0xff]   ;;  %v3376_v63 = vcombine.low %v697_v45, %v698_v46  ;;  %v3976_v45 = vld [vmem:[%s4629_s7 + $0x180] ss:$8 sps:$4 sm:$0xff]   ;;  %v773_v46 = vlaneseq }
  0xe5   : > { %1213 = vmatprep.subr.bf16.mxu0 %v3832_v0  ;;  %1326 = vmatprep.subr.bf16.mxu1 %v3834_v1  ;;  %v3919_v0 = vld [vmem:[%s4629_s7 + $0x10] ss:$8 sps:$4 sm:$0xff]  }
  0xe6   : > { %v3922_v1 = vld [vmem:[%s4629_s7 + $0x110] ss:$8 sps:$4 sm:$0xff]  }
  0xe8   : > { %1214 = vmatpush2.bf16.msra.mxu0 %v3836_v2  ;;  %1327 = vmatpush2.bf16.msra.mxu1 %v3837_v3  ;;  %v3379_v2 = vcombine.high %v699_v57, %v700_v58  ;;  %v3927_v3 = vld [vmem:[%s4629_s7 + $0x4] ss:$8 sps:$4 sm:$0xff]  }
  0xe9   : > { %1215 = vmatprep.subr.bf16.mxu0 %v3838_v4  ;;  %1328 = vmatprep.subr.bf16.mxu1 %v3840_v5  ;;  %v3930_v4 = vld [vmem:[%s4629_s7 + $0x104] ss:$8 sps:$4 sm:$0xff]   ;;  %v3925_v5 = vld [vmem:[%s4629_s7] ss:$8 sps:$4 sm:$0xff]  }
  0xec   : > { %1216 = vmatpush2.bf16.msra.mxu0 %v3842_v7  ;;  %1329 = vmatpush2.bf16.msra.mxu1 %v3843_v8  ;;  %v3933_v7 = vld [vmem:[%s4629_s7 + $0xf4] ss:$8 sps:$4 sm:$0xff]  }
  0xed   : > { %1217 = vmatprep.subr.bf16.mxu0 %v3844_v9  ;;  %1330 = vmatprep.subr.bf16.mxu1 %v3846_v10  ;;  %v3936_v8 = vld [vmem:[%s4629_s7 + $0x1f4] ss:$8 sps:$4 sm:$0xff]   ;;  %v3378_v9 = vcombine.low %v699_v57, %v700_v58 }
  0xee   : > { %v3874_v10 = vld [vmem:[#allocation2 + $0x14] ss:$40 sps:$4 sm:$0xff]  }
  0xf0   : > { %1218 = vmatpush2.bf16.msra.mxu0 %v3848_v13  ;;  %1331 = vmatpush2.bf16.msra.mxu1 %v3849_v14  ;;  %v3931_v13 = vld [vmem:[%s4629_s7 + $0xf0] ss:$8 sps:$4 sm:$0xff]  }
  0xf1   : > { %1219 = vmatprep.subr.bf16.mxu0 %v3850_v15  ;;  %1332 = vmatprep.subr.bf16.mxu1 %v3852_v16  ;;  %v3934_v14 = vld [vmem:[%s4629_s7 + $0x1f0] ss:$8 sps:$4 sm:$0xff]   ;;  %v3939_v15 = vld [vmem:[%s4629_s7 + $0xe4] ss:$8 sps:$4 sm:$0xff]  }
  0xf2   : > { %v3942_v16 = vld [vmem:[%s4629_s7 + $0x1e4] ss:$8 sps:$4 sm:$0xff]  }
  0xf4   : > { %1220 = vmatpush2.bf16.msra.mxu0 %v3854_v17  ;;  %1333 = vmatpush2.bf16.msra.mxu1 %v3855_v18  ;;  %v3937_v17 = vld [vmem:[%s4629_s7 + $0xe0] ss:$8 sps:$4 sm:$0xff]  }
  0xf5   : > { %1221 = vmatprep.subr.bf16.mxu0 %v3856_v19  ;;  %1334 = vmatprep.subr.bf16.mxu1 %v3858_v20  ;;  %v3940_v18 = vld [vmem:[%s4629_s7 + $0x1e0] ss:$8 sps:$4 sm:$0xff]   ;;  %v3945_v19 = vld [vmem:[%s4629_s7 + $0xd4] ss:$8 sps:$4 sm:$0xff]  }
  0xf6   : > { %v3948_v20 = vld [vmem:[%s4629_s7 + $0x1d4] ss:$8 sps:$4 sm:$0xff]  }
  0xf8   : > { %1222 = vmatpush2.bf16.msra.mxu0 %v3860_v21  ;;  %1335 = vmatpush2.bf16.msra.mxu1 %v3861_v22  ;;  %v3876_v21 = vld [vmem:[#allocation2 + $0x10] ss:$40 sps:$4 sm:$0xff]   ;;  %v3877_v22 = vld [vmem:[#allocation2 + $0x64] ss:$16 sps:$4 sm:$0xff]  }
  0xf9   : > { %1223 = vmatprep.subr.bf16.mxu0 %v3862_v23  ;;  %1336 = vmatprep.subr.bf16.mxu1 %v3864_v24  ;;  %v3943_v23 = vld [vmem:[%s4629_s7 + $0xd0] ss:$8 sps:$4 sm:$0xff]  }
  0xfa   : > { %v3946_v24 = vld [vmem:[%s4629_s7 + $0x1d0] ss:$8 sps:$4 sm:$0xff]  }
  0xfc   : > { %1224 = vmatpush2.bf16.msra.mxu0 %v3866_v25  ;;  %1337 = vmatpush2.bf16.msra.mxu1 %v3867_v11  ;;  %v3951_v25 = vld [vmem:[%s4629_s7 + $0xc4] ss:$8 sps:$4 sm:$0xff]  }
  0xfd   : > { %2123 = vmatprep.subr.bf16.mxu0 %v3885_v27  ;;  %2236 = vmatprep.subr.bf16.mxu1 %v3888_v28  ;;  %v3954_v11 = vld [vmem:[%s4629_s7 + $0x1c4] ss:$8 sps:$4 sm:$0xff]   ;;  %v3957_v27 = vld [vmem:[%s4629_s7 + $0xb4] ss:$8 sps:$4 sm:$0xff]  }
  0xfe   : > { %v3960_v28 = vld [vmem:[%s4629_s7 + $0x1b4] ss:$8 sps:$4 sm:$0xff]  }
  0xff   : > { %1226 = vmatmul.mubr.bf16.vlgmr.msra.gmra.mxu0 %v3868_v29  ;;  %1339 = vmatmul.mubr.bf16.vlgmr.msra.gmra.mxu1 %v3868_v29  ;;  %v3879_v29 = vld [vmem:[#allocation2 + $0x60] ss:$16 sps:$4 sm:$0xff]  }
 0x100   : > { %1235 = vmatprep.mubr.bf16.mxu0 %v3373_v30  ;;  %1348 = vmatprep.mubr.bf16.mxu1 %v3373_v30  ;;  %v3880_v30 = vld [vmem:[#allocation2 + $0x7c] ss:$-80 sps:$4 sm:$0xff]  }
 0x101   : > { %2124 = vmatpush1.bf16.msra.mxu0 %v3883_v31  ;;  %2237 = vmatpush1.bf16.msra.mxu1 %v3886_v32  ;;  %v3955_v31 = vld [vmem:[%s4629_s7 + $0xb0] ss:$8 sps:$4 sm:$0xff]  }
 0x102   : > { %2125 = vmatprep.subr.bf16.mxu0 %v3891_v33  ;;  %2238 = vmatprep.subr.bf16.mxu1 %v3894_v34  ;;  %v3958_v32 = vld [vmem:[%s4629_s7 + $0x1b0] ss:$8 sps:$4 sm:$0xff]   ;;  %v3963_v34 = vld [vmem:[%s4629_s7 + $0xa4] ss:$8 sps:$4 sm:$0xff]  }
 0x103   : > { %v3882_v33 = vld [vmem:[#allocation2 + $0x78] ss:$-80 sps:$4 sm:$0xff]  }
 0x105   : > { %2126 = vmatpush1.bf16.msra.mxu0 %v3889_v35  ;;  %2239 = vmatpush1.bf16.msra.mxu1 %v3892_v36  ;;  %v3966_v35 = vld [vmem:[%s4629_s7 + $0x1a4] ss:$8 sps:$4 sm:$0xff]   ;;  %v3961_v36 = vld [vmem:[%s4629_s7 + $0xa0] ss:$8 sps:$4 sm:$0xff]  }
 0x106   : > { %2127 = vmatprep.subr.bf16.mxu0 %v3897_v37  ;;  %2240 = vmatprep.subr.bf16.mxu1 %v3900_v38  ;;  %v3964_v37 = vld [vmem:[%s4629_s7 + $0x1a0] ss:$8 sps:$4 sm:$0xff]   ;;  %v3969_v38 = vld [vmem:[%s4629_s7 + $0x94] ss:$8 sps:$4 sm:$0xff]  }
 0x107   : > { %1236 = vmatmul.mubr.bf16.gmra.mxu0 %v3372_v39  ;;  %1349 = vmatmul.mubr.bf16.gmra.mxu1 %v3372_v39  ;;  %v3972_v39 = vld [vmem:[%s4629_s7 + $0x194] ss:$8 sps:$4 sm:$0xff]  }
 0x108   : > { %1245 = vmatprep.mubr.bf16.mxu0 %v3871_v40  ;;  %1358 = vmatprep.mubr.bf16.mxu1 %v3871_v40  ;;  %v3967_v40 = vld [vmem:[%s4629_s7 + $0x90] ss:$8 sps:$4 sm:$0xff]  }
 0x109   : > { %2128 = vmatpush1.bf16.msra.mxu0 %v3895_v41  ;;  %2241 = vmatpush1.bf16.msra.mxu1 %v3898_v42  ;;  %v3970_v41 = vld [vmem:[%s4629_s7 + $0x190] ss:$8 sps:$4 sm:$0xff]   ;;  %v3975_v42 = vld [vmem:[%s4629_s7 + $0x84] ss:$8 sps:$4 sm:$0xff]  }
 0x10a   : > { %2129 = vmatprep.subr.bf16.mxu0 %v3903_v43  ;;  %2242 = vmatprep.subr.bf16.mxu1 %v3906_v44  ;;  %v3978_v43 = vld [vmem:[%s4629_s7 + $0x184] ss:$8 sps:$4 sm:$0xff]   ;;  %v3973_v44 = vld [vmem:[%s4629_s7 + $0x80] ss:$8 sps:$4 sm:$0xff]  }
 0x10d   : > { %2130 = vmatpush1.bf16.msra.mxu0 %v3901_v47  ;;  %2243 = vmatpush1.bf16.msra.mxu1 %v3904_v48  ;;  %v4859_v47 = vshrl.u32 %v773_v46, 7 }
 0x10e   : > { %2131 = vmatprep.subr.bf16.mxu0 %v3909_v49  ;;  %2244 = vmatprep.subr.bf16.mxu1 %v3912_v50  ;;  %v771_v50 = vld [vmem:[%s4627_s22] sm:$0xf] }
 0x10f   : > { %1246 = vmatmul.mubr.bf16.gmra.mxu0 %v3873_v51  ;;  %1359 = vmatmul.mubr.bf16.gmra.mxu1 %v3873_v51  ;;  %v775_v48 = vsub.s32 0, %v4859_v47  ;;  %v783_v49 = vsub.s32 2, %v4859_v47  ;;  %v779_v51 = vsub.s32 1, %v4859_v47 }
 0x110   : > { %1255 = vmatprep.mubr.bf16.mxu0 %v3377_v52  ;;  %1368 = vmatprep.mubr.bf16.mxu1 %v3377_v52  ;;  %v787_v52 = vsub.s32 3, %v4859_v47 }
 0x111   : > { %2132 = vmatpush1.bf16.msra.mxu0 %v3907_v53  ;;  %2245 = vmatpush1.bf16.msra.mxu1 %v3910_v54  ;;  %v4868_v53 = vrot.slane %v771_v50, %v775_v48  ;;  %v4870_v54 = vrot.slane %v771_v50, %v783_v49 }
 0x112   : > { %2133 = vmatprep.subr.bf16.mxu0 %v3915_v55  ;;  %2246 = vmatprep.subr.bf16.mxu1 %v3918_v56  ;;  %v4874_v55 = vrot.slane %v771_v50, %v779_v51  ;;  %v4876_v56 = vrot.slane %v771_v50, %v787_v52 }
 0x115   : > { %2134 = vmatpush1.bf16.msra.mxu0 %v3913_v59  ;;  %2247 = vmatpush1.bf16.msra.mxu1 %v3916_v60 }
 0x116   : > { %2135 = vmatprep.subr.bf16.mxu0 %v3921_v61  ;;  %2248 = vmatprep.subr.bf16.mxu1 %v3924_v62 }
 0x117   : > { %1256 = vmatmul.mubr.bf16.gmra.mxu0 %v3376_v63  ;;  %1369 = vmatmul.mubr.bf16.gmra.mxu1 %v3376_v63 }
 0x118   : > { %1265 = vmatprep.mubr.bf16.mxu0 %v3379_v2  ;;  %1378 = vmatprep.mubr.bf16.mxu1 %v3379_v2 }
 0x119   : > { %2136 = vmatpush1.bf16.msra.mxu0 %v3919_v0  ;;  %2249 = vmatpush1.bf16.msra.mxu1 %v3922_v1 }
 0x11a   : > { %2137 = vmatprep.subr.bf16.mxu0 %v3927_v3  ;;  %2250 = vmatprep.subr.bf16.mxu1 %v3930_v4 }
 0x11d   : > { %2138 = vmatpush1.bf16.msra.mxu0 %v3925_v5  ;;  %2251 = vmatpush1.bf16.msra.mxu1 %v3928_v6 }
 0x11e   : > { %2139 = vmatprep.subr.bf16.mxu0 %v3933_v7  ;;  %2252 = vmatprep.subr.bf16.mxu1 %v3936_v8 }
 0x11f   : > { %1266 = vmatmul.mubr.bf16.gmra.mxu0 %v3378_v9  ;;  %1379 = vmatmul.mubr.bf16.gmra.mxu1 %v3378_v9 }
 0x120   : > { %1275 = vmatprep.mubr.bf16.mxu0 %v3874_v10  ;;  %1388 = vmatprep.mubr.bf16.mxu1 %v3874_v10 }
 0x121   : > { %2140 = vmatpush2.bf16.msra.mxu0 %v3931_v13  ;;  %2253 = vmatpush2.bf16.msra.mxu1 %v3934_v14 }
 0x122   : > { %2141 = vmatprep.subr.bf16.mxu0 %v3939_v15  ;;  %2254 = vmatprep.subr.bf16.mxu1 %v3942_v16 }
 0x125   : > { %2142 = vmatpush2.bf16.msra.mxu0 %v3937_v17  ;;  %2255 = vmatpush2.bf16.msra.mxu1 %v3940_v18 }
 0x126   : > { %2143 = vmatprep.subr.bf16.mxu0 %v3945_v19  ;;  %2256 = vmatprep.subr.bf16.mxu1 %v3948_v20 }
 0x127   : > { %1276 = vmatmul.mubr.bf16.gmra.mxu0 %v3876_v21  ;;  %1389 = vmatmul.mubr.bf16.gmra.mxu1 %v3876_v21 }
 0x128   : > { %1285 = vmatprep.mubr.bf16.mxu0 %v3877_v22  ;;  %1398 = vmatprep.mubr.bf16.mxu1 %v3877_v22 }
 0x129   : > { %2144 = vmatpush2.bf16.msra.mxu0 %v3943_v23  ;;  %2257 = vmatpush2.bf16.msra.mxu1 %v3946_v24 }
 0x12a   : > { %2145 = vmatprep.subr.bf16.mxu0 %v3951_v25  ;;  %2258 = vmatprep.subr.bf16.mxu1 %v3954_v11 }
 0x12d   : > { %2146 = vmatpush2.bf16.msra.mxu0 %v3949_v12  ;;  %2259 = vmatpush2.bf16.msra.mxu1 %v3952_v26 }
 0x12e   : > { %2147 = vmatprep.subr.bf16.mxu0 %v3957_v27  ;;  %2260 = vmatprep.subr.bf16.mxu1 %v3960_v28 }
 0x12f   : > { %1286 = vmatmul.mubr.bf16.gmra.mxu0 %v3879_v29  ;;  %1399 = vmatmul.mubr.bf16.gmra.mxu1 %v3879_v29 }
 0x130   : > { %1295 = vmatprep.mubr.bf16.mxu0 %v3880_v30  ;;  %1408 = vmatprep.mubr.bf16.mxu1 %v3880_v30 }
 0x131   : > { %2148 = vmatpush2.bf16.msra.mxu0 %v3955_v31  ;;  %2261 = vmatpush2.bf16.msra.mxu1 %v3958_v32 }
 0x132   : > { %2149 = vmatprep.subr.bf16.mxu0 %v3963_v34  ;;  %2262 = vmatprep.subr.bf16.mxu1 %v3966_v35 }
 0x135   : > { %2150 = vmatpush2.bf16.msra.mxu0 %v3961_v36  ;;  %2263 = vmatpush2.bf16.msra.mxu1 %v3964_v37 }
 0x136   : > { %2151 = vmatprep.subr.bf16.mxu0 %v3969_v38  ;;  %2264 = vmatprep.subr.bf16.mxu1 %v3972_v39 }
 0x137   : > { %1296 = vmatmul.mubr.bf16.gmra.mxu0 %v3882_v33  ;;  %1409 = vmatmul.mubr.bf16.gmra.mxu1 %v3882_v33 }
 0x139   : > { %2152 = vmatpush2.bf16.msra.mxu0 %v3967_v40  ;;  %2265 = vmatpush2.bf16.msra.mxu1 %v3970_v41 }
 0x13a   : > { %2153 = vmatprep.subr.bf16.mxu0 %v3975_v42  ;;  %2266 = vmatprep.subr.bf16.mxu1 %v3978_v43 }
 0x13d   : > { %2154 = vmatpush2.bf16.msra.mxu0 %v3973_v44  ;;  %2267 = vmatpush2.bf16.msra.mxu1 %v3976_v45 }
 0x1bf   : > { %v1227_v57 = vpop.f32.mrf.mxu0  ;;  %v1340_v58 = vpop.f32.mrf.mxu1 }
 0x1c0   : > { %v1228_v59 = vadd.f32 %v1227_v57, %v4868_v53  ;;  %v1341_v60 = vadd.f32 %v1340_v58, %v4870_v54 }
 0x1c1   : > { %v1229_v61 = vpop.f32.mrf.mxu0  ;;  %v1342_v62 = vpop.f32.mrf.mxu1 }
 0x1c2   : > { %v1230_v63 = vadd.f32 %v1229_v61, %v4874_v55  ;;  %v1343_v0 = vadd.f32 %v1342_v62, %v4876_v56  ;;  %v1419_v1 = vmax.f32 %v1228_v59, 0.0  ;;  %v1421_v2 = vmax.f32 %v1341_v60, 0.0 }
 0x1c3   : > { %v1231_v3 = vpop.f32.mrf.mxu0  ;;  %v1344_v4 = vpop.f32.mrf.mxu1 }
 0x1c4   : > { %v1420_v5 = vmax.f32 %v1230_v63, 0.0  ;;  %v1422_v6 = vmax.f32 %v1343_v0, 0.0  ;;  %v1232_v7 = vadd.f32 %v1231_v3, %v4868_v53  ;;  %v1345_v8 = vadd.f32 %v1344_v4, %v4870_v54 }
 0x1c5   : > { %v1233_v9 = vpop.f32.mrf.mxu0  ;;  %v1346_v10 = vpop.f32.mrf.mxu1 }
 0x1c6   : > { %v3578_v13 = vpack.c.bf16 %v1420_v5, %v1419_v1  ;;  %v3579_v14 = vpack.c.bf16 %v1422_v6, %v1421_v2  ;;  %v1423_v15 = vmax.f32 %v1232_v7, 0.0  ;;  %v1425_v16 = vmax.f32 %v1345_v8, 0.0 }
 0x1c7   : > { %v1234_v17 = vadd.f32 %v1233_v9, %v4874_v55  ;;  %v1347_v18 = vadd.f32 %v1346_v10, %v4876_v56  ;;  %v1237_v19 = vpop.f32.mrf.mxu0  ;;  %v1350_v20 = vpop.f32.mrf.mxu1  ;;  %v2429_v21 = vadd.f32 %v1420_v5, %v1419_v1 }
 0x1c8   : > { %1675 = vst [vmem:[%s4638_s13] sm:$0xff] %v3578_v13  ;;  %1676 = vst [vmem:[%s4638_s13 + $0x8] sm:$0xff] %v3579_v14  ;;  %v1483_v22 = vpack.c.bf16 %v1423_v15, %v1419_v1  ;;  %v1238_v23 = vadd.f32 %v1237_v19, %v4868_v53  ;;  %v1351_v24 = vadd.f32 %v1350_v20, %v4870_v54 }
 0x1c9   : > { %v1485_v25 = vpack.c.bf16 %v1425_v16, %v1421_v2  ;;  %v1424_v11 = vmax.f32 %v1234_v17, 0.0  ;;  %v1426_v12 = vmax.f32 %v1347_v18, 0.0  ;;  %v1239_v26 = vpop.f32.mrf.mxu0  ;;  %v1352_v27 = vpop.f32.mrf.mxu1  ;;  %v2430_v28 = vadd.f32 %v2429_v21, %v1421_v2 }
 0x1ca   : > { %v4890_v29 = vmax.f32 %v1238_v23, 0.0  ;;  %v4892_v30 = vmax.f32 %v1351_v24, 0.0  ;;  %v1240_v31 = vadd.f32 %v1239_v26, %v4874_v55  ;;  %v1353_v32 = vadd.f32 %v1352_v27, %v4876_v56 }
 0x1cb   : > { %v3580_v33 = vpack.c.bf16 %v1424_v11, %v1423_v15  ;;  %v3581_v34 = vpack.c.bf16 %v1426_v12, %v1425_v16  ;;  %v1241_v35 = vpop.f32.mrf.mxu0  ;;  %v1354_v36 = vpop.f32.mrf.mxu1  ;;  %v1484_v37 = vpack.c.bf16 %v1424_v11, %v1420_v5  ;;  %v1486_v38 = vpack.c.bf16 %v1426_v12, %v1422_v6 }
 0x1cc   : > { %v4896_v39 = vmax.f32 %v1240_v31, 0.0  ;;  %v1430_v40 = vmax.f32 %v1353_v32, 0.0  ;;  %v1242_v41 = vadd.f32 %v1241_v35, %v4868_v53  ;;  %v1355_v42 = vadd.f32 %v1354_v36, %v4870_v54 }
 0x1cd   : > { %1677 = vst [vmem:[%s4638_s13 + $0x10] sm:$0xff] %v3580_v33  ;;  %1678 = vst [vmem:[%s4638_s13 + $0x18] sm:$0xff] %v3581_v34  ;;  %2155 = vmatprep.mubr.bf16.mxu0 %v1484_v37  ;;  %2268 = vmatprep.mubr.bf16.mxu1 %v1486_v38  ;;  %v2431_v43 = vadd.f32 %v2430_v28, %v1422_v6  ;;  %v1243_v44 = vpop.f32.mrf.mxu0  ;;  %v1356_v45 = vpop.f32.mrf.mxu1  ;;  %v2434_v49 = vadd.f32 %v1424_v11, %v1423_v15 }
 0x1ce   : > { %v3582_v50 = vpack.c.bf16 %v4896_v39, %v4890_v29  ;;  %v3583_v52 = vpack.c.bf16 %v1430_v40, %v4892_v30  ;;  %v1433_v57 = vmax.f32 %v1355_v42, 0.0  ;;  %2156 = vmatmul.mubr.bf16.vlgmr.msra.gmra.mxu0 %v1483_v22  ;;  %2269 = vmatmul.mubr.bf16.vlgmr.msra.gmra.mxu1 %v1485_v25  ;;  %v1244_v58 = vadd.f32 %v1243_v44, %v4874_v55 }
 0x1cf   : > { %2432 = vadd.xlane.f32.xlu0 %v2431_v43  ;;  %v1357_v59 = vadd.f32 %v1356_v45, %v4876_v56  ;;  %v1247_v60 = vpop.f32.mrf.mxu0  ;;  %v1360_v61 = vpop.f32.mrf.mxu1  ;;  %v2435_v62 = vadd.f32 %v2434_v49, %v1425_v16  ;;  %v2439_v63 = vadd.f32 %v4896_v39, %v4890_v29  ;;  %v1431_v0 = vmax.f32 %v1242_v41, 0.0 }
 0x1d0   : > { %1679 = vst [vmem:[%s4638_s13 + $0x20] sm:$0xff] %v3582_v50  ;;  %1680 = vst [vmem:[%s4638_s13 + $0x28] sm:$0xff] %v3583_v52  ;;  %v1248_v1 = vadd.f32 %v1247_v60, %v4868_v53  ;;  %v1361_v2 = vadd.f32 %v1360_v61, %v4870_v54  ;;  %v1489_v3 = vpack.c.bf16 %v1433_v57, %v4892_v30  ;;  %v1432_v4 = vmax.f32 %v1244_v58, 0.0 }
 0x1d1   : > { %v1434_v5 = vmax.f32 %v1357_v59, 0.0  ;;  %v2436_v6 = vadd.f32 %v2435_v62, %v1426_v12  ;;  %v1249_v7 = vpop.f32.mrf.mxu0  ;;  %v1362_v8 = vpop.f32.mrf.mxu1  ;;  %v2440_v9 = vadd.f32 %v2439_v63, %v4892_v30  ;;  %v1487_v32 = vpack.c.bf16 %v1431_v0, %v4890_v29 }
 0x1d2   : > { %v4915_v10 = vmax.f32 %v1248_v1, 0.0  ;;  %v4917_v13 = vmax.f32 %v1361_v2, 0.0  ;;  %v1250_v14 = vadd.f32 %v1249_v7, %v4874_v55  ;;  %v1363_v15 = vadd.f32 %v1362_v8, %v4876_v56 }
 0x1d3   : > { %v3584_v16 = vpack.c.bf16 %v1432_v4, %v1431_v0  ;;  %v3585_v17 = vpack.c.bf16 %v1434_v5, %v1433_v57  ;;  %2437 = vadd.xlane.f32.xlu0 %v2436_v6  ;;  %v1251_v18 = vpop.f32.mrf.mxu0  ;;  %v1364_v19 = vpop.f32.mrf.mxu1  ;;  %v1490_v20 = vpack.c.bf16 %v1434_v5, %v1430_v40  ;;  %v2441_v21 = vadd.f32 %v2440_v9, %v1430_v40 }
 0x1d4   : > { %v4921_v22 = vmax.f32 %v1250_v14, 0.0  ;;  %v1438_v23 = vmax.f32 %v1363_v15, 0.0  ;;  %v1252_v24 = vadd.f32 %v1251_v18, %v4868_v53  ;;  %v1365_v25 = vadd.f32 %v1364_v19, %v4870_v54 }
 0x1d5   : > { %1681 = vst [vmem:[%s4638_s13 + $0x30] sm:$0xff] %v3584_v16  ;;  %1682 = vst [vmem:[%s4638_s13 + $0x38] sm:$0xff] %v3585_v17  ;;  %2278 = vmatprep.mubr.bf16.mxu1 %v1490_v20  ;;  %2442 = vadd.xlane.f32.xlu1 %v2441_v21  ;;  %v1488_v11 = vpack.c.bf16 %v1432_v4, %v4896_v39  ;;  %v1253_v12 = vpop.f32.mrf.mxu0  ;;  %v1366_v26 = vpop.f32.mrf.mxu1  ;;  %v2444_v27 = vadd.f32 %v1432_v4, %v1431_v0 }
 0x1d6   : > { %v3586_v28 = vpack.c.bf16 %v4921_v22, %v4915_v10  ;;  %v3587_v30 = vpack.c.bf16 %v1438_v23, %v4917_v13  ;;  %v1441_v31 = vmax.f32 %v1365_v25, 0.0  ;;  %2279 = vmatmul.mubr.bf16.gmra.mxu1 %v1489_v3  ;;  %v1254_v33 = vadd.f32 %v1253_v12, %v4874_v55 }
 0x1d7   : > { %2165 = vmatprep.mubr.bf16.mxu0 %v1488_v11  ;;  %v1367_v34 = vadd.f32 %v1366_v26, %v4876_v56  ;;  %v1257_v35 = vpop.f32.mrf.mxu0  ;;  %v1370_v36 = vpop.f32.mrf.mxu1  ;;  %v2445_v37 = vadd.f32 %v2444_v27, %v1433_v57  ;;  %v2449_v38 = vadd.f32 %v4921_v22, %v4915_v10  ;;  %v1439_v39 = vmax.f32 %v1252_v24, 0.0 }
 0x1d8   : > { %1683 = vst [vmem:[%s4638_s13 + $0x40] sm:$0xff] %v3586_v28  ;;  %1684 = vst [vmem:[%s4638_s13 + $0x48] sm:$0xff] %v3587_v30  ;;  %2166 = vmatmul.mubr.bf16.gmra.mxu0 %v1487_v32  ;;  %v1258_v40 = vadd.f32 %v1257_v35, %v4868_v53  ;;  %v1371_v29 = vadd.f32 %v1370_v36, %v4870_v54  ;;  %v1493_v41 = vpack.c.bf16 %v1441_v31, %v4917_v13 }
 0x1d9   : > { %v1440_v42 = vmax.f32 %v1254_v33, 0.0  ;;  %v1442_v43 = vmax.f32 %v1367_v34, 0.0  ;;  %v2446_v44 = vadd.f32 %v2445_v37, %v1434_v5  ;;  %v1259_v45 = vpop.f32.mrf.mxu0  ;;  %v1372_v49 = vpop.f32.mrf.mxu1  ;;  %v2450_v50 = vadd.f32 %v2449_v38, %v4917_v13 }
 0x1da   : > { %v4942_v52 = vmax.f32 %v1258_v40, 0.0  ;;  %v4944_v57 = vmax.f32 %v1371_v29, 0.0  ;;  %v1260_v58 = vadd.f32 %v1259_v45, %v4874_v55  ;;  %v1373_v59 = vadd.f32 %v1372_v49, %v4876_v56 }
 0x1db   : > { %v3588_v60 = vpack.c.bf16 %v1440_v42, %v1439_v39  ;;  %v3589_v61 = vpack.c.bf16 %v1442_v43, %v1441_v31  ;;  %2447 = vadd.xlane.f32.xlu1 %v2446_v44  ;;  %v1261_v62 = vpop.f32.mrf.mxu0  ;;  %v1374_v63 = vpop.f32.mrf.mxu1  ;;  %v1494_v0 = vpack.c.bf16 %v1442_v43, %v1438_v23  ;;  %v2451_v1 = vadd.f32 %v2450_v50, %v1438_v23 }
 0x1dc   : > { %v4948_v2 = vmax.f32 %v1260_v58, 0.0  ;;  %v1446_v3 = vmax.f32 %v1373_v59, 0.0  ;;  %v1262_v4 = vadd.f32 %v1261_v62, %v4868_v53  ;;  %v1375_v5 = vadd.f32 %v1374_v63, %v4870_v54 }
 0x1dd   : > { %1685 = vst [vmem:[%s4638_s13 + $0x50] sm:$0xff] %v3588_v60  ;;  %1686 = vst [vmem:[%s4638_s13 + $0x58] sm:$0xff] %v3589_v61  ;;  %2288 = vmatprep.mubr.bf16.mxu1 %v1494_v0  ;;  %2452 = vadd.xlane.f32.xlu0 %v2451_v1  ;;  %v1492_v6 = vpack.c.bf16 %v1440_v42, %v4921_v22  ;;  %v1263_v7 = vpop.f32.mrf.mxu0  ;;  %v1376_v8 = vpop.f32.mrf.mxu1  ;;  %v2454_v9 = vadd.f32 %v1440_v42, %v1439_v39 }
 0x1de   : > { %v3590_v13 = vpack.c.bf16 %v4948_v2, %v4942_v52  ;;  %v3591_v14 = vpack.c.bf16 %v1446_v3, %v4944_v57  ;;  %v1449_v15 = vmax.f32 %v1375_v5, 0.0  ;;  %v1491_v16 = vpack.c.bf16 %v1439_v39, %v4915_v10  ;;  %2289 = vmatmul.mubr.bf16.gmra.mxu1 %v1493_v41 }
 0x1df   : > { %2175 = vmatprep.mubr.bf16.mxu0 %v1492_v6  ;;  %v1264_v17 = vadd.f32 %v1263_v7, %v4874_v55  ;;  %v1377_v18 = vadd.f32 %v1376_v8, %v4876_v56  ;;  %v1267_v19 = vpop.f32.mrf.mxu0  ;;  %v1380_v20 = vpop.f32.mrf.mxu1  ;;  %v2455_v21 = vadd.f32 %v2454_v9, %v1441_v31  ;;  %v2459_v22 = vadd.f32 %v4948_v2, %v4942_v52 }
 0x1e0   : > { %1687 = vst [vmem:[%s4638_s13 + $0x60] sm:$0xff] %v3590_v13  ;;  %1688 = vst [vmem:[%s4638_s13 + $0x68] sm:$0xff] %v3591_v14  ;;  %v1447_v23 = vmax.f32 %v1262_v4, 0.0  ;;  %2176 = vmatmul.mubr.bf16.gmra.mxu0 %v1491_v16  ;;  %v1268_v24 = vadd.f32 %v1267_v19, %v4868_v53  ;;  %v1381_v10 = vadd.f32 %v1380_v20, %v4870_v54 }
 0x1e1   : > { %v1497_v25 = vpack.c.bf16 %v1449_v15, %v4944_v57  ;;  %v1448_v11 = vmax.f32 %v1264_v17, 0.0  ;;  %v1450_v12 = vmax.f32 %v1377_v18, 0.0  ;;  %v2456_v26 = vadd.f32 %v2455_v21, %v1442_v43  ;;  %v1269_v27 = vpop.f32.mrf.mxu0  ;;  %v1382_v28 = vpop.f32.mrf.mxu1 }
 0x1e2   : > { %v2460_v30 = vadd.f32 %v2459_v22, %v4944_v57  ;;  %v4969_v31 = vmax.f32 %v1268_v24, 0.0  ;;  %v4971_v32 = vmax.f32 %v1381_v10, 0.0  ;;  %v1270_v33 = vadd.f32 %v1269_v27, %v4874_v55 }
 0x1e3   : > { %v1383_v34 = vadd.f32 %v1382_v28, %v4876_v56  ;;  %v3592_v35 = vpack.c.bf16 %v1448_v11, %v1447_v23  ;;  %v3593_v36 = vpack.c.bf16 %v1450_v12, %v1449_v15  ;;  %2457 = vadd.xlane.f32.xlu1 %v2456_v26  ;;  %v1271_v37 = vpop.f32.mrf.mxu0  ;;  %v1384_v38 = vpop.f32.mrf.mxu1  ;;  %v1498_v39 = vpack.c.bf16 %v1450_v12, %v1446_v3 }
 0x1e4   : > { %v2461_v40 = vadd.f32 %v2460_v30, %v1446_v3  ;;  %v4975_v29 = vmax.f32 %v1270_v33, 0.0  ;;  %v1272_v42 = vadd.f32 %v1271_v37, %v4868_v53  ;;  %v1385_v43 = vadd.f32 %v1384_v38, %v4870_v54 }
 0x1e5   : > { %v1454_v41 = vmax.f32 %v1383_v34, 0.0  ;;  %1689 = vst [vmem:[%s4638_s13 + $0x70] sm:$0xff] %v3592_v35  ;;  %1690 = vst [vmem:[%s4638_s13 + $0x78] sm:$0xff] %v3593_v36  ;;  %2298 = vmatprep.mubr.bf16.mxu1 %v1498_v39  ;;  %v1496_v44 = vpack.c.bf16 %v1448_v11, %v4948_v2  ;;  %v1273_v45 = vpop.f32.mrf.mxu0  ;;  %v1386_v49 = vpop.f32.mrf.mxu1  ;;  %v2464_v50 = vadd.f32 %v1448_v11, %v1447_v23 }
 0x1e6   : > { %2462 = vadd.xlane.f32.xlu0 %v2461_v40  ;;  %v3594_v57 = vpack.c.bf16 %v4975_v29, %v4969_v31  ;;  %v1457_v59 = vmax.f32 %v1385_v43, 0.0  ;;  %v1495_v60 = vpack.c.bf16 %v1447_v23, %v4942_v52  ;;  %2299 = vmatmul.mubr.bf16.gmra.mxu1 %v1497_v25  ;;  %v1274_v61 = vadd.f32 %v1273_v45, %v4874_v55 }
 0x1e7   : > { %v3595_v58 = vpack.c.bf16 %v1454_v41, %v4971_v32  ;;  %2185 = vmatprep.mubr.bf16.mxu0 %v1496_v44  ;;  %v1387_v62 = vadd.f32 %v1386_v49, %v4876_v56  ;;  %v1277_v63 = vpop.f32.mrf.mxu0  ;;  %v1390_v0 = vpop.f32.mrf.mxu1  ;;  %v2465_v1 = vadd.f32 %v2464_v50, %v1449_v15  ;;  %v2469_v2 = vadd.f32 %v4975_v29, %v4969_v31 }
 0x1e8   : > { %1691 = vst [vmem:[%s4638_s13 + $0x80] sm:$0xff] %v3594_v57  ;;  %v1455_v3 = vmax.f32 %v1272_v42, 0.0  ;;  %2186 = vmatmul.mubr.bf16.gmra.mxu0 %v1495_v60  ;;  %v1278_v4 = vadd.f32 %v1277_v63, %v4868_v53  ;;  %v1391_v52 = vadd.f32 %v1390_v0, %v4870_v54  ;;  %v1501_v5 = vpack.c.bf16 %v1457_v59, %v4971_v32 }
 0x1e9   : > { %1692 = vst [vmem:[%s4638_s13 + $0x88] sm:$0xff] %v3595_v58  ;;  %v1456_v6 = vmax.f32 %v1274_v61, 0.0  ;;  %v1458_v7 = vmax.f32 %v1387_v62, 0.0  ;;  %v2466_v8 = vadd.f32 %v2465_v1, %v1450_v12  ;;  %v1279_v9 = vpop.f32.mrf.mxu0  ;;  %v1392_v13 = vpop.f32.mrf.mxu1  ;;  %v2470_v14 = vadd.f32 %v2469_v2, %v4971_v32 }
 0x1ea   : > { %v4996_v15 = vmax.f32 %v1278_v4, 0.0  ;;  %v4998_v16 = vmax.f32 %v1391_v52, 0.0  ;;  %v1280_v17 = vadd.f32 %v1279_v9, %v4874_v55  ;;  %v1393_v18 = vadd.f32 %v1392_v13, %v4876_v56 }
 0x1eb   : > { %v3596_v19 = vpack.c.bf16 %v1456_v6, %v1455_v3  ;;  %v3597_v20 = vpack.c.bf16 %v1458_v7, %v1457_v59  ;;  %2467 = vadd.xlane.f32.xlu1 %v2466_v8  ;;  %v1281_v21 = vpop.f32.mrf.mxu0  ;;  %v1394_v22 = vpop.f32.mrf.mxu1  ;;  %v1502_v23 = vpack.c.bf16 %v1458_v7, %v1454_v41  ;;  %v2471_v24 = vadd.f32 %v2470_v14, %v1454_v41 }
 0x1ec   : > { %v5002_v10 = vmax.f32 %v1280_v17, 0.0  ;;  %v1462_v25 = vmax.f32 %v1393_v18, 0.0  ;;  %v1282_v11 = vadd.f32 %v1281_v21, %v4868_v53  ;;  %v1395_v12 = vadd.f32 %v1394_v22, %v4870_v54 }
 0x1ed   : > { %1693 = vst [vmem:[%s4638_s13 + $0x90] sm:$0xff] %v3596_v19  ;;  %1694 = vst [vmem:[%s4638_s13 + $0x98] sm:$0xff] %v3597_v20  ;;  %2308 = vmatprep.mubr.bf16.mxu1 %v1502_v23  ;;  %2472 = vadd.xlane.f32.xlu0 %v2471_v24  ;;  %v1500_v26 = vpack.c.bf16 %v1456_v6, %v4975_v29  ;;  %v1283_v27 = vpop.f32.mrf.mxu0  ;;  %v1396_v28 = vpop.f32.mrf.mxu1  ;;  %v2474_v30 = vadd.f32 %v1456_v6, %v1455_v3 }
 0x1ee   : > { %v3598_v32 = vpack.c.bf16 %v5002_v10, %v4996_v15  ;;  %v3599_v33 = vpack.c.bf16 %v1462_v25, %v4998_v16  ;;  %v1465_v34 = vmax.f32 %v1395_v12, 0.0  ;;  %v1499_v35 = vpack.c.bf16 %v1455_v3, %v4969_v31  ;;  %2309 = vmatmul.mubr.bf16.gmra.mxu1 %v1501_v5 }
 0x1ef   : > { %2195 = vmatprep.mubr.bf16.mxu0 %v1500_v26  ;;  %v1284_v36 = vadd.f32 %v1283_v27, %v4874_v55  ;;  %v1397_v37 = vadd.f32 %v1396_v28, %v4876_v56  ;;  %v1287_v38 = vpop.f32.mrf.mxu0  ;;  %v1400_v39 = vpop.f32.mrf.mxu1  ;;  %v2475_v40 = vadd.f32 %v2474_v30, %v1457_v59  ;;  %v2479_v29 = vadd.f32 %v5002_v10, %v4996_v15 }
 0x1f0   : > { %1695 = vst [vmem:[%s4638_s13 + $0xa0] sm:$0xff] %v3598_v32  ;;  %1696 = vst [vmem:[%s4638_s13 + $0xa8] sm:$0xff] %v3599_v33  ;;  %v1463_v41 = vmax.f32 %v1282_v11, 0.0  ;;  %2196 = vmatmul.mubr.bf16.gmra.mxu0 %v1499_v35  ;;  %v1288_v42 = vadd.f32 %v1287_v38, %v4868_v53  ;;  %v1401_v31 = vadd.f32 %v1400_v39, %v4870_v54 }
 0x1f1   : > { %v1505_v43 = vpack.c.bf16 %v1465_v34, %v4998_v16  ;;  %v1464_v44 = vmax.f32 %v1284_v36, 0.0  ;;  %v1466_v45 = vmax.f32 %v1397_v37, 0.0  ;;  %v2476_v49 = vadd.f32 %v2475_v40, %v1458_v7  ;;  %v1289_v50 = vpop.f32.mrf.mxu0  ;;  %v1402_v57 = vpop.f32.mrf.mxu1 }
 0x1f2   : > { %v2480_v58 = vadd.f32 %v2479_v29, %v4998_v16  ;;  %v5023_v59 = vmax.f32 %v1288_v42, 0.0  ;;  %v5025_v60 = vmax.f32 %v1401_v31, 0.0  ;;  %v1290_v61 = vadd.f32 %v1289_v50, %v4874_v55 }
 0x1f3   : > { %v1403_v62 = vadd.f32 %v1402_v57, %v4876_v56  ;;  %v3600_v63 = vpack.c.bf16 %v1464_v44, %v1463_v41  ;;  %v3601_v0 = vpack.c.bf16 %v1466_v45, %v1465_v34  ;;  %2477 = vadd.xlane.f32.xlu1 %v2476_v49  ;;  %v1291_v1 = vpop.f32.mrf.mxu0  ;;  %v1404_v2 = vpop.f32.mrf.mxu1  ;;  %v1506_v3 = vpack.c.bf16 %v1466_v45, %v1462_v25 }
 0x1f4   : > { %v2481_v4 = vadd.f32 %v2480_v58, %v1462_v25  ;;  %v5029_v52 = vmax.f32 %v1290_v61, 0.0  ;;  %v1292_v6 = vadd.f32 %v1291_v1, %v4868_v53  ;;  %v1405_v7 = vadd.f32 %v1404_v2, %v4870_v54 }
 0x1f5   : > { %v1470_v5 = vmax.f32 %v1403_v62, 0.0  ;;  %1697 = vst [vmem:[%s4638_s13 + $0xb0] sm:$0xff] %v3600_v63  ;;  %1698 = vst [vmem:[%s4638_s13 + $0xb8] sm:$0xff] %v3601_v0  ;;  %2318 = vmatprep.mubr.bf16.mxu1 %v1506_v3  ;;  %v1504_v8 = vpack.c.bf16 %v1464_v44, %v5002_v10  ;;  %v1293_v9 = vpop.f32.mrf.mxu0  ;;  %v1406_v13 = vpop.f32.mrf.mxu1  ;;  %v2484_v14 = vadd.f32 %v1464_v44, %v1463_v41 }
 0x1f6   : > { %2482 = vadd.xlane.f32.xlu0 %v2481_v4  ;;  %v3602_v16 = vpack.c.bf16 %v5029_v52, %v5023_v59  ;;  %v1473_v18 = vmax.f32 %v1405_v7, 0.0  ;;  %v1503_v19 = vpack.c.bf16 %v1463_v41, %v4996_v15  ;;  %2319 = vmatmul.mubr.bf16.gmra.mxu1 %v1505_v43  ;;  %v1294_v20 = vadd.f32 %v1293_v9, %v4874_v55 }
 0x1f7   : > { %v3603_v17 = vpack.c.bf16 %v1470_v5, %v5025_v60  ;;  %2205 = vmatprep.mubr.bf16.mxu0 %v1504_v8  ;;  %v1407_v21 = vadd.f32 %v1406_v13, %v4876_v56  ;;  %v1297_v22 = vpop.f32.mrf.mxu0  ;;  %v1410_v23 = vpop.f32.mrf.mxu1  ;;  %v2485_v24 = vadd.f32 %v2484_v14, %v1465_v34  ;;  %v2489_v10 = vadd.f32 %v5029_v52, %v5023_v59 }
 0x1f8   : > { %1699 = vst [vmem:[%s4638_s13 + $0xc0] sm:$0xff] %v3602_v16  ;;  %v1471_v25 = vmax.f32 %v1292_v6, 0.0  ;;  %2206 = vmatmul.mubr.bf16.gmra.mxu0 %v1503_v19  ;;  %v1298_v11 = vadd.f32 %v1297_v22, %v4868_v53  ;;  %v1411_v15 = vadd.f32 %v1410_v23, %v4870_v54  ;;  %v1509_v12 = vpack.c.bf16 %v1473_v18, %v5025_v60  ;;  %v2415_v22 = vld [vmem:[#allocation4 + $0x10] sm:$0xff] }
 0x1f9   : > { %1700 = vst [vmem:[%s4638_s13 + $0xc8] sm:$0xff] %v3603_v17  ;;  %v1472_v26 = vmax.f32 %v1294_v20, 0.0  ;;  %v1474_v27 = vmax.f32 %v1407_v21, 0.0  ;;  %v2486_v28 = vadd.f32 %v2485_v24, %v1466_v45  ;;  %v1299_v30 = vpop.f32.mrf.mxu0  ;;  %v1412_v32 = vpop.f32.mrf.mxu1  ;;  %v2490_v33 = vadd.f32 %v2489_v10, %v5025_v60  ;;  %v2413_v17 = vld [vmem:[#allocation4] sm:$0xff]  ;;  %v2414_v20 = vld [vmem:[#allocation4 + $0x8] sm:$0xff] }
 0x1fa   : > { %v1475_v34 = vmax.f32 %v1298_v11, 0.0  ;;  %v1477_v35 = vmax.f32 %v1411_v15, 0.0  ;;  %v1300_v36 = vadd.f32 %v1299_v30, %v4874_v55  ;;  %v1413_v37 = vadd.f32 %v1412_v32, %v4876_v56  ;;  %v2417_v15 = vld [vmem:[#allocation4 + $0x20] sm:$0xff]  ;;  %v2419_v32 = vld [vmem:[#allocation4 + $0x30] sm:$0xff] }
 0x1fb   : > { %v3604_v38 = vpack.c.bf16 %v1472_v26, %v1471_v25  ;;  %v3605_v39 = vpack.c.bf16 %v1474_v27, %v1473_v18  ;;  %2487 = vadd.xlane.f32.xlu1 %v2486_v28  ;;  %v1301_v40 = vpop.f32.mrf.mxu0  ;;  %v1414_v29 = vpop.f32.mrf.mxu1  ;;  %v1510_v41 = vpack.c.bf16 %v1474_v27, %v1470_v5  ;;  %v2491_v42 = vadd.f32 %v2490_v33, %v1470_v5  ;;  %v2418_v28 = vld [vmem:[#allocation4 + $0x28] sm:$0xff] }
 0x1fc   : > { %v1476_v31 = vmax.f32 %v1300_v36, 0.0  ;;  %v1478_v43 = vmax.f32 %v1413_v37, 0.0  ;;  %v1302_v44 = vadd.f32 %v1301_v40, %v4868_v53  ;;  %v1415_v45 = vadd.f32 %v1414_v29, %v4870_v54  ;;  %v2420_v36 = vld [vmem:[#allocation4 + $0x38] sm:$0xff] }
 0x1fd   : > { %1701 = vst [vmem:[%s4638_s13 + $0xd0] sm:$0xff] %v3604_v38  ;;  %1702 = vst [vmem:[%s4638_s13 + $0xd8] sm:$0xff] %v3605_v39  ;;  %2328 = vmatprep.mubr.bf16.mxu1 %v1510_v41  ;;  %2492 = vadd.xlane.f32.xlu0 %v2491_v42  ;;  %v1508_v49 = vpack.c.bf16 %v1472_v26, %v5029_v52  ;;  %v1303_v50 = vpop.f32.mrf.mxu0  ;;  %v1416_v57 = vpop.f32.mrf.mxu1  ;;  %v2494_v58 = vadd.f32 %v1472_v26, %v1471_v25  ;;  %v2421_v38 = vld [vmem:[#allocation4 + $0x40] sm:$0xff]  ;;  %v2422_v41 = vld [vmem:[#allocation4 + $0x48] sm:$0xff] }
 0x1fe   : > { %v3606_v60 = vpack.c.bf16 %v1476_v31, %v1475_v34  ;;  %v3607_v61 = vpack.c.bf16 %v1478_v43, %v1477_v35  ;;  %v1507_v62 = vpack.c.bf16 %v1471_v25, %v5023_v59  ;;  %2329 = vmatmul.mubr.bf16.gmra.mxu1 %v1509_v12  ;;  %v1304_v53 = vadd.f32 %v1303_v50, %v4874_v55  ;;  %v2416_v25 = vld [vmem:[#allocation4 + $0x18] sm:$0xff] }
 0x1ff   : > { %2215 = vmatprep.mubr.bf16.mxu0 %v1508_v49  ;;  %v1417_v54 = vadd.f32 %v1416_v57, %v4876_v56  ;;  %v2495_v63 = vadd.f32 %v2494_v58, %v1473_v18  ;;  %v2499_v0 = vadd.f32 %v1476_v31, %v1475_v34  ;;  %v1479_v1 = vmax.f32 %v1302_v44, 0.0  ;;  %v2424_v49 = vld [vmem:[#allocation4 + $0x58] sm:$0xff]  ;;  %v2425_v57 = vld [vmem:[#allocation4 + $0x60] sm:$0xff] }
 0x200   : > { %1703 = vst [vmem:[%s4638_s13 + $0xe0] sm:$0xff] %v3606_v60  ;;  %1704 = vst [vmem:[%s4638_s13 + $0xe8] sm:$0xff] %v3607_v61  ;;  %v1481_v2 = vmax.f32 %v1415_v45, 0.0  ;;  %2216 = vmatmul.mubr.bf16.gmra.mxu0 %v1507_v62  ;;  %v1480_v3 = vmax.f32 %v1304_v53, 0.0  ;;  %v2426_v62 = vld [vmem:[#allocation4 + $0x68] sm:$0xff] }
 0x201   : > { %v1482_v4 = vmax.f32 %v1417_v54, 0.0  ;;  %v2496_v52 = vadd.f32 %v2495_v63, %v1474_v27  ;;  %v2500_v5 = vadd.f32 %v2499_v0, %v1477_v35  ;;  %v1511_v13 = vpack.c.bf16 %v1479_v1, %v1475_v34  ;;  %v2427_v54 = vld [vmem:[#allocation4 + $0x70] sm:$0xff] }
 0x202   : > { %v3608_v59 = vpack.c.bf16 %v1480_v3, %v1479_v1  ;;  %v1512_v8 = vpack.c.bf16 %v1480_v3, %v1476_v31  ;;  %v1513_v56 = vpack.c.bf16 %v1481_v2, %v1477_v35  ;;  %v2504_v9 = vadd.f32 %v1480_v3, %v1479_v1  ;;  %v2423_v31 = vld [vmem:[#allocation4 + $0x50] sm:$0xff]  ;;  %v1707_v3 = vld [vmem:[#allocation3 + $0xa8] sm:$0xff] }
 0x203   : > { %v3609_v6 = vpack.c.bf16 %v1482_v4, %v1481_v2  ;;  %2497 = vadd.xlane.f32.xlu1 %v2496_v52  ;;  %v1514_v7 = vpack.c.bf16 %v1482_v4, %v1478_v43  ;;  %v2501_v55 = vadd.f32 %v2500_v5, %v1478_v43 }
 0x204   : > { %1705 = vst [vmem:[%s4638_s13 + $0xf0] sm:$0xff] %v3608_v59  ;;  %2225 = vmatprep.mubr.bf16.mxu0 %v1512_v8  ;;  %v2505_v14 = vadd.f32 %v2504_v9, %v1481_v2 }
 0x205   : > { %1706 = vst [vmem:[%s4638_s13 + $0xf8] sm:$0xff] %v3609_v6  ;;  %2338 = vmatprep.mubr.bf16.mxu1 %v1514_v7  ;;  %2502 = vadd.xlane.f32.xlu0 %v2501_v55  ;;  %v1708_v6 = vld [vmem:[#allocation3 + $0x68] sm:$0xff]  ;;  %v2428_v7 = vld [vmem:[#allocation4 + $0x78] sm:$0xff] }
 0x206   : > { %2339 = vmatmul.mubr.bf16.gmra.mxu1 %v1513_v56  ;;  %v2506_v16 = vadd.f32 %v2505_v14, %v1482_v4 }
 0x208   : > { %2226 = vmatmul.mubr.bf16.gmra.mxu0 %v1511_v13  ;;  %2507 = vadd.xlane.f32.xlu1 %v2506_v16  ;;  %v1709_v13 = vld [vmem:[#allocation3 + $0x10] sm:$0xff] }
 0x258   : > { %v2433_v18 = vpop.xlane.xlu0 %2432 }
 0x259   : > { %v2509_v19 = vadd.f32 %v2433_v18, %v2413_v17 }
 0x25b   : > { %2526 = vst.msk [vmem:[#allocation4] sm:$0xff] %vm2525_vm1, %v2509_v19 }
 0x25c   : > { %v2438_v21 = vpop.xlane.xlu0 %2437 }
 0x25d   : > { %v2510_v23 = vadd.f32 %v2438_v21, %v2414_v20  ;;  %v1710_v21 = vld [vmem:[#allocation3 + $0xc0] sm:$0xff] }
 0x25e   : > { %v2443_v24 = vpop.xlane.xlu1 %2442 }
 0x25f   : > { %2527 = vst.msk [vmem:[#allocation4 + $0x8] sm:$0xff] %vm2525_vm1, %v2510_v23  ;;  %v2511_v10 = vadd.f32 %v2443_v24, %v2415_v22 }
 0x261   : > { %2528 = vst.msk [vmem:[#allocation4 + $0x10] sm:$0xff] %vm2525_vm1, %v2511_v10 }
 0x264   : > { %v2448_v11 = vpop.xlane.xlu1 %2447 }
 0x265   : > { %v2512_v12 = vadd.f32 %v2448_v11, %v2416_v25  ;;  %v1711_v11 = vld [vmem:[#allocation3 + $0xc8] sm:$0xff] }
 0x266   : > { %v2453_v26 = vpop.xlane.xlu0 %2452 }
 0x267   : > { %2529 = vst.msk [vmem:[#allocation4 + $0x18] sm:$0xff] %vm2525_vm1, %v2512_v12  ;;  %v2513_v27 = vadd.f32 %v2453_v26, %v2417_v15 }
 0x269   : > { %2530 = vst.msk [vmem:[#allocation4 + $0x20] sm:$0xff] %vm2525_vm1, %v2513_v27  ;;  %v1712_v27 = vld [vmem:[#allocation3 + $0xb0] sm:$0xff] }
 0x26c   : > { %v2458_v30 = vpop.xlane.xlu1 %2457 }
 0x26d   : > { %v2514_v33 = vadd.f32 %v2458_v30, %v2418_v28 }
 0x26f   : > { %v2463_v34 = vpop.xlane.xlu0 %2462  ;;  %2531 = vst.msk [vmem:[#allocation4 + $0x28] sm:$0xff] %vm2525_vm1, %v2514_v33 }
 0x270   : > { %v2515_v35 = vadd.f32 %v2463_v34, %v2419_v32  ;;  %v1713_v34 = vld [vmem:[#allocation3 + $0x70] sm:$0xff] }
 0x272   : > { %2532 = vst.msk [vmem:[#allocation4 + $0x30] sm:$0xff] %vm2525_vm1, %v2515_v35 }
 0x274   : > { %v2468_v37 = vpop.xlane.xlu1 %2467 }
 0x275   : > { %v2516_v39 = vadd.f32 %v2468_v37, %v2420_v36 }
 0x276   : > { %v2473_v40 = vpop.xlane.xlu0 %2472 }
 0x277   : > { %2533 = vst.msk [vmem:[#allocation4 + $0x38] sm:$0xff] %vm2525_vm1, %v2516_v39  ;;  %v2517_v29 = vadd.f32 %v2473_v40, %v2421_v38  ;;  %v1714_v39 = vld [vmem:[#allocation3 + $0x38] sm:$0xff] }
 0x279   : > { %2534 = vst.msk [vmem:[#allocation4 + $0x40] sm:$0xff] %vm2525_vm1, %v2517_v29 }
 0x27c   : > { %v2478_v42 = vpop.xlane.xlu1 %2477 }
 0x27d   : > { %v2518_v43 = vadd.f32 %v2478_v42, %v2422_v41 }
 0x27f   : > { %v2483_v44 = vpop.xlane.xlu0 %2482  ;;  %2535 = vst.msk [vmem:[#allocation4 + $0x48] sm:$0xff] %vm2525_vm1, %v2518_v43 }
 0x280   : > { %v2519_v45 = vadd.f32 %v2483_v44, %v2423_v31  ;;  %v1715_v31 = vld [vmem:[#allocation3 + $0x48] sm:$0xff] }
 0x282   : > { %2536 = vst.msk [vmem:[#allocation4 + $0x50] sm:$0xff] %vm2525_vm1, %v2519_v45 }
 0x284   : > { %v2488_v50 = vpop.xlane.xlu1 %2487 }
 0x285   : > { %v2520_v58 = vadd.f32 %v2488_v50, %v2424_v49  ;;  %v1716_v50 = vld [vmem:[#allocation3 + $0xf8] sm:$0xff] }
 0x286   : > { %v2493_v60 = vpop.xlane.xlu0 %2492 }
 0x287   : > { %2537 = vst.msk [vmem:[#allocation4 + $0x58] sm:$0xff] %vm2525_vm1, %v2520_v58  ;;  %v2521_v61 = vadd.f32 %v2493_v60, %v2425_v57 }
 0x289   : > { %2538 = vst.msk [vmem:[#allocation4 + $0x60] sm:$0xff] %vm2525_vm1, %v2521_v61 }
 0x28c   : > { %v2498_v53 = vpop.xlane.xlu1 %2497 }
 0x28d   : > { %v2522_v63 = vadd.f32 %v2498_v53, %v2426_v62  ;;  %v1717_v62 = vld [vmem:[#allocation3 + $0x78] sm:$0xff] }
 0x28e   : > { %v2270_v0 = vpop.f32.mrf.mxu1  ;;  %v2503_v1 = vpop.xlane.xlu0 %2502 }
 0x28f   : > { %2539 = vst.msk [vmem:[#allocation4 + $0x68] sm:$0xff] %vm2525_vm1, %v2522_v63  ;;  %v2523_v2 = vadd.f32 %v2503_v1, %v2427_v54  ;;  %v2157_v4 = vpop.f32.mrf.mxu0  ;;  %v1718_v1 = vld [vmem:[#allocation3 + $0x88] sm:$0xff] }
 0x290   : > { %v2271_v52 = vadd.f32 %v2270_v0, %v2157_v4  ;;  %v2272_v5 = vpop.f32.mrf.mxu1 }
 0x291   : > { %2540 = vst.msk [vmem:[#allocation4 + $0x70] sm:$0xff] %vm2525_vm1, %v2523_v2  ;;  %v2159_v59 = vpop.f32.mrf.mxu0  ;;  %v2508_v9 = vpop.xlane.xlu1 %2507 }
 0x292   : > { %v2349_v55 = vadd.f32 %v2271_v52, %v1707_v3  ;;  %v2273_v8 = vadd.f32 %v2272_v5, %v2159_v59  ;;  %v2274_v56 = vpop.f32.mrf.mxu1  ;;  %v2524_v17 = vadd.f32 %v2508_v9, %v2428_v7  ;;  %v1719_v5 = vld [vmem:[#allocation3 + $0xf0] sm:$0xff] }
 0x293   : > { %v2161_v14 = vpop.f32.mrf.mxu0 }
 0x294   : > { %2381 = vst [vmem:[#allocation3 + $0xa8] sm:$0xff] %v2349_v55  ;;  %v2350_v16 = vadd.f32 %v2273_v8, %v1708_v6  ;;  %v2275_v18 = vadd.f32 %v2274_v56, %v2161_v14  ;;  %v2276_v19 = vpop.f32.mrf.mxu1  ;;  %2541 = vst.msk [vmem:[#allocation4 + $0x78] sm:$0xff] %vm2525_vm1, %v2524_v17  ;;  %v1720_v8 = vld [vmem:[#allocation3 + $0x18] sm:$0xff] }
 0x295   : > { %v2163_v20 = vpop.f32.mrf.mxu0 }
 0x296   : > { %2382 = vst [vmem:[#allocation3 + $0x68] sm:$0xff] %v2350_v16  ;;  %v2351_v22 = vadd.f32 %v2275_v18, %v1709_v13  ;;  %v2277_v23 = vadd.f32 %v2276_v19, %v2163_v20  ;;  %v2280_v24 = vpop.f32.mrf.mxu1  ;;  %v1721_v16 = vld [vmem:[#allocation3 + $0x30] sm:$0xff] }
 0x298   : > { %2383 = vst [vmem:[#allocation3 + $0x10] sm:$0xff] %v2351_v22  ;;  %v2352_v10 = vadd.f32 %v2277_v23, %v1710_v21  ;;  %v2167_v25 = vpop.f32.mrf.mxu0  ;;  %v2282_v15 = vpop.f32.mrf.mxu1  ;;  %v1722_v21 = vld [vmem:[#allocation3 + $0x50] sm:$0xff] }
 0x299   : > { %v2281_v12 = vadd.f32 %v2280_v24, %v2167_v25  ;;  %v1723_v25 = vld [vmem:[#allocation3 + $0xb8] sm:$0xff] }
 0x29a   : > { %2384 = vst [vmem:[#allocation3 + $0xc0] sm:$0xff] %v2352_v10  ;;  %v2169_v26 = vpop.f32.mrf.mxu0  ;;  %v2284_v28 = vpop.f32.mrf.mxu1 }
 0x29b   : > { %v2353_v30 = vadd.f32 %v2281_v12, %v1711_v11  ;;  %v2283_v32 = vadd.f32 %v2282_v15, %v2169_v26 }
 0x29c   : > { %v2171_v33 = vpop.f32.mrf.mxu0  ;;  %v2286_v35 = vpop.f32.mrf.mxu1 }
 0x29d   : > { %2385 = vst [vmem:[#allocation3 + $0xc8] sm:$0xff] %v2353_v30  ;;  %v2354_v36 = vadd.f32 %v2283_v32, %v1712_v27  ;;  %v2285_v37 = vadd.f32 %v2284_v28, %v2171_v33  ;;  %v1724_v27 = vld [vmem:[#allocation3 + $0xd0] sm:$0xff] }
 0x29e   : > { %v2173_v38 = vpop.f32.mrf.mxu0  ;;  %v2290_v40 = vpop.f32.mrf.mxu1 }
 0x29f   : > { %2386 = vst [vmem:[#allocation3 + $0xb0] sm:$0xff] %v2354_v36  ;;  %v2355_v29 = vadd.f32 %v2285_v37, %v1713_v34  ;;  %v2287_v41 = vadd.f32 %v2286_v35, %v2173_v38  ;;  %v1725_v34 = vld [vmem:[#allocation3 + $0xd8] sm:$0xff] }
 0x2a0   : > { %v2177_v42 = vpop.f32.mrf.mxu0  ;;  %v2292_v43 = vpop.f32.mrf.mxu1 }
 0x2a1   : > { %2387 = vst [vmem:[#allocation3 + $0x70] sm:$0xff] %v2355_v29  ;;  %v2356_v44 = vadd.f32 %v2287_v41, %v1714_v39  ;;  %v2291_v45 = vadd.f32 %v2290_v40, %v2177_v42  ;;  %v1726_v39 = vld [vmem:[#allocation3 + $0x58] sm:$0xff] }
 0x2a2   : > { %v2179_v49 = vpop.f32.mrf.mxu0  ;;  %v2294_v57 = vpop.f32.mrf.mxu1 }
 0x2a3   : > { %2388 = vst [vmem:[#allocation3 + $0x38] sm:$0xff] %v2356_v44  ;;  %v2357_v58 = vadd.f32 %v2291_v45, %v1715_v31  ;;  %v2293_v60 = vadd.f32 %v2292_v43, %v2179_v49  ;;  %v1727_v31 = vld [vmem:[#allocation3 + $0x80] sm:$0xff] }
 0x2a4   : > { %v2181_v61 = vpop.f32.mrf.mxu0  ;;  %v2296_v53 = vpop.f32.mrf.mxu1 }
 0x2a5   : > { %2389 = vst [vmem:[#allocation3 + $0x48] sm:$0xff] %v2357_v58  ;;  %v2358_v54 = vadd.f32 %v2293_v60, %v1716_v50  ;;  %v2295_v63 = vadd.f32 %v2294_v57, %v2181_v61  ;;  %v1728_v50 = vld [vmem:[#allocation3 + $0x40] sm:$0xff] }
 0x2a6   : > { %v2183_v0 = vpop.f32.mrf.mxu0  ;;  %v2300_v2 = vpop.f32.mrf.mxu1 }
 0x2a7   : > { %2390 = vst [vmem:[#allocation3 + $0xf8] sm:$0xff] %v2358_v54  ;;  %v2359_v3 = vadd.f32 %v2295_v63, %v1717_v62  ;;  %v2297_v4 = vadd.f32 %v2296_v53, %v2183_v0  ;;  %v1729_v62 = vld [vmem:[#allocation3 + $0x28] sm:$0xff] }
 0x2a8   : > { %v2187_v52 = vpop.f32.mrf.mxu0  ;;  %v2302_v59 = vpop.f32.mrf.mxu1 }
 0x2a9   : > { %2391 = vst [vmem:[#allocation3 + $0x78] sm:$0xff] %v2359_v3  ;;  %v2360_v6 = vadd.f32 %v2297_v4, %v1718_v1  ;;  %v2301_v7 = vadd.f32 %v2300_v2, %v2187_v52  ;;  %v1730_v1 = vld [vmem:[#allocation3] sm:$0xff] }
 0x2aa   : > { %v2189_v55 = vpop.f32.mrf.mxu0  ;;  %v2304_v56 = vpop.f32.mrf.mxu1 }
 0x2ab   : > { %2392 = vst [vmem:[#allocation3 + $0x88] sm:$0xff] %v2360_v6  ;;  %v2361_v9 = vadd.f32 %v2301_v7, %v1719_v5  ;;  %v2303_v13 = vadd.f32 %v2302_v59, %v2189_v55  ;;  %v1731_v5 = vld [vmem:[#allocation3 + $0x90] sm:$0xff] }
 0x2ac   : > { %v2191_v14 = vpop.f32.mrf.mxu0  ;;  %v2306_v17 = vpop.f32.mrf.mxu1 }
 0x2ad   : > { %2393 = vst [vmem:[#allocation3 + $0xf0] sm:$0xff] %v2361_v9  ;;  %v2362_v18 = vadd.f32 %v2303_v13, %v1720_v8  ;;  %v2305_v19 = vadd.f32 %v2304_v56, %v2191_v14  ;;  %v1732_v8 = vld [vmem:[#allocation3 + $0xe8] sm:$0xff] }
 0x2ae   : > { %v2193_v20 = vpop.f32.mrf.mxu0  ;;  %v2310_v22 = vpop.f32.mrf.mxu1 }
 0x2af   : > { %2394 = vst [vmem:[#allocation3 + $0x18] sm:$0xff] %v2362_v18  ;;  %v2363_v23 = vadd.f32 %v2305_v19, %v1721_v16  ;;  %v2307_v24 = vadd.f32 %v2306_v17, %v2193_v20  ;;  %v1733_v16 = vld [vmem:[#allocation3 + $0xa0] sm:$0xff] }
 0x2b0   : > { %v2197_v10 = vpop.f32.mrf.mxu0  ;;  %v2312_v11 = vpop.f32.mrf.mxu1 }
 0x2b1   : > { %2395 = vst [vmem:[#allocation3 + $0x30] sm:$0xff] %v2363_v23  ;;  %v2364_v15 = vadd.f32 %v2307_v24, %v1722_v21  ;;  %v2311_v12 = vadd.f32 %v2310_v22, %v2197_v10  ;;  %v1734_v21 = vld [vmem:[#allocation3 + $0x20] sm:$0xff] }
 0x2b2   : > { %v2199_v26 = vpop.f32.mrf.mxu0  ;;  %v2314_v28 = vpop.f32.mrf.mxu1 }
 0x2b3   : > { %2396 = vst [vmem:[#allocation3 + $0x50] sm:$0xff] %v2364_v15  ;;  %v2365_v30 = vadd.f32 %v2311_v12, %v1723_v25  ;;  %v2313_v32 = vadd.f32 %v2312_v11, %v2199_v26  ;;  %v1735_v25 = vld [vmem:[#allocation3 + $0x8] sm:$0xff] }
 0x2b4   : > { %v2201_v33 = vpop.f32.mrf.mxu0  ;;  %v2316_v35 = vpop.f32.mrf.mxu1 }
 0x2b5   : > { %2397 = vst [vmem:[#allocation3 + $0xb8] sm:$0xff] %v2365_v30  ;;  %v2366_v36 = vadd.f32 %v2313_v32, %v1724_v27  ;;  %v2315_v37 = vadd.f32 %v2314_v28, %v2201_v33  ;;  %v1736_v27 = vld [vmem:[#allocation3 + $0xe0] sm:$0xff] }
 0x2b6   : > { %v2203_v38 = vpop.f32.mrf.mxu0  ;;  %v2320_v40 = vpop.f32.mrf.mxu1 }
 0x2b7   : > { %2398 = vst [vmem:[#allocation3 + $0xd0] sm:$0xff] %v2366_v36  ;;  %v2367_v29 = vadd.f32 %v2315_v37, %v1725_v34  ;;  %v2317_v41 = vadd.f32 %v2316_v35, %v2203_v38  ;;  %v1737_v34 = vld [vmem:[#allocation3 + $0x60] sm:$0xff] }
 0x2b8   : > { %v2207_v42 = vpop.f32.mrf.mxu0  ;;  %v2322_v43 = vpop.f32.mrf.mxu1 }
 0x2b9   : > { %2399 = vst [vmem:[#allocation3 + $0xd8] sm:$0xff] %v2367_v29  ;;  %v2368_v44 = vadd.f32 %v2317_v41, %v1726_v39  ;;  %v2321_v45 = vadd.f32 %v2320_v40, %v2207_v42  ;;  %v1738_v39 = vld [vmem:[#allocation3 + $0x98] sm:$0xff] }
 0x2ba   : > { %v2209_v49 = vpop.f32.mrf.mxu0  ;;  %v2324_v57 = vpop.f32.mrf.mxu1 }
 0x2bb   : > { %2400 = vst [vmem:[#allocation3 + $0x58] sm:$0xff] %v2368_v44  ;;  %v2369_v58 = vadd.f32 %v2321_v45, %v1727_v31  ;;  %v2323_v60 = vadd.f32 %v2322_v43, %v2209_v49 }
 0x2bc   : > { %v2211_v61 = vpop.f32.mrf.mxu0  ;;  %v2326_v53 = vpop.f32.mrf.mxu1 }
 0x2bd   : > { %2401 = vst [vmem:[#allocation3 + $0x80] sm:$0xff] %v2369_v58  ;;  %v2370_v54 = vadd.f32 %v2323_v60, %v1728_v50  ;;  %v2325_v63 = vadd.f32 %v2324_v57, %v2211_v61 }
 0x2be   : > { %v2213_v0 = vpop.f32.mrf.mxu0  ;;  %v2330_v2 = vpop.f32.mrf.mxu1 }
 0x2bf   : > { %2402 = vst [vmem:[#allocation3 + $0x40] sm:$0xff] %v2370_v54  ;;  %v2371_v3 = vadd.f32 %v2325_v63, %v1729_v62  ;;  %v2327_v4 = vadd.f32 %v2326_v53, %v2213_v0 }
 0x2c0   : > { %v2217_v52 = vpop.f32.mrf.mxu0  ;;  %v2332_v59 = vpop.f32.mrf.mxu1 }
 0x2c1   : > { %2403 = vst [vmem:[#allocation3 + $0x28] sm:$0xff] %v2371_v3  ;;  %v2372_v6 = vadd.f32 %v2327_v4, %v1730_v1  ;;  %v2331_v7 = vadd.f32 %v2330_v2, %v2217_v52 }
 0x2c2   : > { %v2219_v55 = vpop.f32.mrf.mxu0  ;;  %v2334_v56 = vpop.f32.mrf.mxu1 }
 0x2c3   : > { %2404 = vst [vmem:[#allocation3] sm:$0xff] %v2372_v6  ;;  %v2373_v9 = vadd.f32 %v2331_v7, %v1731_v5  ;;  %v2333_v13 = vadd.f32 %v2332_v59, %v2219_v55 }
 0x2c4   : > { %v2221_v14 = vpop.f32.mrf.mxu0  ;;  %v2336_v17 = vpop.f32.mrf.mxu1 }
 0x2c5   : > { %2405 = vst [vmem:[#allocation3 + $0x90] sm:$0xff] %v2373_v9  ;;  %v2374_v18 = vadd.f32 %v2333_v13, %v1732_v8  ;;  %v2335_v19 = vadd.f32 %v2334_v56, %v2221_v14 }
 0x2c6   : > { %v2223_v20 = vpop.f32.mrf.mxu0  ;;  %v2340_v22 = vpop.f32.mrf.mxu1 }
 0x2c7   : > { %2406 = vst [vmem:[#allocation3 + $0xe8] sm:$0xff] %v2374_v18  ;;  %v2375_v23 = vadd.f32 %v2335_v19, %v1733_v16  ;;  %v2337_v24 = vadd.f32 %v2336_v17, %v2223_v20 }
 0x2c8   : > { %v2227_v10 = vpop.f32.mrf.mxu0  ;;  %v2342_v11 = vpop.f32.mrf.mxu1 }
 0x2c9   : > { %2407 = vst [vmem:[#allocation3 + $0xa0] sm:$0xff] %v2375_v23  ;;  %v2376_v15 = vadd.f32 %v2337_v24, %v1734_v21  ;;  %v2341_v12 = vadd.f32 %v2340_v22, %v2227_v10 }
 0x2ca   : > { %v2229_v26 = vpop.f32.mrf.mxu0  ;;  %v2344_v28 = vpop.f32.mrf.mxu1 }
 0x2cb   : > { %2408 = vst [vmem:[#allocation3 + $0x20] sm:$0xff] %v2376_v15  ;;  %v2377_v30 = vadd.f32 %v2341_v12, %v1735_v25  ;;  %v2343_v32 = vadd.f32 %v2342_v11, %v2229_v26 }
 0x2cc   : > { %v2231_v33 = vpop.f32.mrf.mxu0  ;;  %v2346_v35 = vpop.f32.mrf.mxu1 }
 0x2cd   : > { %2409 = vst [vmem:[#allocation3 + $0x8] sm:$0xff] %v2377_v30  ;;  %v2378_v36 = vadd.f32 %v2343_v32, %v1736_v27  ;;  %v2345_v37 = vadd.f32 %v2344_v28, %v2231_v33 }
 0x2ce   : > { %v2233_v38 = vpop.f32.mrf.mxu0 }
 0x2cf   : > { %2410 = vst [vmem:[#allocation3 + $0xe0] sm:$0xff] %v2378_v36  ;;  %v2379_v40 = vadd.f32 %v2345_v37, %v1737_v34  ;;  %v2347_v29 = vadd.f32 %v2346_v35, %v2233_v38  ;;  %2545 = sbr.rel (%p3546_p1) target bundleno = 951 (0x3b7), region = 64 }
 0x2d1   : > { %2411 = vst [vmem:[#allocation3 + $0x60] sm:$0xff] %v2379_v40  ;;  %v2380_v41 = vadd.f32 %v2347_v29, %v1738_v39 }
 0x2d3   : > { %2412 = vst [vmem:[#allocation3 + $0x98] sm:$0xff] %v2380_v41 }
 0x2d4   : > { %v2550_v42 = vld [vmem:[%s4611_s26 + $0x20] sm:$0xff]  ;;  %v2582_v31 = vld [vmem:[#allocation3 + $0xc8] sm:$0xff]  ;;  %v2583_v43 = vld [vmem:[#allocation3 + $0xb0] sm:$0xff]  ;;  %v4313_v45 = vmov 0   ;;  %vm2793_vm2 = vcmask 130112   ;;  %vm2800_vm3 = vcmask 195712  }
 0x2d5   : > { %v2610_v44 = vld [vmem:[%s5498_s9] sm:$0x3]  ;;  %3980 = vset.pattern.permute.xlu1 %v4313_v45  ;;  %3979 = vset.pattern.permute.xlu0 %v4313_v45  ;;  %v2551_v49 = vld [vmem:[%s4611_s26 + $0x28] sm:$0xff]  ;;  %v2584_v53 = vld [vmem:[#allocation3 + $0x70] sm:$0xff]  ;;  %vm2807_vm4 = vcmask 261312   ;;  %vm2814_vm5 = vcmask 326912  }
 0x2d6   : > { %v5088_v50 = vrot.slane %v2610_v44, %v775_v48  ;;  %v5092_v57 = vrot.slane %v2610_v44, %v779_v51  ;;  %v2578_v58 = vld [vmem:[#allocation3 + $0xa8] sm:$0xff]  ;;  %v2546_v61 = vld [vmem:[%s4611_s26] sm:$0xff]  ;;  %v2552_v1 = vld [vmem:[%s4611_s26 + $0x30] sm:$0xff]  ;;  %vm2821_vm6 = vcmask 392512   ;;  %vm2828_vm7 = vcmask 458112  }
 0x2d7   : > { %v2579_v60 = vld [vmem:[#allocation3 + $0x68] sm:$0xff]  ;;  %v2553_v2 = vld [vmem:[%s4611_s26 + $0x38] sm:$0xff]  ;;  %v2580_v52 = vld [vmem:[#allocation3 + $0x10] sm:$0xff]  ;;  %vm2835_vm8 = vcmask 523712   ;;  %vm2842_vm9 = vcmask 589312   ;;  %vm2849_vm10 = vcmask 654912  }
 0x2d8   : > { %v2547_v62 = vld [vmem:[%s4611_s26 + $0x8] sm:$0xff]  ;;  %v2626_v54 = vadd.f32 %v5088_v50, %v2582_v31  ;;  %v2627_v63 = vadd.f32 %v5092_v57, %v2583_v43  ;;  %v2622_v0 = vadd.f32 %v5088_v50, %v2578_v58  ;;  %v2623_v48 = vadd.f32 %v5092_v57, %v2579_v60  ;;  %v2585_v3 = vld [vmem:[#allocation3 + $0x38] sm:$0xff]  ;;  %v2581_v5 = vld [vmem:[#allocation3 + $0xc0] sm:$0xff] }
 0x2d9   : > { %v2628_v51 = vadd.f32 %v5088_v50, %v2584_v53  ;;  %v2629_v4 = vadd.f32 %v5092_v57, %v2585_v3  ;;  %v2548_v8 = vld [vmem:[%s4611_s26 + $0x10] sm:$0xff]  ;;  %v2549_v56 = vld [vmem:[%s4611_s26 + $0x18] sm:$0xff]  ;;  %v2624_v14 = vadd.f32 %v5088_v50, %v2580_v52  ;;  %v2625_v16 = vadd.f32 %v5092_v57, %v2581_v5  ;;  %v2589_v18 = vld [vmem:[#allocation3 + $0x88] sm:$0xff] }
 0x2da   : > { %v2658_v59 = vsub.f32 %v2626_v54, %v2550_v42  ;;  %v2659_v6 = vsub.f32 %v2627_v63, %v2551_v49  ;;  %v2654_v7 = vsub.f32 %v2622_v0, %v2546_v61  ;;  %v2655_v55 = vsub.f32 %v2623_v48, %v2547_v62  ;;  %v2588_v17 = vld [vmem:[#allocation3 + $0x78] sm:$0xff]  ;;  %v2586_v23 = vld [vmem:[#allocation3 + $0x48] sm:$0xff]  ;;  %v2556_v15 = vld [vmem:[%s4611_s26 + $0x50] sm:$0xff] }
 0x2db   : > { %v2660_v9 = vsub.f32 %v2628_v51, %v2552_v1  ;;  %v2661_v13 = vsub.f32 %v2629_v4, %v2553_v2  ;;  %v2656_v25 = vsub.f32 %v2624_v14, %v2548_v8  ;;  %v2657_v11 = vsub.f32 %v2625_v16, %v2549_v56  ;;  %v2557_v12 = vld [vmem:[%s4611_s26 + $0x58] sm:$0xff]  ;;  %v2554_v33 = vld [vmem:[%s4611_s26 + $0x40] sm:$0xff]  ;;  %v2592_v34 = vld [vmem:[#allocation3 + $0x30] sm:$0xff] }
 0x2dc   : > { %v2690_v19 = vmul.f32 %v2658_v59, %v2658_v59  ;;  %v2691_v20 = vmul.f32 %v2659_v6, %v2659_v6  ;;  %v2686_v21 = vmul.f32 %v2654_v7, %v2654_v7  ;;  %v2687_v22 = vmul.f32 %v2655_v55, %v2655_v55  ;;  %v2587_v26 = vld [vmem:[#allocation3 + $0xf8] sm:$0xff]  ;;  %v2593_v35 = vld [vmem:[#allocation3 + $0x50] sm:$0xff]  ;;  %v2555_v39 = vld [vmem:[%s4611_s26 + $0x48] sm:$0xff] }
 0x2dd   : > { %v2692_v24 = vmul.f32 %v2660_v9, %v2660_v9  ;;  %v2693_v10 = vmul.f32 %v2661_v13, %v2661_v13  ;;  %v2632_v30 = vadd.f32 %v5088_v50, %v2588_v17  ;;  %v2633_v32 = vadd.f32 %v5092_v57, %v2589_v18  ;;  %v2590_v29 = vld [vmem:[#allocation3 + $0xf0] sm:$0xff]  ;;  %v2561_v44 = vld [vmem:[%s4611_s26 + $0x78] sm:$0xff]  ;;  %v2558_v62 = vld [vmem:[%s4611_s26 + $0x60] sm:$0xff] }
 0x2de   : > { %v2724_v27 = vadd.f32 %v2691_v20, %v2690_v19  ;;  %v2718_v28 = vadd.f32 %v2687_v22, %v2686_v21  ;;  %v2688_v37 = vmul.f32 %v2656_v25, %v2656_v25  ;;  %v2689_v38 = vmul.f32 %v2657_v11, %v2657_v11  ;;  %v2560_v43 = vld [vmem:[%s4611_s26 + $0x70] sm:$0xff]  ;;  %v2591_v45 = vld [vmem:[#allocation3 + $0x18] sm:$0xff]  ;;  %v2559_v0 = vld [vmem:[%s4611_s26 + $0x68] sm:$0xff] }
 0x2df   : > { %v2727_v36 = vadd.f32 %v2693_v10, %v2692_v24  ;;  %v2630_v40 = vadd.f32 %v5088_v50, %v2586_v23  ;;  %v2664_v41 = vsub.f32 %v2632_v30, %v2556_v15  ;;  %v2665_v42 = vsub.f32 %v2633_v32, %v2557_v12  ;;  %v2596_v1 = vld [vmem:[#allocation3 + $0xd8] sm:$0xff]  ;;  %v2564_v55 = vld [vmem:[%s4611_s26 + $0x90] sm:$0xff]  ;;  %v2562_v17 = vld [vmem:[%s4611_s26 + $0x80] sm:$0xff] }
 0x2e0   : > { %2725 = vadd.xlane.f32.xlu1 %v2724_v27  ;;  %2719 = vadd.xlane.f32.xlu0 %v2718_v28  ;;  %v2631_v31 = vadd.f32 %v5092_v57, %v2587_v26  ;;  %v2721_v49 = vadd.f32 %v2689_v38, %v2688_v37  ;;  %v2636_v60 = vadd.f32 %v5088_v50, %v2592_v34  ;;  %v2597_v52 = vld [vmem:[#allocation3 + $0x58] sm:$0xff]  ;;  %v2595_v8 = vld [vmem:[#allocation3 + $0xd0] sm:$0xff]  ;;  %v2600_v18 = vld [vmem:[#allocation3 + $0x28] sm:$0xff]  ;;  %vm2856_vm11 = vcmask 720512  }
 0x2e1   : > { %v2662_v58 = vsub.f32 %v2630_v40, %v2554_v33  ;;  %v2637_v61 = vadd.f32 %v5092_v57, %v2593_v35  ;;  %v2696_v53 = vmul.f32 %v2664_v41, %v2664_v41  ;;  %v2697_v54 = vmul.f32 %v2665_v42, %v2665_v42  ;;  %v2594_v5 = vld [vmem:[#allocation3 + $0xb8] sm:$0xff]  ;;  %v2563_v22 = vld [vmem:[%s4611_s26 + $0x88] sm:$0xff]  ;;  %v2601_v24 = vld [vmem:[#allocation3] sm:$0xff] }
 0x2e2   : > { %v2663_v63 = vsub.f32 %v2631_v31, %v2555_v39  ;;  %v2634_v48 = vadd.f32 %v5088_v50, %v2590_v29  ;;  %v2668_v3 = vsub.f32 %v2636_v60, %v2560_v43  ;;  %v2635_v4 = vadd.f32 %v5092_v57, %v2591_v45  ;;  %v2565_v14 = vld [vmem:[%s4611_s26 + $0x98] sm:$0xff]  ;;  %v2568_v12 = vld [vmem:[%s4611_s26 + $0xb0] sm:$0xff]  ;;  %v2598_v26 = vld [vmem:[#allocation3 + $0x80] sm:$0xff] }
 0x2e3   : > { %v2694_v2 = vmul.f32 %v2662_v58, %v2662_v58  ;;  %v2669_v51 = vsub.f32 %v2637_v61, %v2561_v44  ;;  %v2733_v59 = vadd.f32 %v2697_v54, %v2696_v53  ;;  %v2640_v16 = vadd.f32 %v5088_v50, %v2596_v1  ;;  %v2569_v30 = vld [vmem:[%s4611_s26 + $0xb8] sm:$0xff]  ;;  %v2599_v33 = vld [vmem:[#allocation3 + $0x40] sm:$0xff]  ;;  %v2567_v42 = vld [vmem:[%s4611_s26 + $0xa8] sm:$0xff] }
 0x2e4   : > { %2728 = vadd.xlane.f32.xlu1 %v2727_v36  ;;  %2722 = vadd.xlane.f32.xlu0 %v2721_v49  ;;  %v2695_v6 = vmul.f32 %v2663_v63, %v2663_v63  ;;  %v2666_v7 = vsub.f32 %v2634_v48, %v2558_v62  ;;  %v2700_v56 = vmul.f32 %v2668_v3, %v2668_v3  ;;  %v2604_v34 = vld [vmem:[#allocation3 + $0xa0] sm:$0xff]  ;;  %v2572_v58 = vld [vmem:[%s4611_s26 + $0xd0] sm:$0xff]  ;;  %v2603_v62 = vld [vmem:[#allocation3 + $0xe8] sm:$0xff]  ;;  %vm2863_vm12 = vcmask 786112  }
 0x2e5   : > { %v2701_v9 = vmul.f32 %v2669_v51, %v2669_v51  ;;  %v2667_v13 = vsub.f32 %v2635_v4, %v2559_v0  ;;  %v2641_v21 = vadd.f32 %v5092_v57, %v2597_v52  ;;  %v2638_v23 = vadd.f32 %v5088_v50, %v2594_v5  ;;  %v2566_v39 = vld [vmem:[%s4611_s26 + $0xa0] sm:$0xff]  ;;  %v2602_v61 = vld [vmem:[#allocation3 + $0x90] sm:$0xff]  ;;  %v2573_v0 = vld [vmem:[%s4611_s26 + $0xd8] sm:$0xff] }
 0x2e6   : > { %v2730_v19 = vadd.f32 %v2695_v6, %v2694_v2  ;;  %v2698_v20 = vmul.f32 %v2666_v7, %v2666_v7  ;;  %v2672_v11 = vsub.f32 %v2640_v16, %v2564_v55  ;;  %v2639_v15 = vadd.f32 %v5092_v57, %v2595_v8  ;;  %v2605_v43 = vld [vmem:[#allocation3 + $0x20] sm:$0xff]  ;;  %v2571_v52 = vld [vmem:[%s4611_s26 + $0xc8] sm:$0xff]  ;;  %v2576_v55 = vld [vmem:[%s4611_s26 + $0xf0] sm:$0xff] }
 0x2e7   : > { %v2739_v10 = vadd.f32 %v2701_v9, %v2700_v56  ;;  %v2699_v25 = vmul.f32 %v2667_v13, %v2667_v13  ;;  %v2673_v27 = vsub.f32 %v2641_v21, %v2565_v14  ;;  %v2670_v28 = vsub.f32 %v2638_v23, %v2562_v17  ;;  %v2608_v48 = vld [vmem:[#allocation3 + $0x60] sm:$0xff]  ;;  %v2609_v8 = vld [vmem:[#allocation3 + $0x98] sm:$0xff]  ;;  %v2606_v16 = vld [vmem:[#allocation3 + $0x8] sm:$0xff] }
 0x2e8   : > { %2734 = vadd.xlane.f32.xlu1 %v2733_v59  ;;  %2731 = vadd.xlane.f32.xlu0 %v2730_v19  ;;  %v2644_v32 = vadd.f32 %v5088_v50, %v2600_v18  ;;  %v2704_v36 = vmul.f32 %v2672_v11, %v2672_v11  ;;  %v2671_v37 = vsub.f32 %v2639_v15, %v2563_v22  ;;  %v2570_v4 = vld [vmem:[%s4611_s26 + $0xc0] sm:$0xff]  ;;  %v2577_v21 = vld [vmem:[%s4611_s26 + $0xf8] sm:$0xff]  ;;  %v2575_v11 = vld [vmem:[%s4611_s26 + $0xe8] sm:$0xff]  ;;  %vm2870_vm13 = vcmask 851712  }
 0x2e9   : > { %v2736_v35 = vadd.f32 %v2699_v25, %v2698_v20  ;;  %v2645_v38 = vadd.f32 %v5092_v57, %v2601_v24  ;;  %v2705_v40 = vmul.f32 %v2673_v27, %v2673_v27  ;;  %v2702_v29 = vmul.f32 %v2670_v28, %v2670_v28  ;;  %v2607_v17 = vld [vmem:[#allocation3 + $0xe0] sm:$0xff] }
 0x2ea   : > { %v2676_v41 = vsub.f32 %v2644_v32, %v2568_v12  ;;  %v2642_v31 = vadd.f32 %v5088_v50, %v2598_v26  ;;  %v2703_v44 = vmul.f32 %v2671_v37, %v2671_v37  ;;  %v2643_v49 = vadd.f32 %v5092_v57, %v2599_v33  ;;  %v2574_v25 = vld [vmem:[%s4611_s26 + $0xe0] sm:$0xff] }
 0x2eb   : > { %v2677_v45 = vsub.f32 %v2645_v38, %v2569_v30  ;;  %v2648_v60 = vadd.f32 %v5088_v50, %v2604_v34  ;;  %v2745_v53 = vadd.f32 %v2705_v40, %v2704_v36  ;;  %v2649_v51 = vadd.f32 %v5092_v57, %v2605_v43  ;;  %v2906_v43 = vld [vmem:[#allocation4 + $0x58] sm:$0xff] }
 0x2ec   : > { %2740 = vadd.xlane.f32.xlu1 %v2739_v10  ;;  %2737 = vadd.xlane.f32.xlu0 %v2736_v35  ;;  %v2708_v54 = vmul.f32 %v2676_v41, %v2676_v41  ;;  %v2674_v63 = vsub.f32 %v2642_v31, %v2566_v39  ;;  %v2742_v1 = vadd.f32 %v2703_v44, %v2702_v29  ;;  %v2895_v29 = vld [vmem:[#allocation4] sm:$0xff]  ;;  %v2898_v41 = vld [vmem:[#allocation4 + $0x18] sm:$0xff]  ;;  %v2900_v44 = vld [vmem:[#allocation4 + $0x28] sm:$0xff]  ;;  %vm2877_vm14 = vcmask 917312  }
 0x2ed   : > { %v2709_v2 = vmul.f32 %v2677_v45, %v2677_v45  ;;  %v2675_v3 = vsub.f32 %v2643_v49, %v2567_v42  ;;  %v2680_v59 = vsub.f32 %v2648_v60, %v2572_v58  ;;  %v2646_v6 = vadd.f32 %v5088_v50, %v2602_v61  ;;  %v2904_v42 = vld [vmem:[#allocation4 + $0x48] sm:$0xff]  ;;  %v2899_v31 = vld [vmem:[#allocation4 + $0x20] sm:$0xff]  ;;  %v2901_v49 = vld [vmem:[#allocation4 + $0x30] sm:$0xff] }
 0x2ee   : > { %v2706_v5 = vmul.f32 %v2674_v63, %v2674_v63  ;;  %v2647_v7 = vadd.f32 %v5092_v57, %v2603_v62  ;;  %v2681_v13 = vsub.f32 %v2649_v51, %v2573_v0  ;;  %v2652_v14 = vadd.f32 %v5088_v50, %v2608_v48  ;;  %v2908_v45 = vld [vmem:[#allocation4 + $0x68] sm:$0xff]  ;;  %v2910_v58 = vld [vmem:[#allocation4 + $0x78] sm:$0xff]  ;;  %v2903_v61 = vld [vmem:[#allocation4 + $0x40] sm:$0xff] }
 0x2ef   : > { %v2751_v56 = vadd.f32 %v2709_v2, %v2708_v54  ;;  %v2707_v9 = vmul.f32 %v2675_v3, %v2675_v3  ;;  %v2712_v18 = vmul.f32 %v2680_v59, %v2680_v59  ;;  %v2678_v19 = vsub.f32 %v2646_v6, %v2570_v4  ;;  %v2902_v60 = vld [vmem:[#allocation4 + $0x38] sm:$0xff]  ;;  %v2905_v62 = vld [vmem:[#allocation4 + $0x50] sm:$0xff] }
 0x2f0   : > { %2746 = vadd.xlane.f32.xlu1 %v2745_v53  ;;  %2743 = vadd.xlane.f32.xlu0 %v2742_v1  ;;  %v2679_v20 = vsub.f32 %v2647_v7, %v2571_v52  ;;  %v2713_v23 = vmul.f32 %v2681_v13, %v2681_v13  ;;  %v2653_v24 = vadd.f32 %v5092_v57, %v2609_v8  ;;  %v2907_v53 = vld [vmem:[#allocation4 + $0x60] sm:$0xff]  ;;  %v2909_v54 = vld [vmem:[#allocation4 + $0x70] sm:$0xff]  ;;  %v5157_v63 = vand.u32 127, %v773_v46 }
 0x2f1   : > { %v2748_v22 = vadd.f32 %v2707_v9, %v2706_v5  ;;  %v2684_v10 = vsub.f32 %v2652_v14, %v2576_v55  ;;  %v2710_v15 = vmul.f32 %v2678_v19, %v2678_v19  ;;  %v2650_v26 = vadd.f32 %v5088_v50, %v2606_v16  ;;  %v2896_v50 = vld [vmem:[#allocation4 + $0x8] sm:$0xff] }
 0x2f2   : > { %v2711_v12 = vmul.f32 %v2679_v20, %v2679_v20  ;;  %v2651_v27 = vadd.f32 %v5092_v57, %v2607_v17  ;;  %v2757_v28 = vadd.f32 %v2713_v23, %v2712_v18  ;;  %v2685_v30 = vsub.f32 %v2653_v24, %v2577_v21  ;;  %v2897_v57 = vld [vmem:[#allocation4 + $0x10] sm:$0xff] }
 0x2f3   : > { %v2716_v32 = vmul.f32 %v2684_v10, %v2684_v10  ;;  %v2682_v34 = vsub.f32 %v2650_v26, %v2574_v25  ;;  %v2788_v0 = vadd.s32 4294967288, %v5157_v63  ;;  %v2795_v48 = vadd.s32 4294967280, %v5157_v63 }
 0x2f4   : > { %2752 = vadd.xlane.f32.xlu1 %v2751_v56  ;;  %2749 = vadd.xlane.f32.xlu0 %v2748_v22  ;;  %v2754_v33 = vadd.f32 %v2711_v12, %v2710_v15  ;;  %v2683_v35 = vsub.f32 %v2651_v27, %v2575_v11  ;;  %v2717_v36 = vmul.f32 %v2685_v30, %v2685_v30  ;;  %v2802_v2 = vadd.s32 4294967272, %v5157_v63 }
 0x2f5   : > { %v2714_v37 = vmul.f32 %v2682_v34, %v2682_v34  ;;  %v5163_v1 = vsub.s32 %v5157_v63, %v4859_v47  ;;  %v5167_v4 = vsub.s32 %v2788_v0, %v4859_v47  ;;  %v2809_v52 = vadd.s32 4294967264, %v5157_v63 }
 0x2f6   : > { %v2715_v38 = vmul.f32 %v2683_v35, %v2683_v35  ;;  %v2763_v39 = vadd.f32 %v2717_v36, %v2716_v32  ;;  %v5171_v46 = vsub.s32 %v2795_v48, %v4859_v47  ;;  %v2816_v5 = vadd.s32 4294967256, %v5157_v63 }
 0x2f7   : > { %v5176_v6 = vsub.s32 %v2802_v2, %v4859_v47  ;;  %v5180_v56 = vsub.s32 %v2809_v52, %v4859_v47  ;;  %v2823_v9 = vadd.s32 4294967248, %v5157_v63  ;;  %v2830_v16 = vadd.s32 4294967240, %v5157_v63 }
 0x2f8   : > { %2758 = vadd.xlane.f32.xlu1 %v2757_v28  ;;  %2755 = vadd.xlane.f32.xlu0 %v2754_v33  ;;  %v2760_v40 = vadd.f32 %v2715_v38, %v2714_v37  ;;  %v5185_v14 = vsub.s32 %v2816_v5, %v4859_v47  ;;  %v2837_v10 = vadd.s32 4294967232, %v5157_v63  ;;  %v2844_v15 = vadd.s32 4294967224, %v5157_v63 }
 0x2f9   : > { %v5194_v24 = vsub.s32 %v2823_v9, %v4859_v47  ;;  %v5199_v11 = vsub.s32 %v2830_v16, %v4859_v47  ;;  %v2851_v32 = vadd.s32 4294967216, %v5157_v63  ;;  %v2858_v36 = vadd.s32 4294967208, %v5157_v63 }
 0x2fa   : > { %v5205_v30 = vsub.s32 %v2837_v10, %v4859_v47  ;;  %v5211_v35 = vsub.s32 %v2844_v15, %v4859_v47  ;;  %vm2884_vm15 = vcmask 982912   ;;  %vm2891_vm0 = vcmask 1048512  }
 0x2fc   : > { %2764 = vadd.xlane.f32.xlu1 %v2763_v39  ;;  %2761 = vadd.xlane.f32.xlu0 %v2760_v40 }
 0x30d   : > { %2947 = vperm.xlu1 %3980, %v2896_v50   ;;  %v5217_v50 = vsub.s32 %v2851_v32, %v4859_v47 }
 0x311   : > { %2950 = vperm.xlu1 %3980, %v2897_v57   ;;  %v2865_v57 = vadd.s32 4294967200, %v5157_v63 }
 0x312   : > { %2944 = vperm.xlu0 %3979, %v2895_v29  }
 0x315   : > { %2953 = vperm.xlu1 %3980, %v2898_v41  }
 0x316   : > { %2971 = vperm.xlu0 %3979, %v2904_v42   ;;  %v5223_v42 = vsub.s32 %v2858_v36, %v4859_v47 }
 0x319   : > { %2956 = vperm.xlu1 %3980, %v2899_v31   ;;  %v2872_v31 = vadd.s32 4294967192, %v5157_v63 }
 0x31a   : > { %2977 = vperm.xlu0 %3979, %v2906_v43  }
 0x31d   : > { %2959 = vperm.xlu1 %3980, %v2900_v44  }
 0x31e   : > { %2983 = vperm.xlu0 %3979, %v2908_v45  }
 0x321   : > { %2962 = vperm.xlu1 %3980, %v2901_v49  }
 0x322   : > { %2989 = vperm.xlu0 %3979, %v2910_v58   ;;  %v5229_v58 = vsub.s32 %v2865_v57, %v4859_v47 }
 0x325   : > { %2965 = vperm.xlu1 %3980, %v2902_v60   ;;  %v2886_v60 = vadd.s32 4294967176, %v5157_v63 }
 0x329   : > { %2968 = vperm.xlu1 %3980, %v2903_v61   ;;  %v2879_v61 = vadd.s32 4294967184, %v5157_v63 }
 0x32b   : > { %v2882_v63 = vsub.s32 %v2879_v61, %v4859_v47 }
 0x32d   : > { %2974 = vperm.xlu1 %3980, %v2905_v62  }
 0x331   : > { %2980 = vperm.xlu1 %3980, %v2907_v53  }
 0x335   : > { %2986 = vperm.xlu1 %3980, %v2909_v54   ;;  %v5236_v54 = vsub.s32 %v2872_v31, %v4859_v47 }
 0x369   : > { %v2726_v3 = vpop.xlane.xlu1 %2725  ;;  %v2720_v51 = vpop.xlane.xlu0 %2719 }
 0x36a   : > { %v2787_v59 = vrot.slane %v2720_v51, %v5163_v1  ;;  %v2799_v13 = vrot.slane %v2726_v3, %v5171_v46  ;;  %v5241_v51 = vsub.s32 %v2886_v60, %v4859_v47 }
 0x36d   : > { %v2729_v7 = vpop.xlane.xlu1 %2728  ;;  %v2723_v55 = vpop.xlane.xlu0 %2722 }
 0x36e   : > { %v2792_v8 = vrot.slane %v2723_v55, %v5167_v4  ;;  %v2806_v17 = vrot.slane %v2729_v7, %v5176_v6 }
 0x370   : > { %v2794_v18 = vsel %vm2793_vm2, %v2792_v8, %v2787_v59 }
 0x371   : > { %v2801_v19 = vsel %vm2800_vm3, %v2799_v13, %v2794_v18  ;;  %v2735_v20 = vpop.xlane.xlu1 %2734  ;;  %v2732_v21 = vpop.xlane.xlu0 %2731 }
 0x372   : > { %v2808_v22 = vsel %vm2807_vm4, %v2806_v17, %v2801_v19  ;;  %v2813_v23 = vrot.slane %v2732_v21, %v5180_v56  ;;  %v2820_v25 = vrot.slane %v2735_v20, %v5185_v14 }
 0x374   : > { %v2815_v12 = vsel %vm2814_vm5, %v2813_v23, %v2808_v22 }
 0x375   : > { %v2741_v26 = vpop.xlane.xlu1 %2740  ;;  %v2738_v27 = vpop.xlane.xlu0 %2737  ;;  %v2822_v34 = vsel %vm2821_vm6, %v2820_v25, %v2815_v12 }
 0x376   : > { %v2827_v28 = vrot.slane %v2738_v27, %v5194_v24  ;;  %v2834_v33 = vrot.slane %v2741_v26, %v5199_v11 }
 0x378   : > { %v2829_v37 = vsel %vm2828_vm7, %v2827_v28, %v2822_v34 }
 0x379   : > { %v2747_v38 = vpop.xlane.xlu1 %2746  ;;  %v2744_v39 = vpop.xlane.xlu0 %2743  ;;  %v2836_v41 = vsel %vm2835_vm8, %v2834_v33, %v2829_v37 }
 0x37a   : > { %v2841_v40 = vrot.slane %v2744_v39, %v5205_v30  ;;  %v2848_v29 = vrot.slane %v2747_v38, %v5211_v35 }
 0x37c   : > { %v2843_v43 = vsel %vm2842_vm9, %v2841_v40, %v2836_v41 }
 0x37d   : > { %v2753_v44 = vpop.xlane.xlu1 %2752  ;;  %v2750_v45 = vpop.xlane.xlu0 %2749  ;;  %v2850_v53 = vsel %vm2849_vm10, %v2848_v29, %v2843_v43 }
 0x37e   : > { %v2855_v49 = vrot.slane %v2750_v45, %v5217_v50  ;;  %v2862_v62 = vrot.slane %v2753_v44, %v5223_v42 }
 0x380   : > { %v2857_v0 = vsel %vm2856_vm11, %v2855_v49, %v2850_v53 }
 0x381   : > { %v2759_v48 = vpop.xlane.xlu1 %2758  ;;  %v2756_v2 = vpop.xlane.xlu0 %2755  ;;  %v2864_v5 = vsel %vm2863_vm12, %v2862_v62, %v2857_v0 }
 0x382   : > { %v2869_v3 = vrot.slane %v2756_v2, %v5229_v58  ;;  %v2876_v52 = vrot.slane %v2759_v48, %v5236_v54 }
 0x384   : > { %v2871_v59 = vsel %vm2870_vm13, %v2869_v3, %v2864_v5 }
 0x385   : > { %v2765_v7 = vpop.xlane.xlu1 %2764  ;;  %v2762_v55 = vpop.xlane.xlu0 %2761  ;;  %v2878_v13 = vsel %vm2877_vm14, %v2876_v52, %v2871_v59 }
 0x386   : > { %v2890_v8 = vrot.slane %v2765_v7, %v5241_v51  ;;  %v2883_v9 = vrot.slane %v2762_v55, %v2882_v63 }
 0x388   : > { %v2885_v16 = vsel %vm2884_vm15, %v2883_v9, %v2878_v13 }
 0x389   : > { %v2892_v47 = vsel %vm2891_vm0, %v2890_v8, %v2885_v16  ;;  %v2948_v17 = vpop.permute.xlu1 %2947 }
 0x38a   : > { %2894 = vst [vmem:[%s437_s0] sm:$0x1] %v2892_v47  ;;  %v2998_v10 = vrot.slane %v2948_v17, %v5167_v4 }
 0x38d   : > { %v2951_v18 = vpop.permute.xlu1 %2950  ;;  %v2945_v21 = vpop.permute.xlu0 %2944 }
 0x38e   : > { %v2994_v23 = vrot.slane %v2945_v21, %v5163_v1  ;;  %v3003_v15 = vrot.slane %v2951_v18, %v5171_v46 }
 0x390   : > { %v2999_v26 = vsel %vm2793_vm2, %v2998_v10, %v2994_v23 }
 0x391   : > { %v2954_v19 = vpop.permute.xlu1 %2953  ;;  %v2972_v12 = vpop.permute.xlu0 %2971  ;;  %v3004_v34 = vsel %vm2800_vm3, %v3003_v15, %v2999_v26 }
 0x392   : > { %v3008_v27 = vrot.slane %v2954_v19, %v5176_v6 }
 0x394   : > { %v3009_v1 = vsel %vm2807_vm4, %v3008_v27, %v3004_v34 }
 0x395   : > { %v2957_v20 = vpop.permute.xlu1 %2956  ;;  %v2978_v37 = vpop.permute.xlu0 %2977 }
 0x396   : > { %v3013_v28 = vrot.slane %v2957_v20, %v5180_v56  ;;  %v3048_v43 = vrot.slane %v2978_v37, %v5223_v42 }
 0x398   : > { %v3014_v46 = vsel %vm2814_vm5, %v3013_v28, %v3009_v1 }
 0x399   : > { %v2960_v22 = vpop.permute.xlu1 %2959  ;;  %v2984_v29 = vpop.permute.xlu0 %2983 }
 0x39a   : > { %v3018_v32 = vrot.slane %v2960_v22, %v5185_v14 }
 0x39c   : > { %v3019_v38 = vsel %vm2821_vm6, %v3018_v32, %v3014_v46 }
 0x39d   : > { %v2963_v25 = vpop.permute.xlu1 %2962  ;;  %v2990_v49 = vpop.permute.xlu0 %2989 }
 0x39e   : > { %v3023_v36 = vrot.slane %v2963_v25, %v5194_v24  ;;  %v3038_v24 = vrot.slane %v2972_v12, %v5211_v35  ;;  %v3058_v35 = vrot.slane %v2984_v29, %v5236_v54 }
 0x3a0   : > { %v3024_v6 = vsel %vm2828_vm7, %v3023_v36, %v3019_v38 }
 0x3a1   : > { %v2966_v33 = vpop.permute.xlu1 %2965 }
 0x3a2   : > { %v3028_v4 = vrot.slane %v2966_v33, %v5199_v11 }
 0x3a4   : > { %v3029_v14 = vsel %vm2835_vm8, %v3028_v4, %v3024_v6 }
 0x3a5   : > { %v2969_v39 = vpop.permute.xlu1 %2968 }
 0x3a6   : > { %v3033_v56 = vrot.slane %v2969_v39, %v5205_v30 }
 0x3a8   : > { %v3034_v40 = vsel %vm2842_vm9, %v3033_v56, %v3029_v14 }
 0x3a9   : > { %v2975_v57 = vpop.permute.xlu1 %2974  ;;  %v3039_v41 = vsel %vm2849_vm10, %v3038_v24, %v3034_v40 }
 0x3aa   : > { %v3043_v11 = vrot.slane %v2975_v57, %v5217_v50  ;;  %v3068_v50 = vrot.slane %v2990_v49, %v5241_v51 }
 0x3ac   : > { %v3044_v31 = vsel %vm2856_vm11, %v3043_v11, %v3039_v41 }
 0x3ad   : > { %v2981_v44 = vpop.permute.xlu1 %2980  ;;  %v3049_v45 = vsel %vm2863_vm12, %v3048_v43, %v3044_v31 }
 0x3ae   : > { %v3053_v30 = vrot.slane %v2981_v44, %v5229_v58 }
 0x3b0   : > { %v3054_v60 = vsel %vm2870_vm13, %v3053_v30, %v3049_v45 }
 0x3b1   : > { %v2987_v61 = vpop.permute.xlu1 %2986  ;;  %v3059_v53 = vsel %vm2877_vm14, %v3058_v35, %v3054_v60 }
 0x3b2   : > { %v3063_v62 = vrot.slane %v2987_v61, %v2882_v63 }
 0x3b4   : > { %v3064_v0 = vsel %vm2884_vm15, %v3063_v62, %v3059_v53 }
 0x3b5   : > { %v3069_v42 = vsel %vm2891_vm0, %v3068_v50, %v3064_v0 }
 0x3b6   : > { %3071 = vst [vmem:[%s443_s5] sm:$0x1] %v3069_v42 }
 0x3b7 PF: > { %s5499_s26 = sld [smem:[#allocation27_spill]]  ;;  %s3113_s6 = sshll.u32 %s437_s0, 4  ;;  %s3114_s6 = int_to_ptr.vmem [resolvable:$true] %s3113_s6 }
 0x3b8   : > { %s5500_s23 = sld [smem:[#allocation41_spill]]  ;;  %s5295_s10 = scalar_lea.sflag [#allocation15], %s368_s15 }
 0x3b9   : > { %s4093_s18 = scalar_lea.vmem %s3114_s6, 16  ;;  %s4314_s17 = smov [#allocation14]  }
 0x3ba   : > { %p4094_p6 = scmp.ne.s32.totalorder %s3114_s6, %s4093_s18  ;;  %s4097_s21 = sshll.u32 %s4314_s17, 4  ;;  %s4098_s21 = int_to_ptr.vmem [resolvable:$false] %s4097_s21 }
 0x3bb   : > { %s4099_s16 = scalar_lea.vmem %s4098_s21, 32  ;;  %p4100_p9 = scmp.lt.s32.totalorder %s3114_s6, %s4098_s21 }
 0x3bc   : > { %p4095_p10 = pnand %p4094_p6, %p4546_p11  ;;  %p4101_p13 = scmp.lt.s32.totalorder %s4099_s16, %s4093_s18 }
 0x3bd   : > { %s3552_s11 = sshll.u32 %s5499_s26, 4 }
 0x3be   : > { %s3111_s7 = scalar_lea.hbm %s5500_s23, %s3552_s11  ;;  %p4096_p0 = pneg %p4095_p10 }
 0x3bf   : > { %p4102_p4 = por %p4101_p13, %p4100_p9 }
 0x3c1   : > { %p4103_p2 = pnand %p4102_p4, %p4096_p0 }
 0x3c3   : > { %4106 = shalt.err (!%p4103_p2)
}
 0x3c4   : > { %s4107_s19 = scalar_lea.hbm %s3111_s7, 16  ;;  %s4111_s0 = scalar_lea.hbm %s5500_s23, 32 }
 0x3c5   : > { %p4108_p3 = scmp.ne.s32.totalorder %s3111_s7, %s4107_s19  ;;  %p4112_p8 = scmp.lt.s32.totalorder %s3111_s7, %s5500_s23 }
 0x3c6   : > { %p4113_p1 = scmp.lt.s32.totalorder %s4111_s0, %s4107_s19 }
 0x3c7   : > { %p4109_p7 = pnand %p4108_p3, %p4546_p11 }
 0x3c8   : > { %p4114_p6 = por %p4113_p1, %p4112_p8 }
 0x3c9   : > { %p4110_p5 = pneg %p4109_p7 }
 0x3cb   : > { %p4115_p10 = pnand %p4114_p6, %p4110_p5 }
 0x3cd   : > { %4118 = shalt.err (!%p4115_p10)
}
 0x3ce   : > { %s5501_s30 = sld [smem:[#allocation26_spill]]  ;;  %s3610_s18 = sshll.u32 %s5499_s26, 7 }
 0x3cf   : > { %3620 = dma.vmem_to_hbm [thread:$0]  (%p4546_p11), %s3114_s6, 16, %s3111_s7, %s5295_s10  }
 0x3d0   : > { %s3097_s21 = sshll.u32 %s4638_s13, 4  ;;  %s5502_s15 = sld [smem:[#allocation40_spill]]  ;;  %s5313_s21 = int_to_ptr.vmem [resolvable:$true] %s3097_s21 }
 0x3d1   : > { %s5322_s29 = scalar_lea.sflag [#allocation7], %s429_s27  ;;  %s4119_s9 = scalar_lea.vmem %s5313_s21, 4096 }
 0x3d2   : > { %p4120_p0 = scmp.ne.s32.totalorder %s5313_s21, %s4119_s9  ;;  %s4315_s13 = smov [#allocation13]  }
 0x3d3   : > { %s4123_s7 = sshll.u32 %s4315_s13, 4  ;;  %s4124_s7 = int_to_ptr.vmem [resolvable:$false] %s4123_s7 }
 0x3d4   : > { %s3549_s22 = sshll.u32 %s5501_s30, 2  ;;  %p4121_p9 = pnand %p4120_p0, %p4539_p12 }
 0x3d5   : > { %s3094_s17 = sadd.s32 %s3610_s18, %s3549_s22  ;;  %s4125_s6 = scalar_lea.vmem %s4124_s7, 8192 }
 0x3d6   : > { %s3551_s16 = sshll.u32 %s3094_s17, 6  ;;  %p4122_p13 = pneg %p4121_p9 }
 0x3d7   : > { %s5318_s0 = scalar_lea.hbm %s5502_s15, %s3551_s16  ;;  %p4126_p4 = scmp.lt.s32.totalorder %s5313_s21, %s4124_s7 }
 0x3d8   : > { %p4127_p2 = scmp.lt.s32.totalorder %s4125_s6, %s4119_s9 }
 0x3da   : > { %p4128_p3 = por %p4127_p2, %p4126_p4 }
 0x3dc   : > { %p4129_p7 = pnand %p4128_p3, %p4122_p13 }
 0x3de   : > { %4132 = shalt.err (!%p4129_p7)
}
 0x3df   : > { %s4133_s27 = scalar_lea.hbm %s5318_s0, 4096  ;;  %s4137_s18 = scalar_lea.hbm %s5502_s15, 16384 }
 0x3e0   : > { %p4134_p5 = scmp.ne.s32.totalorder %s5318_s0, %s4133_s27  ;;  %p4138_p6 = scmp.lt.s32.totalorder %s5318_s0, %s5502_s15 }
 0x3e1   : > { %p4139_p10 = scmp.lt.s32.totalorder %s4137_s18, %s4133_s27 }
 0x3e2   : > { %p4135_p8 = pnand %p4134_p5, %p4539_p12 }
 0x3e3   : > { %p4140_p0 = por %p4139_p10, %p4138_p6 }
 0x3e4   : > { %p4136_p1 = pneg %p4135_p8 }
 0x3e6   : > { %p4141_p9 = pnand %p4140_p0, %p4136_p1 }
 0x3e8   : > { %4144 = shalt.err (!%p4141_p9)
}
 0x3e9   : > { %s4316_s19 = smov 256   ;;  %s4317_s20 = smov 512  }
 0x3ea   : > { %s4318_s9 = smov 16   ;;  %s5503_s6 = sld [smem:[#allocation42_spill]] }
 0x3eb   : > { %3619 = dma.vmem_to_hbm [thread:$0]  (%p4539_p12), %s5313_s21, 4096, %s5318_s0, %s5322_s29, %s4316_s19, %s4317_s20, %s4318_s9  }
 0x3ec   : > { %s3126_s30 = sshll.u32 %s443_s5, 4  ;;  %s4319_s18 = smov [#allocation16]   ;;  %s3127_s30 = int_to_ptr.vmem [resolvable:$true] %s3126_s30 }
 0x3ed   : > { %s4145_s22 = scalar_lea.vmem %s3127_s30, 16  ;;  %s4149_s17 = sshll.u32 %s4319_s18, 4  ;;  %s4150_s17 = int_to_ptr.vmem [resolvable:$false] %s4149_s17 }
 0x3ee   : > { %p4146_p13 = scmp.ne.s32.totalorder %s3127_s30, %s4145_s22  ;;  %s4151_s16 = scalar_lea.vmem %s4150_s17, 32 }
 0x3ef   : > { %p4152_p3 = scmp.lt.s32.totalorder %s3127_s30, %s4150_s17  ;;  %p4153_p7 = scmp.lt.s32.totalorder %s4151_s16, %s4145_s22 }
 0x3f0   : > { %s3124_s27 = scalar_lea.hbm %s5503_s6, %s3552_s11  ;;  %p4147_p4 = pnand %p4146_p13, %p4546_p11 }
 0x3f1   : > { %p4154_p12 = por %p4153_p7, %p4152_p3 }
 0x3f2   : > { %p4148_p2 = pneg %p4147_p4 }
 0x3f4   : > { %p4155_p5 = pnand %p4154_p12, %p4148_p2 }
 0x3f6   : > { %4158 = shalt.err (!%p4155_p5)
}
 0x3f7   : > { %s4159_s1 = scalar_lea.hbm %s3124_s27, 16  ;;  %s4163_s26 = scalar_lea.hbm %s5503_s6, 32 }
 0x3f8   : > { %p4160_p8 = scmp.ne.s32.totalorder %s3124_s27, %s4159_s1  ;;  %p4164_p10 = scmp.lt.s32.totalorder %s3124_s27, %s5503_s6 }
 0x3f9   : > { %p4165_p0 = scmp.lt.s32.totalorder %s4163_s26, %s4159_s1 }
 0x3fa   : > { %p4161_p1 = pnand %p4160_p8, %p4546_p11 }
 0x3fb   : > { %p4166_p9 = por %p4165_p0, %p4164_p10 }
 0x3fc   : > { %p4162_p6 = pneg %p4161_p1 }
 0x3fe   : > { %p4167_p13 = pnand %p4166_p9, %p4162_p6 }
 0x400   : > { %4170 = shalt.err (!%p4167_p13)
}
 0x401   : > { %3621 = dma.vmem_to_hbm [thread:$0]  (%p4546_p11), %s3127_s30, 16, %s3124_s27, %s5295_s10  }
 0x402 PF: > { %s5504_s0 = sld [smem:[#allocation22_spill]]  ;;  %p3649_p4 = scmp.ge.s32.totalorder %s4301_s14, 2 }
 0x403   : > { %s5505_s29 = sld [smem:[#allocation35_spill]] }
 0x408   : > { %s3138_s19 = sand.u32 1, %s5504_s0  }
 0x409   : > { %p5506_p2 = scmp.ne.s32.totalorder %s5505_s29, 0  ;;  %s3139_s20 = scalar_lea.sflag [#allocation7], %s3138_s19 }
 0x40b   : > { %p3639_p3 = pnand %p3649_p4, %p5506_p2 }
 0x40d   : > { %p3640_p7 = pneg %p3639_p3 }
 0x40f   : > { %4240 = dma.done.wait (%p3640_p7), %s3139_s20, 4096  }
 0x410   : > { %4242 = vsyncadd (%p3640_p7), %s3139_s20, 4294963200  ;;  %s5507_s9 = sadd.s32 4294967294, %s4301_s14   ;;  %s5508_s13 = sld [smem:[#allocation36_spill]] }
 0x411   : > { %s3147_s7 = sand.u32 1, %s5507_s9  }
 0x412   : > { %s3148_s4 = scalar_lea.sflag [#allocation15], %s3147_s7 }
 0x416   : > { %p5509_p12 = scmp.ne.s32.totalorder %s5508_s13, 0 }
 0x418   : > { %p3642_p5 = pnand %p3649_p4, %p5509_p12 }
 0x41a   : > { %p3643_p8 = pneg %p3642_p5 }
 0x41c   : > { %4244 = dma.done.wait (%p3643_p8), %s3148_s4, 32  }
 0x41d   : > { %4246 = vsyncadd (%p3643_p8), %s3148_s4, 4294967264  ;;  %s33_s14 = sadd.s32 1, %s4301_s14   ;;  %s5511_s27 = sld [smem:[#allocation23_spill]] }
 0x41e   : > { %p5374_p11 = scmp.ge.s32.totalorder %s33_s14, 6   ;;  %s5512_s26 = sld [smem:[#allocation34_spill]] }
 0x41f   : > { %s5513_s30 = sld [smem:[#allocation24_spill]]  ;;  %s5521_s24 = smov %s4253_s25 }
 0x420   : > { %s5514_s29 = sld [smem:[#allocation32_spill]]  ;;  %s5527_s10 = smov %s4293_s12 }
 0x421   : > { %s5515_s22 = sld [smem:[#allocation25_spill]] }
 0x422   : > { %s5516_s9 = sld [smem:[#allocation33_spill]] }
 0x423   : > { %s5517_s11 = sld [smem:[#allocation28_spill]]  ;;  %s5522_s25 = smov %s5511_s27 }
 0x424   : > { %s5518_s18 = sld [smem:[#allocation29_spill]]  ;;  %s5523_s27 = smov %s4265_s28 }
 0x425   : > { %s5519_s13 = sld [smem:[#allocation31_spill]]  ;;  %s5524_s28 = smov %s5513_s30 }
 0x426   : > { %s5525_s30 = smov %s4277_s8  ;;  %32 = sbr.rel (!%p5374_p11) target bundleno = 23 (0x17), region = 162 }
 0x427   : > { %s5526_s8 = smov %s5515_s22 }
 0x42a   : > { %s5528_s12 = smov %s5518_s18 }
 0x42b   :  { %3160 = vsyncpa [#allocation6], 1 }
 0x42c   :  { %3162 = vsyncpa [#allocation6 + $0x1], 1 }
 0x42d   :  { %3163 = vsyncpa [#allocation9], 1 }
 0x42e   :  { %3165 = vsyncpa [#allocation9 + $0x1], 1 }
 0x42f   :  { %3166 = vsyncpa [#allocation12], 1 }
 0x430   :  { %3168 = vsyncpa [#allocation12 + $0x1], 1 }
 0x431   :  { %3169 = vsyncpa [#allocation7], 1 }
 0x432   :  { %3171 = vsyncpa [#allocation7 + $0x1], 1 }
 0x433   :  { %3172 = vsyncpa [#allocation15], 1 }
 0x434   :  { %3174 = vsyncpa [#allocation15 + $0x1], 1 }

</bundles_post_ra>
